<compile_context>
chip_gen: v7x
topology: tpu7x:2x2x1
jax: 0.10.0
libtpu: 0.0.40
codegen_flags: <defaults>
</compile_context>

<pallas_src>
import math

import jax
import jax.numpy as jnp
import numpy as np
from jax.experimental import pallas as pl
from jax.experimental.pallas import tpu as pltpu


# ----------------------------------------------------------------------------
# Host-side construction of the exact resampling matrices
# ----------------------------------------------------------------------------
def _adaptive_avg_pool_matrix(in_size, out_size):
    """(out_size, in_size) matrix reproducing nn.AdaptiveAvgPool2d per axis."""
    m = np.zeros((out_size, in_size), dtype=np.float32)
    for i in range(out_size):
        start = (i * in_size) // out_size                 # floor
        end = -((-(i + 1) * in_size) // out_size)         # ceil
        m[i, start:end] = 1.0 / (end - start)
    return m


def _bilinear_upsample_matrix(in_size, out_size, scale_factor):
    """(out_size, in_size) matrix reproducing F.interpolate bilinear, align_corners=False."""
    m = np.zeros((out_size, in_size), dtype=np.float32)
    scale = 1.0 / scale_factor                            # PyTorch uses 1/scale_factor
    for t in range(out_size):
        src = (t + 0.5) * scale - 0.5
        src = max(src, 0.0)
        i0 = min(int(np.floor(src)), in_size - 1)
        i1 = min(i0 + 1, in_size - 1)
        lam = src - i0
        m[t, i0] += 1.0 - lam
        m[t, i1] += lam
    return m


# ----------------------------------------------------------------------------
# Pallas kernel: one batch element per grid step
# ----------------------------------------------------------------------------
def _dpup_kernel(x_ref, mpoolT_ref, wc_ref, scale_ref, shift_ref, mupT_ref, o_ref):
    xb = x_ref[...]                                             # (C, H*W)
    # adaptive average pool as a matmul over flattened spatial dim
    pooled = jnp.dot(xb, mpoolT_ref[...],
                     preferred_element_type=jnp.float32)        # (C, 256)
    # 1x1 conv (no bias)
    y = jnp.dot(wc_ref[...], pooled,
                preferred_element_type=jnp.float32)             # (Cout, 256)
    # BatchNorm (eval, folded to scale/shift) + SiLU
    # TODO(synk): BatchNorm training-mode batch statistics are not implemented (eval fold only).
    y = y * scale_ref[...] + shift_ref[...]
    y = y * (1.0 / (1.0 + jnp.exp(-y)))                         # SiLU
    # bilinear upsample as a matmul over flattened 16x16 grid
    o_ref[...] = jnp.dot(y, mupT_ref[...],
                         preferred_element_type=jnp.float32).astype(o_ref.dtype)


# ----------------------------------------------------------------------------
# Wrapper
# ----------------------------------------------------------------------------
def dpup_forward(x, params):
    """x: (B, C, H, W) float32 -> (B, 256, Ho, Wo)."""
    B, C, H, W = x.shape
    S = H * W
    mpoolT = params["mpoolT"]          # (S, P)
    wc = params["wc"]                  # (Cout, C)
    bn_scale = params["bn_scale"]      # (Cout, 1)
    bn_shift = params["bn_shift"]      # (Cout, 1)
    mupT = params["mupT"]              # (P, T)
    P = mpoolT.shape[1]
    Cout = wc.shape[0]
    T = mupT.shape[1]
    Ho, Wo = params["out_hw"]

    x_flat = x.reshape(B, C, S)

    out = pl.pallas_call(
        _dpup_kernel,
        out_shape=jax.ShapeDtypeStruct((B, Cout, T), x.dtype),
        grid_spec=pltpu.PrefetchScalarGridSpec(
            num_scalar_prefetch=0,
            grid=(B,),
            in_specs=[
                pl.BlockSpec((None, C, S), lambda b: (b, 0, 0)),   # x (lead dim squeezed)
                pl.BlockSpec((S, P), lambda b: (0, 0)),            # pooling matrix^T
                pl.BlockSpec((Cout, C), lambda b: (0, 0)),         # conv weight
                pl.BlockSpec((Cout, 1), lambda b: (0, 0)),         # BN scale
                pl.BlockSpec((Cout, 1), lambda b: (0, 0)),         # BN shift
                pl.BlockSpec((P, T), lambda b: (0, 0)),            # upsample matrix^T
            ],
            out_specs=pl.BlockSpec((None, Cout, T), lambda b: (b, 0, 0)),
        ),
        compiler_params=pltpu.CompilerParams(
            dimension_semantics=("parallel",)),
    )(x_flat, mpoolT, wc, bn_scale, bn_shift, mupT)

    return out.reshape(B, Cout, Ho, Wo)


# ----------------------------------------------------------------------------
# Deterministic synthetic parameters (matching the module's shapes)
# ----------------------------------------------------------------------------
def make_params(key, c1, *, kernal=(16, 16), scale_factor=1.25, c2=256,
                in_hw=(32, 32), bn_eps=1e-3):
    H, W = in_hw
    K = kernal[0]                                   # AdaptiveAvgPool2d(kernal[0]) -> KxK
    Ho = int(math.floor(K * scale_factor))
    Wo = int(math.floor(K * scale_factor))

    Ph = _adaptive_avg_pool_matrix(H, K)            # (K, H)
    Pw = _adaptive_avg_pool_matrix(W, K)            # (K, W)
    Uh = _bilinear_upsample_matrix(K, Ho, scale_factor)   # (Ho, K)
    Uw = _bilinear_upsample_matrix(K, Wo, scale_factor)   # (Wo, K)

    # separable -> combined operators over flattened (row-major) spatial dims
    mpool = np.kron(Ph, Pw)                         # (K*K, H*W)
    mup = np.kron(Uh, Uw)                           # (Ho*Wo, K*K)

    k1, k2, k3, k4, k5 = jax.random.split(key, 5)
    lim = 1.0 / math.sqrt(c1)
    wc = jax.random.uniform(k1, (c2, c1), minval=-lim, maxval=lim,
                            dtype=jnp.float32)
    gamma = jax.random.uniform(k2, (c2,), minval=0.5, maxval=1.5, dtype=jnp.float32)
    beta = jax.random.uniform(k3, (c2,), minval=-0.1, maxval=0.1, dtype=jnp.float32)
    run_mean = jax.random.uniform(k4, (c2,), minval=-0.1, maxval=0.1, dtype=jnp.float32)
    run_var = jax.random.uniform(k5, (c2,), minval=0.5, maxval=1.5, dtype=jnp.float32)

    bn_scale = gamma / jnp.sqrt(run_var + bn_eps)
    bn_shift = beta - run_mean * bn_scale

    return dict(
        mpoolT=jnp.asarray(mpool.T),                # (H*W, K*K)
        mupT=jnp.asarray(mup.T),                    # (K*K, Ho*Wo)
        wc=wc,                                      # (256, c1)
        bn_scale=bn_scale.reshape(c2, 1),
        bn_shift=bn_shift.reshape(c2, 1),
        Ph=jnp.asarray(Ph), Pw=jnp.asarray(Pw),
        Uh=jnp.asarray(Uh), Uw=jnp.asarray(Uw),
        out_hw=(Ho, Wo),
    )


# ----------------------------------------------------------------------------
# Pure-JAX reference (separable form, mirrors the PyTorch forward)
# ----------------------------------------------------------------------------
def reference(x, params):
    hi = jax.lax.Precision.HIGHEST
    hp = jnp.einsum("ph,bchw->bcpw", params["Ph"], x, precision=hi)
    pooled = jnp.einsum("qw,bcpw->bcpq", params["Pw"], hp, precision=hi)
    y = jnp.einsum("oc,bcpq->bopq", params["wc"], pooled, precision=hi)
    y = y * params["bn_scale"].reshape(1, -1, 1, 1) + params["bn_shift"].reshape(1, -1, 1, 1)
    y = y * jax.nn.sigmoid(y)                                         # SiLU
    uh = jnp.einsum("tp,bopq->botq", params["Uh"], y, precision=hi)
    out = jnp.einsum("sq,botq->bots", params["Uw"], uh, precision=hi)
    return out


if __name__ == "__main__":
    B, c1, H, W = 2, 32, 32, 32                     # small NCHW input
    key = jax.random.PRNGKey(0)
    kx, kp = jax.random.split(key)
    x = jax.random.normal(kx, (B, c1, H, W), dtype=jnp.float32)
    params = make_params(kp, c1, kernal=(16, 16), scale_factor=1.25, in_hw=(H, W))

    out = dpup_forward(x, params)
    out = jax.block_until_ready(out)
    assert out.shape == (B, 256, 20, 20)

    ref = reference(x, params)
    np.testing.assert_allclose(np.asarray(out), np.asarray(ref),
                               rtol=1e-3, atol=1e-3)
    print("KERNEL_OK")
</pallas_src>

<mosaic_0001>
module attributes {stable_mosaic.version = 11 : i64} {
  func.func @_dpup_kernel(%arg0: i32, %arg1: memref<1x32x1024xf32, #tpu.memory_space<vmem>>, %arg2: memref<1024x256xf32, #tpu.memory_space<vmem>>, %arg3: memref<256x32xf32, #tpu.memory_space<vmem>>, %arg4: memref<256x1xf32, #tpu.memory_space<vmem>>, %arg5: memref<256x1xf32, #tpu.memory_space<vmem>>, %arg6: memref<256x400xf32, #tpu.memory_space<vmem>>, %arg7: memref<1x256x400xf32, #tpu.memory_space<vmem>>) attributes {dimension_semantics = [#tpu.dimension_semantics<parallel>], iteration_bounds = array<i64: 2>, scalar_prefetch = 0 : i64, scratch_operands = 0 : i64, tpu.core_type = #tpu.core_type<tc>, window_params = [{transform_indices = @transform_0, window_bounds = array<i64: 1, 32, 1024>}, {pipeline_mode = #tpu.pipeline_mode<synchronous>, transform_indices = @transform_1, window_bounds = array<i64: 1024, 256>}, {pipeline_mode = #tpu.pipeline_mode<synchronous>, transform_indices = @transform_2, window_bounds = array<i64: 256, 32>}, {pipeline_mode = #tpu.pipeline_mode<synchronous>, transform_indices = @transform_3, window_bounds = array<i64: 256, 1>}, {pipeline_mode = #tpu.pipeline_mode<synchronous>, transform_indices = @transform_4, window_bounds = array<i64: 256, 1>}, {pipeline_mode = #tpu.pipeline_mode<synchronous>, transform_indices = @transform_5, window_bounds = array<i64: 256, 400>}, {transform_indices = @transform_6, window_bounds = array<i64: 1, 256, 400>}]} {
    %c0 = arith.constant 0 : index
    %c0_0 = arith.constant 0 : index
    %c0_1 = arith.constant 0 : index
    %0 = vector.load %arg1[%c0, %c0_0, %c0_1] : memref<1x32x1024xf32, #tpu.memory_space<vmem>>, vector<1x32x1024xf32>
    %1 = vector.shape_cast %0 : vector<1x32x1024xf32> to vector<32x1024xf32>
    %c0_2 = arith.constant 0 : index
    %c0_3 = arith.constant 0 : index
    %2 = vector.load %arg2[%c0_2, %c0_3] : memref<1024x256xf32, #tpu.memory_space<vmem>>, vector<1024x256xf32>
    %cst = arith.constant dense<0.000000e+00> : vector<32x256xf32>
    %3 = tpu.matmul %1, %2, %cst {dimension_numbers = #tpu.dot_dimension_numbers<[1], [0], [0], [1], [0, 0, 1, 1], [], []>} : vector<32x1024xf32>, vector<1024x256xf32>, vector<32x256xf32> -> vector<32x256xf32>
    %c0_4 = arith.constant 0 : index
    %c0_5 = arith.constant 0 : index
    %4 = vector.load %arg3[%c0_4, %c0_5] : memref<256x32xf32, #tpu.memory_space<vmem>>, vector<256x32xf32>
    %cst_6 = arith.constant dense<0.000000e+00> : vector<256x256xf32>
    %5 = tpu.matmul %4, %3, %cst_6 {dimension_numbers = #tpu.dot_dimension_numbers<[1], [0], [0], [1], [0, 0, 1, 1], [], []>} : vector<256x32xf32>, vector<32x256xf32>, vector<256x256xf32> -> vector<256x256xf32>
    %c0_7 = arith.constant 0 : index
    %c0_8 = arith.constant 0 : index
    %6 = vector.load %arg4[%c0_7, %c0_8] : memref<256x1xf32, #tpu.memory_space<vmem>>, vector<256x1xf32>
    %7 = vector.broadcast %6 : vector<256x1xf32> to vector<256x256xf32>
    %8 = arith.mulf %5, %7 : vector<256x256xf32>
    %c0_9 = arith.constant 0 : index
    %c0_10 = arith.constant 0 : index
    %9 = vector.load %arg5[%c0_9, %c0_10] : memref<256x1xf32, #tpu.memory_space<vmem>>, vector<256x1xf32>
    %10 = vector.broadcast %9 : vector<256x1xf32> to vector<256x256xf32>
    %11 = arith.addf %8, %10 : vector<256x256xf32>
    %cst_11 = arith.constant 0.000000e+00 : f32
    %12 = vector.broadcast %cst_11 : f32 to vector<256x256xf32>
    %13 = arith.subf %12, %11 : vector<256x256xf32>
    %14 = math.exp %13 : vector<256x256xf32>
    %cst_12 = arith.constant 1.000000e+00 : f32
    %15 = vector.broadcast %cst_12 : f32 to vector<256x256xf32>
    %16 = arith.addf %15, %14 : vector<256x256xf32>
    %cst_13 = arith.constant 1.000000e+00 : f32
    %17 = vector.broadcast %cst_13 : f32 to vector<256x256xf32>
    %18 = arith.divf %17, %16 : vector<256x256xf32>
    %19 = arith.mulf %11, %18 : vector<256x256xf32>
    %c0_14 = arith.constant 0 : index
    %c0_15 = arith.constant 0 : index
    %20 = vector.load %arg6[%c0_14, %c0_15] : memref<256x400xf32, #tpu.memory_space<vmem>>, vector<256x400xf32>
    %cst_16 = arith.constant dense<0.000000e+00> : vector<256x400xf32>
    %21 = tpu.matmul %19, %20, %cst_16 {dimension_numbers = #tpu.dot_dimension_numbers<[1], [0], [0], [1], [0, 0, 1, 1], [], []>} : vector<256x256xf32>, vector<256x400xf32>, vector<256x400xf32> -> vector<256x400xf32>
    %c0_17 = arith.constant 0 : index
    %c0_18 = arith.constant 0 : index
    %c0_19 = arith.constant 0 : index
    %22 = vector.load %arg7[%c0_17, %c0_18, %c0_19] : memref<1x256x400xf32, #tpu.memory_space<vmem>>, vector<1x256x400xf32>
    %23 = vector.shape_cast %22 : vector<1x256x400xf32> to vector<256x400xf32>
    %24 = vector.shape_cast %21 : vector<256x400xf32> to vector<1x256x400xf32>
    tpu.vector_store %arg7[%c0_17, %c0_18, %c0_19], %24 {strides = array<i32>} : memref<1x256x400xf32, #tpu.memory_space<vmem>>, vector<1x256x400xf32>,
    return
  }
  func.func @transform_0(%arg0: i32) -> (i32, i32, i32) {
    %c0_i32 = arith.constant 0 : i32
    %c0_i32_0 = arith.constant 0 : i32
    %c0_i32_1 = arith.constant 0 : i32
    return %arg0, %c0_i32, %c0_i32_0 : i32, i32, i32
  }
  func.func @transform_1(%arg0: i32) -> (i32, i32) {
    %c0_i32 = arith.constant 0 : i32
    %c0_i32_0 = arith.constant 0 : i32
    %c0_i32_1 = arith.constant 0 : i32
    return %c0_i32, %c0_i32_0 : i32, i32
  }
  func.func @transform_2(%arg0: i32) -> (i32, i32) {
    %c0_i32 = arith.constant 0 : i32
    %c0_i32_0 = arith.constant 0 : i32
    %c0_i32_1 = arith.constant 0 : i32
    return %c0_i32, %c0_i32_0 : i32, i32
  }
  func.func @transform_3(%arg0: i32) -> (i32, i32) {
    %c0_i32 = arith.constant 0 : i32
    %c0_i32_0 = arith.constant 0 : i32
    %c0_i32_1 = arith.constant 0 : i32
    return %c0_i32, %c0_i32_0 : i32, i32
  }
  func.func @transform_4(%arg0: i32) -> (i32, i32) {
    %c0_i32 = arith.constant 0 : i32
    %c0_i32_0 = arith.constant 0 : i32
    %c0_i32_1 = arith.constant 0 : i32
    return %c0_i32, %c0_i32_0 : i32, i32
  }
  func.func @transform_5(%arg0: i32) -> (i32, i32) {
    %c0_i32 = arith.constant 0 : i32
    %c0_i32_0 = arith.constant 0 : i32
    %c0_i32_1 = arith.constant 0 : i32
    return %c0_i32, %c0_i32_0 : i32, i32
  }
  func.func @transform_6(%arg0: i32) -> (i32, i32, i32) {
    %c0_i32 = arith.constant 0 : i32
    %c0_i32_0 = arith.constant 0 : i32
    %c0_i32_1 = arith.constant 0 : i32
    return %arg0, %c0_i32, %c0_i32_0 : i32, i32, i32
  }
}

</mosaic_0001>

<bundles_post_ra>
// kernel: tpu_custom_call.1
= control target key start
LH: loop header
LB: loop body
LE: loop exit
PB: predicated region body
PF: predicated region fallthrough
CT: control target
= control target key end

     0   :  { %s3846_s21 = smov 0   ;;  %s6480_s0 = inlined_call_operand.vmem [shape: f32[2,32,1024], index: 0, kind: input, shape index: {}]   ;;  %s6481_s1 = inlined_call_operand.vmem [shape: f32[1024,256], index: 1, kind: input, shape index: {}]   ;;  %s6482_s2 = inlined_call_operand.vmem [shape: f32[256,32], index: 2, kind: input, shape index: {}]   ;;  %s6483_s3 = inlined_call_operand.vmem [shape: f32[256,1], index: 3, kind: input, shape index: {}]   ;;  %s6484_s4 = inlined_call_operand.vmem [shape: f32[256,1], index: 4, kind: input, shape index: {}]   ;;  %s6485_s5 = inlined_call_operand.vmem [shape: f32[256,400], index: 5, kind: input, shape index: {}]   ;;  %s6486_s6 = inlined_call_operand.vmem [shape: f32[2,256,400], index: 6, kind: output, shape index: {}]  }
   0x1 LB: > { %s3068_s22 = sadd.s32 4294967295, %s3807_s21   ;;  %p3072_p0 = scmp.ge.s32.totalorder %s3807_s21, 1  ;;  %s3807_s21 = sphi %s3846_s21, %s16_s21  }
   0x2   : > { %p212_p1 = scmp.lt.s32.totalorder %s3807_s21, 3 }
   0x4   : > { %p213_p2 = pnand %p3072_p0, %p212_p1 }
   0x6   : > { %216 = sbr.rel (%p213_p2) target bundleno = 1262 (0x4ee), region = 44 }
   0xd   : > { %v285_v0 = vld [vmem:[%s6481_s1 + $0x8] sm:$0xff]  ;;  %v287_v1 = vld [vmem:[%s6481_s1 + $0x18] sm:$0xff]  ;;  %v284_v2 = vld [vmem:[%s6481_s1] sm:$0xff]  ;;  %p242_p3 = scmp.lt.s32.totalorder %s3068_s22, 1  ;;  %vm928_vm0 = vcmask 261120   ;;  %vm2887_vm1 = vcmask 130048  }
   0xe   : > { %v3113_v3 = vpack.c.bf16 %v287_v1, %v285_v0  ;;  %v286_v4 = vld [vmem:[%s6481_s1 + $0x10] sm:$0xff]  ;;  %v289_v5 = vld [vmem:[%s6481_s1 + $0x28] sm:$0xff]  ;;  %v291_v6 = vld [vmem:[%s6481_s1 + $0x38] sm:$0xff] }
   0xf   : > { %v3115_v7 = vpack.c.bf16 %v286_v4, %v284_v2  ;;  %v3117_v8 = vpack.c.bf16 %v291_v6, %v289_v5  ;;  %v288_v9 = vld [vmem:[%s6481_s1 + $0x20] sm:$0xff]  ;;  %v290_v10 = vld [vmem:[%s6481_s1 + $0x30] sm:$0xff]  ;;  %v293_v11 = vld [vmem:[%s6481_s1 + $0x48] sm:$0xff]  ;;  %s6637_s22 = smov (!%p242_p3, %s3068_s22), 1 }
  0x10   : > { %3114 = vmatprep.subr.bf16.mxu0 %v3113_v3  ;;  %v295_v12 = vld [vmem:[%s6481_s1 + $0x58] sm:$0xff]  ;;  %v3119_v13 = vpack.c.bf16 %v290_v10, %v288_v9  ;;  %v292_v15 = vld [vmem:[%s6481_s1 + $0x40] sm:$0xff]  ;;  %v294_v16 = vld [vmem:[%s6481_s1 + $0x50] sm:$0xff]  ;;  %s3111_s23 = sshll.u32 %s6637_s22, 8  ;;  %s3112_s17 = sshll.u32 %s6637_s22, 10 }
  0x11   : > { %3116 = vmatpush1.bf16.msra.mxu0 %v3115_v7  ;;  %v3121_v14 = vpack.c.bf16 %v295_v12, %v293_v11  ;;  %v297_v17 = vld [vmem:[%s6481_s1 + $0x68] sm:$0xff]  ;;  %v299_v18 = vld [vmem:[%s6481_s1 + $0x78] sm:$0xff]  ;;  %v3123_v19 = vpack.c.bf16 %v294_v16, %v292_v15  ;;  %v296_v21 = vld [vmem:[%s6481_s1 + $0x60] sm:$0xff]  ;;  %s3942_s10 = scalar_lea.vmem %s6480_s0, %s3111_s23  ;;  %s6278_s20 = scalar_lea.vmem %s6486_s6, %s3112_s17 }
  0x12   : > { %3118 = vmatprep.subr.bf16.mxu0 %v3117_v8  ;;  %v3125_v20 = vpack.c.bf16 %v299_v18, %v297_v17  ;;  %v298_v22 = vld [vmem:[%s6481_s1 + $0x70] sm:$0xff]  ;;  %v301_v23 = vld [vmem:[%s6481_s1 + $0x88] sm:$0xff]  ;;  %v303_v24 = vld [vmem:[%s6481_s1 + $0x98] sm:$0xff] }
  0x13   : > { %v3127_v25 = vpack.c.bf16 %v298_v22, %v296_v21  ;;  %v3129_v26 = vpack.c.bf16 %v303_v24, %v301_v23  ;;  %v300_v27 = vld [vmem:[%s6481_s1 + $0x80] sm:$0xff]  ;;  %v302_v28 = vld [vmem:[%s6481_s1 + $0x90] sm:$0xff]  ;;  %v305_v29 = vld [vmem:[%s6481_s1 + $0xa8] sm:$0xff] }
  0x14   : > { %v307_v30 = vld [vmem:[%s6481_s1 + $0xb8] sm:$0xff]  ;;  %v3131_v31 = vpack.c.bf16 %v302_v28, %v300_v27  ;;  %v304_v33 = vld [vmem:[%s6481_s1 + $0xa0] sm:$0xff]  ;;  %v306_v34 = vld [vmem:[%s6481_s1 + $0xb0] sm:$0xff] }
  0x15   : > { %3120 = vmatpush1.bf16.msra.mxu0 %v3119_v13  ;;  %v3133_v32 = vpack.c.bf16 %v307_v30, %v305_v29  ;;  %v309_v35 = vld [vmem:[%s6481_s1 + $0xc8] sm:$0xff]  ;;  %v311_v36 = vld [vmem:[%s6481_s1 + $0xd8] sm:$0xff]  ;;  %v3135_v37 = vpack.c.bf16 %v306_v34, %v304_v33  ;;  %v308_v39 = vld [vmem:[%s6481_s1 + $0xc0] sm:$0xff] }
  0x16   : > { %3122 = vmatprep.subr.bf16.mxu0 %v3121_v14  ;;  %v3137_v38 = vpack.c.bf16 %v311_v36, %v309_v35  ;;  %v310_v40 = vld [vmem:[%s6481_s1 + $0xd0] sm:$0xff]  ;;  %v253_v41 = vld [vmem:[%s3942_s10 + $0x8] sm:$0xff]  ;;  %v315_v43 = vld [vmem:[%s6481_s1 + $0xf8] sm:$0xff] }
  0x17   : > { %v313_v42 = vld [vmem:[%s6481_s1 + $0xe8] sm:$0xff]  ;;  %604 = vmatprep.mubr.f32.mxu0 %v253_v41  ;;  %v3139_v44 = vpack.c.bf16 %v310_v40, %v308_v39  ;;  %v312_v46 = vld [vmem:[%s6481_s1 + $0xe0] sm:$0xff]  ;;  %v314_v47 = vld [vmem:[%s6481_s1 + $0xf0] sm:$0xff] }
  0x18   : > { %v3141_v45 = vpack.c.bf16 %v315_v43, %v313_v42  ;;  %v317_v48 = vld [vmem:[%s6481_s1 + $0x108] sm:$0xff]  ;;  %v319_v49 = vld [vmem:[%s6481_s1 + $0x118] sm:$0xff]  ;;  %v3143_v50 = vpack.c.bf16 %v314_v47, %v312_v46  ;;  %v316_v52 = vld [vmem:[%s6481_s1 + $0x100] sm:$0xff] }
  0x19   : > { %3124 = vmatpush1.bf16.msra.mxu0 %v3123_v19  ;;  %v3145_v51 = vpack.c.bf16 %v319_v49, %v317_v48  ;;  %v318_v53 = vld [vmem:[%s6481_s1 + $0x110] sm:$0xff]  ;;  %v321_v54 = vld [vmem:[%s6481_s1 + $0x128] sm:$0xff]  ;;  %v323_v55 = vld [vmem:[%s6481_s1 + $0x138] sm:$0xff] }
  0x1a   : > { %3126 = vmatprep.subr.bf16.mxu0 %v3125_v20  ;;  %v3147_v56 = vpack.c.bf16 %v318_v53, %v316_v52  ;;  %v3149_v57 = vpack.c.bf16 %v323_v55, %v321_v54  ;;  %v320_v58 = vld [vmem:[%s6481_s1 + $0x120] sm:$0xff]  ;;  %v322_v59 = vld [vmem:[%s6481_s1 + $0x130] sm:$0xff]  ;;  %v325_v60 = vld [vmem:[%s6481_s1 + $0x148] sm:$0xff] }
  0x1b   : > { %v327_v61 = vld [vmem:[%s6481_s1 + $0x158] sm:$0xff]  ;;  %v3151_v62 = vpack.c.bf16 %v322_v59, %v320_v58  ;;  %v324_v0 = vld [vmem:[%s6481_s1 + $0x140] sm:$0xff]  ;;  %v326_v1 = vld [vmem:[%s6481_s1 + $0x150] sm:$0xff] }
  0x1c   : > { %v3153_v63 = vpack.c.bf16 %v327_v61, %v325_v60  ;;  %v329_v2 = vld [vmem:[%s6481_s1 + $0x168] sm:$0xff]  ;;  %v331_v3 = vld [vmem:[%s6481_s1 + $0x178] sm:$0xff]  ;;  %v3155_v4 = vpack.c.bf16 %v326_v1, %v324_v0  ;;  %v328_v6 = vld [vmem:[%s6481_s1 + $0x160] sm:$0xff] }
  0x1d   : > { %3128 = vmatpush1.bf16.msra.mxu0 %v3127_v25  ;;  %v3157_v5 = vpack.c.bf16 %v331_v3, %v329_v2  ;;  %v330_v7 = vld [vmem:[%s6481_s1 + $0x170] sm:$0xff]  ;;  %v333_v8 = vld [vmem:[%s6481_s1 + $0x188] sm:$0xff]  ;;  %v335_v9 = vld [vmem:[%s6481_s1 + $0x198] sm:$0xff] }
  0x1e   : > { %3130 = vmatprep.subr.bf16.mxu0 %v3129_v26  ;;  %v3159_v10 = vpack.c.bf16 %v330_v7, %v328_v6  ;;  %v3161_v11 = vpack.c.bf16 %v335_v9, %v333_v8  ;;  %v332_v12 = vld [vmem:[%s6481_s1 + $0x180] sm:$0xff]  ;;  %v334_v13 = vld [vmem:[%s6481_s1 + $0x190] sm:$0xff]  ;;  %v337_v14 = vld [vmem:[%s6481_s1 + $0x1a8] sm:$0xff] }
  0x1f   : > { %v339_v15 = vld [vmem:[%s6481_s1 + $0x1b8] sm:$0xff]  ;;  %v3163_v16 = vpack.c.bf16 %v334_v13, %v332_v12  ;;  %v336_v18 = vld [vmem:[%s6481_s1 + $0x1a0] sm:$0xff]  ;;  %v338_v19 = vld [vmem:[%s6481_s1 + $0x1b0] sm:$0xff] }
  0x20   : > { %v3165_v17 = vpack.c.bf16 %v339_v15, %v337_v14  ;;  %v341_v20 = vld [vmem:[%s6481_s1 + $0x1c8] sm:$0xff]  ;;  %v343_v21 = vld [vmem:[%s6481_s1 + $0x1d8] sm:$0xff]  ;;  %v3167_v22 = vpack.c.bf16 %v338_v19, %v336_v18  ;;  %v340_v24 = vld [vmem:[%s6481_s1 + $0x1c0] sm:$0xff] }
  0x21   : > { %3132 = vmatpush1.bf16.msra.mxu0 %v3131_v31  ;;  %v3169_v23 = vpack.c.bf16 %v343_v21, %v341_v20  ;;  %v342_v25 = vld [vmem:[%s6481_s1 + $0x1d0] sm:$0xff]  ;;  %v345_v26 = vld [vmem:[%s6481_s1 + $0x1e8] sm:$0xff]  ;;  %v347_v27 = vld [vmem:[%s6481_s1 + $0x1f8] sm:$0xff] }
  0x22   : > { %3134 = vmatprep.subr.bf16.mxu0 %v3133_v32  ;;  %v3171_v28 = vpack.c.bf16 %v342_v25, %v340_v24  ;;  %v3173_v29 = vpack.c.bf16 %v347_v27, %v345_v26  ;;  %v344_v30 = vld [vmem:[%s6481_s1 + $0x1e0] sm:$0xff]  ;;  %v346_v31 = vld [vmem:[%s6481_s1 + $0x1f0] sm:$0xff]  ;;  %v349_v32 = vld [vmem:[%s6481_s1 + $0x208] sm:$0xff] }
  0x23   : > { %v351_v33 = vld [vmem:[%s6481_s1 + $0x218] sm:$0xff]  ;;  %v3175_v34 = vpack.c.bf16 %v346_v31, %v344_v30  ;;  %v348_v36 = vld [vmem:[%s6481_s1 + $0x200] sm:$0xff]  ;;  %v357_v46 = vld [vmem:[%s6481_s1 + $0x248] sm:$0xff] }
  0x24   : > { %v3177_v35 = vpack.c.bf16 %v351_v33, %v349_v32  ;;  %v355_v39 = vld [vmem:[%s6481_s1 + $0x238] sm:$0xff]  ;;  %v252_v40 = vld [vmem:[%s3942_s10] sm:$0xff]  ;;  %v358_v52 = vld [vmem:[%s6481_s1 + $0x250] sm:$0xff] }
  0x25   : > { %3136 = vmatpush1.bf16.msra.mxu0 %v3135_v37  ;;  %v350_v37 = vld [vmem:[%s6481_s1 + $0x210] sm:$0xff]  ;;  %v352_v43 = vld [vmem:[%s6481_s1 + $0x220] sm:$0xff]  ;;  %v359_v47 = vld [vmem:[%s6481_s1 + $0x258] sm:$0xff] }
  0x26   : > { %3138 = vmatprep.subr.bf16.mxu0 %v3137_v38  ;;  %v353_v38 = vld [vmem:[%s6481_s1 + $0x228] sm:$0xff]  ;;  %v3179_v41 = vpack.c.bf16 %v350_v37, %v348_v36  ;;  %v260_v49 = vld [vmem:[%s3942_s10 + $0x40] sm:$0xff]  ;;  %v363_v55 = vld [vmem:[%s6481_s1 + $0x278] sm:$0xff] }
  0x27   : > { %v3181_v42 = vpack.c.bf16 %v355_v39, %v353_v38  ;;  %v269_v53 = vld [vmem:[%s3942_s10 + $0x88] sm:$0xff]  ;;  %v360_v59 = vld [vmem:[%s6481_s1 + $0x260] sm:$0xff]  ;;  %v362_v60 = vld [vmem:[%s6481_s1 + $0x270] sm:$0xff] }
  0x28   : > { %v361_v54 = vld [vmem:[%s6481_s1 + $0x268] sm:$0xff]  ;;  %v3191_v0 = vpack.c.bf16 %v362_v60, %v360_v59  ;;  %v276_v1 = vld [vmem:[%s3942_s10 + $0xc0] sm:$0xff]  ;;  %v371_v7 = vld [vmem:[%s6481_s1 + $0x2b8] sm:$0xff] }
  0x29   : > { %3140 = vmatpush1.bf16.msra.mxu0 %v3139_v44  ;;  %v354_v44 = vld [vmem:[%s6481_s1 + $0x230] sm:$0xff]  ;;  %v3189_v58 = vpack.c.bf16 %v363_v55, %v361_v54  ;;  %v277_v61 = vld [vmem:[%s3942_s10 + $0xc8] sm:$0xff]  ;;  %v364_v3 = vld [vmem:[%s6481_s1 + $0x280] sm:$0xff] }
  0x2a   : > { %3142 = vmatprep.subr.bf16.mxu0 %v3141_v45  ;;  %v261_v45 = vld [vmem:[%s3942_s10 + $0x48] sm:$0xff]  ;;  %v3183_v48 = vpack.c.bf16 %v354_v44, %v352_v43  ;;  %v375_v13 = vld [vmem:[%s6481_s1 + $0x2d8] sm:$0xff]  ;;  %v402_v59 = vld [vmem:[%s6481_s1 + $0x3b0] sm:$0xff] }
  0x2b   : > { %v369_v6 = vld [vmem:[%s6481_s1 + $0x2a8] sm:$0xff]  ;;  %v379_v19 = vld [vmem:[%s6481_s1 + $0x2f8] sm:$0xff] }
  0x2c   : > { %v3197_v9 = vpack.c.bf16 %v371_v7, %v369_v6  ;;  %v373_v12 = vld [vmem:[%s6481_s1 + $0x2c8] sm:$0xff]  ;;  %v383_v25 = vld [vmem:[%s6481_s1 + $0x318] sm:$0xff]  ;;  %v408_v6 = vld [vmem:[%s6481_s1 + $0x3e0] sm:$0xff] }
  0x2d   : > { %3144 = vmatpush1.bf16.msra.mxu0 %v3143_v50  ;;  %v3185_v50 = vpack.c.bf16 %v359_v47, %v357_v46  ;;  %v3201_v15 = vpack.c.bf16 %v375_v13, %v373_v12  ;;  %v377_v18 = vld [vmem:[%s6481_s1 + $0x2e8] sm:$0xff]  ;;  %v387_v31 = vld [vmem:[%s6481_s1 + $0x338] sm:$0xff]  ;;  %v392_v46 = vld [vmem:[%s6481_s1 + $0x360] sm:$0xff] }
  0x2e   : > { %3146 = vmatprep.subr.bf16.mxu0 %v3145_v51  ;;  %v356_v51 = vld [vmem:[%s6481_s1 + $0x240] sm:$0xff]  ;;  %v3205_v21 = vpack.c.bf16 %v379_v19, %v377_v18  ;;  %v381_v24 = vld [vmem:[%s6481_s1 + $0x308] sm:$0xff]  ;;  %v391_v37 = vld [vmem:[%s6481_s1 + $0x358] sm:$0xff] }
  0x2f   : > { %v3209_v27 = vpack.c.bf16 %v383_v25, %v381_v24  ;;  %v385_v30 = vld [vmem:[%s6481_s1 + $0x328] sm:$0xff]  ;;  %v395_v43 = vld [vmem:[%s6481_s1 + $0x378] sm:$0xff]  ;;  %v394_v47 = vld [vmem:[%s6481_s1 + $0x370] sm:$0xff] }
  0x30   : > { %v3213_v33 = vpack.c.bf16 %v387_v31, %v385_v30  ;;  %v389_v36 = vld [vmem:[%s6481_s1 + $0x348] sm:$0xff]  ;;  %v403_v55 = vld [vmem:[%s6481_s1 + $0x3b8] sm:$0xff]  ;;  %v410_v7 = vld [vmem:[%s6481_s1 + $0x3f0] sm:$0xff] }
  0x31   : > { %3148 = vmatpush1.bf16.msra.mxu0 %v3147_v56  ;;  %v3187_v56 = vpack.c.bf16 %v358_v52, %v356_v51  ;;  %v3217_v39 = vpack.c.bf16 %v391_v37, %v389_v36  ;;  %v396_v52 = vld [vmem:[%s6481_s1 + $0x380] sm:$0xff]  ;;  %v401_v54 = vld [vmem:[%s6481_s1 + $0x3a8] sm:$0xff]  ;;  %v414_v13 = vld [vmem:[%s6481_s1 + $0x410] sm:$0xff] }
  0x32   : > { %3150 = vmatprep.subr.bf16.mxu0 %v3149_v57  ;;  %v268_v57 = vld [vmem:[%s3942_s10 + $0x80] sm:$0xff]  ;;  %v405_v60 = vld [vmem:[%s6481_s1 + $0x3c8] sm:$0xff]  ;;  %v262_v25 = vld [vmem:[%s3942_s10 + $0x50] sm:$0xff] }
  0x33   : > { %v412_v12 = vld [vmem:[%s6481_s1 + $0x400] sm:$0xff]  ;;  %v425_v30 = vld [vmem:[%s6481_s1 + $0x468] sm:$0xff]  ;;  %v427_v31 = vld [vmem:[%s6481_s1 + $0x478] sm:$0xff] }
  0x34   : > { %v416_v19 = vld [vmem:[%s6481_s1 + $0x420] sm:$0xff]  ;;  %v426_v36 = vld [vmem:[%s6481_s1 + $0x470] sm:$0xff]  ;;  %v279_v37 = vld [vmem:[%s3942_s10 + $0xd8] sm:$0xff] }
  0x35   : > { %3152 = vmatpush1.bf16.msra.mxu0 %v3151_v62  ;;  %v365_v62 = vld [vmem:[%s6481_s1 + $0x288] sm:$0xff] }
  0x36   : > { %3154 = vmatprep.subr.bf16.mxu0 %v3153_v63  ;;  %v367_v63 = vld [vmem:[%s6481_s1 + $0x298] sm:$0xff] }
  0x37   : > { %v3193_v2 = vpack.c.bf16 %v367_v63, %v365_v62 }
  0x39   : > { %3156 = vmatpush1.bf16.msra.mxu0 %v3155_v4  ;;  %v366_v4 = vld [vmem:[%s6481_s1 + $0x290] sm:$0xff] }
  0x3a   : > { %3158 = vmatprep.subr.bf16.mxu0 %v3157_v5  ;;  %v255_v5 = vld [vmem:[%s3942_s10 + $0x18] sm:$0xff]  ;;  %v3195_v8 = vpack.c.bf16 %v366_v4, %v364_v3 }
  0x3b   : > { %v411_v3 = vld [vmem:[%s6481_s1 + $0x3f8] sm:$0xff] }
  0x3d   : > { %3160 = vmatpush1.bf16.msra.mxu0 %v3159_v10  ;;  %v368_v10 = vld [vmem:[%s6481_s1 + $0x2a0] sm:$0xff] }
  0x3e   : > { %3162 = vmatprep.subr.bf16.mxu0 %v3161_v11  ;;  %v370_v11 = vld [vmem:[%s6481_s1 + $0x2b0] sm:$0xff] }
  0x3f   : > { %v3199_v14 = vpack.c.bf16 %v370_v11, %v368_v10  ;;  %v3239_v10 = vpack.c.bf16 %v410_v7, %v408_v6  ;;  %v442_v6 = vld [vmem:[%s6481_s1 + $0x4f0] sm:$0xff]  ;;  %v445_v7 = vld [vmem:[%s6481_s1 + $0x508] sm:$0xff] }
  0x41   : > { %3164 = vmatpush1.bf16.msra.mxu0 %v3163_v16  ;;  %v372_v16 = vld [vmem:[%s6481_s1 + $0x2c0] sm:$0xff] }
  0x42   : > { %3166 = vmatprep.subr.bf16.mxu0 %v3165_v17  ;;  %v374_v17 = vld [vmem:[%s6481_s1 + $0x2d0] sm:$0xff] }
  0x43   : > { %v3203_v20 = vpack.c.bf16 %v374_v17, %v372_v16  ;;  %v254_v16 = vld [vmem:[%s3942_s10 + $0x10] sm:$0xff]  ;;  %v3243_v17 = vpack.c.bf16 %v414_v13, %v412_v12  ;;  %v444_v13 = vld [vmem:[%s6481_s1 + $0x500] sm:$0xff] }
  0x45   : > { %3168 = vmatpush1.bf16.msra.mxu0 %v3167_v22  ;;  %v376_v22 = vld [vmem:[%s6481_s1 + $0x2e0] sm:$0xff] }
  0x46   : > { %3170 = vmatprep.subr.bf16.mxu0 %v3169_v23  ;;  %v378_v23 = vld [vmem:[%s6481_s1 + $0x2f0] sm:$0xff] }
  0x47   : > { %v3207_v26 = vpack.c.bf16 %v378_v23, %v376_v22  ;;  %v421_v22 = vld [vmem:[%s6481_s1 + $0x448] sm:$0xff]  ;;  %v423_v23 = vld [vmem:[%s6481_s1 + $0x458] sm:$0xff] }
  0x49   : > { %3172 = vmatpush1.bf16.msra.mxu0 %v3171_v28  ;;  %v380_v28 = vld [vmem:[%s6481_s1 + $0x300] sm:$0xff] }
  0x4a   : > { %3174 = vmatprep.subr.bf16.mxu0 %v3173_v29  ;;  %v382_v29 = vld [vmem:[%s6481_s1 + $0x310] sm:$0xff] }
  0x4b   : > { %v3211_v32 = vpack.c.bf16 %v382_v29, %v380_v28  ;;  %v422_v28 = vld [vmem:[%s6481_s1 + $0x450] sm:$0xff]  ;;  %v271_v29 = vld [vmem:[%s3942_s10 + $0x98] sm:$0xff] }
  0x4d   : > { %3176 = vmatpush1.bf16.msra.mxu0 %v3175_v34  ;;  %v384_v34 = vld [vmem:[%s6481_s1 + $0x320] sm:$0xff] }
  0x4e   : > { %3178 = vmatprep.subr.bf16.mxu0 %v3177_v35  ;;  %v386_v35 = vld [vmem:[%s6481_s1 + $0x330] sm:$0xff] }
  0x4f   : > { %v3215_v38 = vpack.c.bf16 %v386_v35, %v384_v34  ;;  %v3253_v34 = vpack.c.bf16 %v427_v31, %v425_v30  ;;  %v424_v35 = vld [vmem:[%s6481_s1 + $0x460] sm:$0xff] }
  0x50   : > { %605 = vmatmul.mubr.f32.vlgmr.msra.gmra.mrb[0].mxu0 %v252_v40  ;;  %v388_v40 = vld [vmem:[%s6481_s1 + $0x340] sm:$0xff] }
  0x51   : > { %3180 = vmatpush1.bf16.msra.mxu0 %v3179_v41  ;;  %610 = vmatprep.mubr.f32.mxu0 %v261_v45  ;;  %v390_v41 = vld [vmem:[%s6481_s1 + $0x350] sm:$0xff] }
  0x52   : > { %3182 = vmatprep.subr.bf16.mxu0 %v3181_v42  ;;  %v393_v42 = vld [vmem:[%s6481_s1 + $0x368] sm:$0xff]  ;;  %v3219_v44 = vpack.c.bf16 %v390_v41, %v388_v40  ;;  %v3255_v40 = vpack.c.bf16 %v426_v36, %v424_v35  ;;  %v278_v41 = vld [vmem:[%s3942_s10 + $0xd0] sm:$0xff]  ;;  %v463_v35 = vld [vmem:[%s6481_s1 + $0x598] sm:$0xff] }
  0x53   : > { %v3221_v45 = vpack.c.bf16 %v395_v43, %v393_v42  ;;  %v428_v43 = vld [vmem:[%s6481_s1 + $0x480] sm:$0xff] }
  0x54   : > { %611 = vmatmul.mubr.f32.gmra.mrb[2].mxu0 %v260_v49  ;;  %v399_v49 = vld [vmem:[%s6481_s1 + $0x398] sm:$0xff] }
  0x55   : > { %3184 = vmatpush1.bf16.msra.mxu0 %v3183_v48  ;;  %616 = vmatprep.mubr.f32.mxu0 %v269_v53  ;;  %v397_v48 = vld [vmem:[%s6481_s1 + $0x388] sm:$0xff]  ;;  %v398_v53 = vld [vmem:[%s6481_s1 + $0x390] sm:$0xff] }
  0x56   : > { %3186 = vmatprep.subr.bf16.mxu0 %v3185_v50  ;;  %v3223_v50 = vpack.c.bf16 %v394_v47, %v392_v46  ;;  %v3225_v51 = vpack.c.bf16 %v399_v49, %v397_v48  ;;  %v433_v46 = vld [vmem:[%s6481_s1 + $0x4a8] sm:$0xff]  ;;  %v435_v47 = vld [vmem:[%s6481_s1 + $0x4b8] sm:$0xff]  ;;  %v1282_v48 = vld [vmem:[%s6483_s3] sm:$0xff] }
  0x58   : > { %617 = vmatmul.mubr.f32.gmra.mrb[4].mxu0 %v268_v57  ;;  %v3229_v57 = vpack.c.bf16 %v403_v55, %v401_v54  ;;  %v3809_v54 = vmov 0   ;;  %v437_v55 = vld [vmem:[%s6481_s1 + $0x4c8] sm:$0xff] }
  0x59   : > { %3188 = vmatpush1.bf16.msra.mxu0 %v3187_v56  ;;  %622 = vmatprep.mubr.f32.mxu0 %v277_v61  ;;  %v3227_v56 = vpack.c.bf16 %v398_v53, %v396_v52  ;;  %v407_v61 = vld [vmem:[%s6481_s1 + $0x3d8] sm:$0xff]  ;;  %v432_v52 = vld [vmem:[%s6481_s1 + $0x4a0] sm:$0xff]  ;;  %v434_v53 = vld [vmem:[%s6481_s1 + $0x4b0] sm:$0xff] }
  0x5a   : > { %3190 = vmatprep.subr.bf16.mxu0 %v3189_v58  ;;  %v400_v58 = vld [vmem:[%s6481_s1 + $0x3a0] sm:$0xff]  ;;  %v3233_v63 = vpack.c.bf16 %v407_v61, %v405_v60  ;;  %3543 = vset.pattern.permute.xlu0 %v3809_v54 }
  0x5b   : > { %v3231_v62 = vpack.c.bf16 %v402_v59, %v400_v58  ;;  %1316 = vperm.xlu0 %3543, %v1282_v48   ;;  %3544 = vset.pattern.permute.xlu1 %v3809_v54  ;;  %v3263_v58 = vpack.c.bf16 %v434_v53, %v432_v52  ;;  %v1539_v59 = vld [vmem:[%s6484_s4 + $0x8] sm:$0xff]  ;;  %v436_v61 = vld [vmem:[%s6481_s1 + $0x4c0] sm:$0xff]  ;;  %v475_v53 = vld [vmem:[%s6481_s1 + $0x5f8] sm:$0xff] }
  0x5c   : > { %623 = vmatmul.mubr.f32.gmra.mrb[6].mxu0 %v276_v1  ;;  %v406_v1 = vld [vmem:[%s6481_s1 + $0x3d0] sm:$0xff]  ;;  %v473_v52 = vld [vmem:[%s6481_s1 + $0x5e8] sm:$0xff] }
  0x5d   : > { %3192 = vmatpush1.bf16.msra.mxu0 %v3191_v0  ;;  %693 = vmatprep.mubr.f32.mxu0 %v255_v5  ;;  %v404_v0 = vld [vmem:[%s6481_s1 + $0x3c0] sm:$0xff] }
  0x5e   : > { %3194 = vmatprep.subr.bf16.mxu0 %v3193_v2  ;;  %v409_v2 = vld [vmem:[%s6481_s1 + $0x3e8] sm:$0xff]  ;;  %v3235_v4 = vpack.c.bf16 %v406_v1, %v404_v0  ;;  %v443_v0 = vld [vmem:[%s6481_s1 + $0x4f8] sm:$0xff]  ;;  %v1284_v1 = vld [vmem:[%s6483_s3 + $0x10] sm:$0xff] }
  0x5f   : > { %v3237_v5 = vpack.c.bf16 %v411_v3, %v409_v2  ;;  %v1540_v3 = vld [vmem:[%s6484_s4 + $0x10] sm:$0xff] }
  0x61   : > { %3196 = vmatpush1.bf16.msra.mxu0 %v3195_v8  ;;  %v413_v8 = vld [vmem:[%s6481_s1 + $0x408] sm:$0xff] }
  0x62   : > { %3198 = vmatprep.subr.bf16.mxu0 %v3197_v9  ;;  %v415_v9 = vld [vmem:[%s6481_s1 + $0x418] sm:$0xff] }
  0x63   : > { %v3241_v11 = vpack.c.bf16 %v415_v9, %v413_v8  ;;  %v447_v8 = vld [vmem:[%s6481_s1 + $0x518] sm:$0xff] }
  0x64   : > { %v1285_v9 = vld [vmem:[%s6483_s3 + $0x18] sm:$0xff]  ;;  %v3273_v12 = vpack.c.bf16 %v447_v8, %v445_v7  ;;  %v265_v7 = vld [vmem:[%s3942_s10 + $0x68] sm:$0xff] }
  0x65   : > { %3200 = vmatpush1.bf16.msra.mxu0 %v3199_v14  ;;  %v417_v14 = vld [vmem:[%s6481_s1 + $0x428] sm:$0xff] }
  0x66   : > { %3202 = vmatprep.subr.bf16.mxu0 %v3201_v15  ;;  %v419_v15 = vld [vmem:[%s6481_s1 + $0x438] sm:$0xff]  ;;  %v485_v8 = vld [vmem:[%s6481_s1 + $0x648] sm:$0xff] }
  0x67   : > { %v3245_v18 = vpack.c.bf16 %v419_v15, %v417_v14  ;;  %v446_v14 = vld [vmem:[%s6481_s1 + $0x510] sm:$0xff]  ;;  %v449_v15 = vld [vmem:[%s6481_s1 + $0x528] sm:$0xff] }
  0x69   : > { %3204 = vmatpush1.bf16.msra.mxu0 %v3203_v20  ;;  %v418_v20 = vld [vmem:[%s6481_s1 + $0x430] sm:$0xff] }
  0x6a   : > { %3206 = vmatprep.subr.bf16.mxu0 %v3205_v21  ;;  %v263_v21 = vld [vmem:[%s3942_s10 + $0x58] sm:$0xff]  ;;  %v3247_v24 = vpack.c.bf16 %v418_v20, %v416_v19  ;;  %v448_v20 = vld [vmem:[%s6481_s1 + $0x520] sm:$0xff] }
  0x6d   : > { %3208 = vmatpush1.bf16.msra.mxu0 %v3207_v26  ;;  %v3249_v26 = vpack.c.bf16 %v423_v23, %v421_v22  ;;  %v453_v22 = vld [vmem:[%s6481_s1 + $0x548] sm:$0xff]  ;;  %v455_v23 = vld [vmem:[%s6481_s1 + $0x558] sm:$0xff] }
  0x6e   : > { %3210 = vmatprep.subr.bf16.mxu0 %v3209_v27  ;;  %v420_v27 = vld [vmem:[%s6481_s1 + $0x440] sm:$0xff] }
  0x71   : > { %3212 = vmatpush1.bf16.msra.mxu0 %v3211_v32  ;;  %v3251_v32 = vpack.c.bf16 %v422_v28, %v420_v27  ;;  %v454_v27 = vld [vmem:[%s6481_s1 + $0x550] sm:$0xff]  ;;  %v457_v28 = vld [vmem:[%s6481_s1 + $0x568] sm:$0xff] }
  0x72   : > { %3214 = vmatprep.subr.bf16.mxu0 %v3213_v33  ;;  %v270_v33 = vld [vmem:[%s3942_s10 + $0x90] sm:$0xff] }
  0x75   : > { %3216 = vmatpush1.bf16.msra.mxu0 %v3215_v38  ;;  %v429_v38 = vld [vmem:[%s6481_s1 + $0x488] sm:$0xff] }
  0x76   : > { %3218 = vmatprep.subr.bf16.mxu0 %v3217_v39  ;;  %v431_v39 = vld [vmem:[%s6481_s1 + $0x498] sm:$0xff] }
  0x77   : > { %v3257_v42 = vpack.c.bf16 %v431_v39, %v429_v38  ;;  %v460_v38 = vld [vmem:[%s6481_s1 + $0x580] sm:$0xff]  ;;  %v462_v39 = vld [vmem:[%s6481_s1 + $0x590] sm:$0xff] }
  0x79   : > { %3220 = vmatpush1.bf16.msra.mxu0 %v3219_v44  ;;  %v430_v44 = vld [vmem:[%s6481_s1 + $0x490] sm:$0xff] }
  0x7a   : > { %3222 = vmatprep.subr.bf16.mxu0 %v3221_v45  ;;  %v257_v45 = vld [vmem:[%s3942_s10 + $0x28] sm:$0xff]  ;;  %v3259_v49 = vpack.c.bf16 %v430_v44, %v428_v43  ;;  %v464_v44 = vld [vmem:[%s6481_s1 + $0x5a0] sm:$0xff] }
  0x7d   : > { %3224 = vmatpush1.bf16.msra.mxu0 %v3223_v50  ;;  %v1283_v50 = vld [vmem:[%s6483_s3 + $0x8] sm:$0xff] }
  0x7e   : > { %3226 = vmatprep.subr.bf16.mxu0 %v3225_v51  ;;  %v3261_v51 = vpack.c.bf16 %v435_v47, %v433_v46  ;;  %1321 = vperm.xlu1 %3544, %v1283_v50   ;;  %v469_v46 = vld [vmem:[%s6481_s1 + $0x5c8] sm:$0xff]  ;;  %v471_v47 = vld [vmem:[%s6481_s1 + $0x5d8] sm:$0xff]  ;;  %v468_v50 = vld [vmem:[%s6481_s1 + $0x5c0] sm:$0xff] }
  0x81   : > { %3228 = vmatpush1.bf16.msra.mxu0 %v3227_v56  ;;  %v439_v56 = vld [vmem:[%s6481_s1 + $0x4d8] sm:$0xff] }
  0x82   : > { %3230 = vmatprep.subr.bf16.mxu0 %v3229_v57  ;;  %v1538_v57 = vld [vmem:[%s6484_s4] sm:$0xff]  ;;  %v3265_v60 = vpack.c.bf16 %v439_v56, %v437_v55  ;;  %1577 = vperm.xlu1 %3544, %v1539_v59   ;;  %v3301_v55 = vpack.c.bf16 %v475_v53, %v473_v52  ;;  %v479_v59 = vld [vmem:[%s6481_s1 + $0x618] sm:$0xff] }
  0x83   : > { %1572 = vperm.xlu0 %3543, %v1538_v57   ;;  %v472_v56 = vld [vmem:[%s6481_s1 + $0x5e0] sm:$0xff]  ;;  %v474_v57 = vld [vmem:[%s6481_s1 + $0x5f0] sm:$0xff] }
  0x85   : > { %3232 = vmatpush1.bf16.msra.mxu0 %v3231_v62  ;;  %v438_v62 = vld [vmem:[%s6481_s1 + $0x4d0] sm:$0xff] }
  0x86   : > { %3234 = vmatprep.subr.bf16.mxu0 %v3233_v63  ;;  %v441_v63 = vld [vmem:[%s6481_s1 + $0x4e8] sm:$0xff]  ;;  %v3267_v2 = vpack.c.bf16 %v438_v62, %v436_v61  ;;  %1582 = vperm.xlu1 %3544, %v1540_v3   ;;  %v476_v62 = vld [vmem:[%s6481_s1 + $0x600] sm:$0xff] }
  0x87   : > { %1326 = vperm.xlu0 %3543, %v1284_v1   ;;  %v483_v1 = vld [vmem:[%s6481_s1 + $0x638] sm:$0xff] }
  0x89   : > { %3236 = vmatpush1.bf16.msra.mxu0 %v3235_v4  ;;  %v3269_v4 = vpack.c.bf16 %v443_v0, %v441_v63  ;;  %v478_v63 = vld [vmem:[%s6481_s1 + $0x610] sm:$0xff]  ;;  %v481_v0 = vld [vmem:[%s6481_s1 + $0x628] sm:$0xff] }
  0x8a   : > { %3238 = vmatprep.subr.bf16.mxu0 %v3237_v5  ;;  %v440_v5 = vld [vmem:[%s6481_s1 + $0x4e0] sm:$0xff]  ;;  %v3307_v3 = vpack.c.bf16 %v478_v63, %v476_v62  ;;  %v517_v62 = vld [vmem:[%s6481_s1 + $0x748] sm:$0xff]  ;;  %v519_v63 = vld [vmem:[%s6481_s1 + $0x758] sm:$0xff] }
  0x8b   : > { %1331 = vperm.xlu0 %3543, %v1285_v9   ;;  %v487_v9 = vld [vmem:[%s6481_s1 + $0x658] sm:$0xff] }
  0x8d   : > { %3240 = vmatpush1.bf16.msra.mxu0 %v3239_v10  ;;  %v3271_v10 = vpack.c.bf16 %v442_v6, %v440_v5  ;;  %v480_v5 = vld [vmem:[%s6481_s1 + $0x620] sm:$0xff]  ;;  %v482_v6 = vld [vmem:[%s6481_s1 + $0x630] sm:$0xff] }
  0x8e   : > { %3242 = vmatprep.subr.bf16.mxu0 %v3241_v11  ;;  %v1541_v11 = vld [vmem:[%s6484_s4 + $0x18] sm:$0xff] }
  0x8f   : > { %1587 = vperm.xlu1 %3544, %v1541_v11   ;;  %v264_v11 = vld [vmem:[%s3942_s10 + $0x60] sm:$0xff] }
  0x90   : > { %694 = vmatmul.mubr.f32.vlgmr.msra.gmra.mrb[0].mxu0 %v254_v16  ;;  %v451_v16 = vld [vmem:[%s6481_s1 + $0x538] sm:$0xff] }
  0x91   : > { %3244 = vmatpush1.bf16.msra.mxu0 %v3243_v17  ;;  %699 = vmatprep.mubr.f32.mxu0 %v263_v21  ;;  %v1286_v17 = vld [vmem:[%s6483_s3 + $0x20] sm:$0xff]  ;;  %v3277_v19 = vpack.c.bf16 %v451_v16, %v449_v15  ;;  %v450_v21 = vld [vmem:[%s6481_s1 + $0x530] sm:$0xff]  ;;  %v273_v15 = vld [vmem:[%s3942_s10 + $0xa8] sm:$0xff] }
  0x92   : > { %3246 = vmatprep.subr.bf16.mxu0 %v3245_v18  ;;  %v3275_v18 = vpack.c.bf16 %v446_v14, %v444_v13  ;;  %1336 = vperm.xlu0 %3543, %v1286_v17   ;;  %v484_v13 = vld [vmem:[%s6481_s1 + $0x640] sm:$0xff]  ;;  %v486_v14 = vld [vmem:[%s6481_s1 + $0x650] sm:$0xff]  ;;  %v489_v16 = vld [vmem:[%s6481_s1 + $0x668] sm:$0xff] }
  0x93   : > { %v491_v17 = vld [vmem:[%s6481_s1 + $0x678] sm:$0xff] }
  0x94   : > { %700 = vmatmul.mubr.f32.gmra.mrb[2].mxu0 %v262_v25  ;;  %v3281_v25 = vpack.c.bf16 %v455_v23, %v453_v22  ;;  %v490_v22 = vld [vmem:[%s6481_s1 + $0x670] sm:$0xff]  ;;  %v281_v23 = vld [vmem:[%s3942_s10 + $0xe8] sm:$0xff] }
  0x95   : > { %3248 = vmatpush1.bf16.msra.mxu0 %v3247_v24  ;;  %705 = vmatprep.mubr.f32.mxu0 %v271_v29  ;;  %v3279_v24 = vpack.c.bf16 %v450_v21, %v448_v20  ;;  %v459_v29 = vld [vmem:[%s6481_s1 + $0x578] sm:$0xff]  ;;  %v3317_v20 = vpack.c.bf16 %v491_v17, %v489_v16  ;;  %v488_v21 = vld [vmem:[%s6481_s1 + $0x660] sm:$0xff]  ;;  %v529_v16 = vld [vmem:[%s6481_s1 + $0x7a8] sm:$0xff] }
  0x96   : > { %3250 = vmatprep.subr.bf16.mxu0 %v3249_v26  ;;  %v452_v26 = vld [vmem:[%s6481_s1 + $0x540] sm:$0xff]  ;;  %v3285_v31 = vpack.c.bf16 %v459_v29, %v457_v28  ;;  %v531_v17 = vld [vmem:[%s6481_s1 + $0x7b8] sm:$0xff] }
  0x97   : > { %v3283_v30 = vpack.c.bf16 %v454_v27, %v452_v26  ;;  %v3319_v26 = vpack.c.bf16 %v490_v22, %v488_v21  ;;  %v280_v27 = vld [vmem:[%s3942_s10 + $0xe0] sm:$0xff]  ;;  %v530_v21 = vld [vmem:[%s6481_s1 + $0x7b0] sm:$0xff]  ;;  %v533_v22 = vld [vmem:[%s6481_s1 + $0x7c8] sm:$0xff] }
  0x98   : > { %706 = vmatmul.mubr.f32.gmra.mrb[4].mxu0 %v270_v33  ;;  %v458_v33 = vld [vmem:[%s6481_s1 + $0x570] sm:$0xff]  ;;  %v492_v29 = vld [vmem:[%s6481_s1 + $0x680] sm:$0xff] }
  0x99   : > { %3252 = vmatpush1.bf16.msra.mxu0 %v3251_v32  ;;  %711 = vmatprep.mubr.f32.mxu0 %v279_v37  ;;  %v456_v32 = vld [vmem:[%s6481_s1 + $0x560] sm:$0xff] }
  0x9a   : > { %3254 = vmatprep.subr.bf16.mxu0 %v3253_v34  ;;  %v461_v34 = vld [vmem:[%s6481_s1 + $0x588] sm:$0xff]  ;;  %v3287_v36 = vpack.c.bf16 %v458_v33, %v456_v32  ;;  %v499_v33 = vld [vmem:[%s6481_s1 + $0x6b8] sm:$0xff] }
  0x9b   : > { %v3289_v37 = vpack.c.bf16 %v463_v35, %v461_v34  ;;  %v497_v32 = vld [vmem:[%s6481_s1 + $0x6a8] sm:$0xff] }
  0x9c   : > { %712 = vmatmul.mubr.f32.gmra.mrb[6].mxu0 %v278_v41  ;;  %v467_v41 = vld [vmem:[%s6481_s1 + $0x5b8] sm:$0xff]  ;;  %v3325_v35 = vpack.c.bf16 %v499_v33, %v497_v32  ;;  %v536_v32 = vld [vmem:[%s6481_s1 + $0x7e0] sm:$0xff]  ;;  %v538_v33 = vld [vmem:[%s6481_s1 + $0x7f0] sm:$0xff] }
  0x9d   : > { %3256 = vmatpush1.bf16.msra.mxu0 %v3255_v40  ;;  %782 = vmatprep.mubr.f32.mxu0 %v257_v45  ;;  %v465_v40 = vld [vmem:[%s6481_s1 + $0x5a8] sm:$0xff]  ;;  %v466_v45 = vld [vmem:[%s6481_s1 + $0x5b0] sm:$0xff] }
  0x9e   : > { %3258 = vmatprep.subr.bf16.mxu0 %v3257_v42  ;;  %v3291_v42 = vpack.c.bf16 %v462_v39, %v460_v38  ;;  %v3293_v43 = vpack.c.bf16 %v467_v41, %v465_v40  ;;  %v3295_v48 = vpack.c.bf16 %v466_v45, %v464_v44  ;;  %v501_v38 = vld [vmem:[%s6481_s1 + $0x6c8] sm:$0xff]  ;;  %v503_v39 = vld [vmem:[%s6481_s1 + $0x6d8] sm:$0xff] }
  0x9f   : > { %v3329_v41 = vpack.c.bf16 %v503_v39, %v501_v38  ;;  %v505_v44 = vld [vmem:[%s6481_s1 + $0x6e8] sm:$0xff]  ;;  %v507_v45 = vld [vmem:[%s6481_s1 + $0x6f8] sm:$0xff]  ;;  %v274_v39 = vld [vmem:[%s3942_s10 + $0xb0] sm:$0xff] }
  0xa0   : > { %v275_v38 = vld [vmem:[%s3942_s10 + $0xb8] sm:$0xff] }
  0xa1   : > { %3260 = vmatpush1.bf16.msra.mxu0 %v3259_v49  ;;  %v3297_v49 = vpack.c.bf16 %v471_v47, %v469_v46  ;;  %v3333_v47 = vpack.c.bf16 %v507_v45, %v505_v44  ;;  %v1543_v44 = vld [vmem:[%s6484_s4 + $0x28] sm:$0xff]  ;;  %v1288_v45 = vld [vmem:[%s6483_s3 + $0x30] sm:$0xff] }
  0xa2   : > { %3262 = vmatprep.subr.bf16.mxu0 %v3261_v51  ;;  %v470_v51 = vld [vmem:[%s6481_s1 + $0x5d0] sm:$0xff] }
  0xa3   : > { %v3299_v54 = vpack.c.bf16 %v470_v51, %v468_v50  ;;  %v509_v50 = vld [vmem:[%s6481_s1 + $0x708] sm:$0xff]  ;;  %v511_v51 = vld [vmem:[%s6481_s1 + $0x718] sm:$0xff] }
  0xa4   : > { %v3337_v53 = vpack.c.bf16 %v511_v51, %v509_v50  ;;  %v1546_v50 = vld [vmem:[%s6484_s4 + $0x40] sm:$0xff]  ;;  %v1291_v51 = vld [vmem:[%s6483_s3 + $0x48] sm:$0xff] }
  0xa5   : > { %3264 = vmatpush1.bf16.msra.mxu0 %v3263_v58  ;;  %v477_v58 = vld [vmem:[%s6481_s1 + $0x608] sm:$0xff] }
  0xa6   : > { %3266 = vmatprep.subr.bf16.mxu0 %v3265_v60  ;;  %v3303_v60 = vpack.c.bf16 %v474_v57, %v472_v56  ;;  %v3305_v61 = vpack.c.bf16 %v479_v59, %v477_v58  ;;  %v513_v56 = vld [vmem:[%s6481_s1 + $0x728] sm:$0xff]  ;;  %v515_v57 = vld [vmem:[%s6481_s1 + $0x738] sm:$0xff] }
  0xa7   : > { %v3341_v59 = vpack.c.bf16 %v515_v57, %v513_v56  ;;  %v1293_v56 = vld [vmem:[%s6483_s3 + $0x58] sm:$0xff] }
  0xa8   : > { %v1549_v57 = vld [vmem:[%s6484_s4 + $0x58] sm:$0xff] }
  0xa9   : > { %3268 = vmatpush1.bf16.msra.mxu0 %v3267_v2  ;;  %v256_v2 = vld [vmem:[%s3942_s10 + $0x20] sm:$0xff] }
  0xaa   : > { %3270 = vmatprep.subr.bf16.mxu0 %v3269_v4  ;;  %v3309_v4 = vpack.c.bf16 %v483_v1, %v481_v0  ;;  %v3345_v1 = vpack.c.bf16 %v519_v63, %v517_v62  ;;  %v1296_v62 = vld [vmem:[%s6483_s3 + $0x70] sm:$0xff] }
  0xab   : > { %v1552_v63 = vld [vmem:[%s6484_s4 + $0x70] sm:$0xff] }
  0xad   : > { %3272 = vmatpush1.bf16.msra.mxu0 %v3271_v10  ;;  %v3311_v10 = vpack.c.bf16 %v482_v6, %v480_v5  ;;  %v523_v5 = vld [vmem:[%s6481_s1 + $0x778] sm:$0xff] }
  0xae   : > { %3274 = vmatprep.subr.bf16.mxu0 %v3273_v12  ;;  %v3313_v12 = vpack.c.bf16 %v487_v9, %v485_v8  ;;  %v520_v8 = vld [vmem:[%s6481_s1 + $0x760] sm:$0xff]  ;;  %v522_v9 = vld [vmem:[%s6481_s1 + $0x770] sm:$0xff] }
  0xb1   : > { %3276 = vmatpush1.bf16.msra.mxu0 %v3275_v18  ;;  %v3315_v18 = vpack.c.bf16 %v486_v14, %v484_v13  ;;  %v524_v14 = vld [vmem:[%s6481_s1 + $0x780] sm:$0xff] }
  0xb2   : > { %3278 = vmatprep.subr.bf16.mxu0 %v3277_v19  ;;  %v272_v19 = vld [vmem:[%s3942_s10 + $0xa0] sm:$0xff] }
  0xb5   : > { %3280 = vmatpush1.bf16.msra.mxu0 %v3279_v24  ;;  %v493_v24 = vld [vmem:[%s6481_s1 + $0x688] sm:$0xff] }
  0xb6   : > { %3282 = vmatprep.subr.bf16.mxu0 %v3281_v25  ;;  %v495_v25 = vld [vmem:[%s6481_s1 + $0x698] sm:$0xff] }
  0xb7   : > { %v3321_v28 = vpack.c.bf16 %v495_v25, %v493_v24 }
  0xb9   : > { %3284 = vmatpush1.bf16.msra.mxu0 %v3283_v30  ;;  %v494_v30 = vld [vmem:[%s6481_s1 + $0x690] sm:$0xff] }
  0xba   : > { %3286 = vmatprep.subr.bf16.mxu0 %v3285_v31  ;;  %v259_v31 = vld [vmem:[%s3942_s10 + $0x38] sm:$0xff]  ;;  %v3323_v34 = vpack.c.bf16 %v494_v30, %v492_v29 }
  0xbb   : > { %v539_v29 = vld [vmem:[%s6481_s1 + $0x7f8] sm:$0xff] }
  0xbd   : > { %3288 = vmatpush1.bf16.msra.mxu0 %v3287_v36  ;;  %v496_v36 = vld [vmem:[%s6481_s1 + $0x6a0] sm:$0xff] }
  0xbe   : > { %3290 = vmatprep.subr.bf16.mxu0 %v3289_v37  ;;  %v498_v37 = vld [vmem:[%s6481_s1 + $0x6b0] sm:$0xff] }
  0xbf   : > { %v3327_v40 = vpack.c.bf16 %v498_v37, %v496_v36  ;;  %v267_v36 = vld [vmem:[%s3942_s10 + $0x78] sm:$0xff]  ;;  %v266_v37 = vld [vmem:[%s3942_s10 + $0x70] sm:$0xff] }
  0xc1   : > { %3292 = vmatpush1.bf16.msra.mxu0 %v3291_v42  ;;  %v500_v42 = vld [vmem:[%s6481_s1 + $0x6c0] sm:$0xff] }
  0xc2   : > { %3294 = vmatprep.subr.bf16.mxu0 %v3293_v43  ;;  %v502_v43 = vld [vmem:[%s6481_s1 + $0x6d0] sm:$0xff] }
  0xc3   : > { %v3331_v46 = vpack.c.bf16 %v502_v43, %v500_v42  ;;  %v1542_v42 = vld [vmem:[%s6484_s4 + $0x20] sm:$0xff]  ;;  %v1287_v43 = vld [vmem:[%s6483_s3 + $0x28] sm:$0xff] }
  0xc4   : > { %1592 = vperm.xlu1 %3544, %v1542_v42   ;;  %1341 = vperm.xlu0 %3543, %v1287_v43   ;;  %v2243_v42 = vld [vmem:[%s6485_s5 + $0x8] sm:$0xff] }
  0xc5   : > { %3296 = vmatpush1.bf16.msra.mxu0 %v3295_v48  ;;  %v504_v48 = vld [vmem:[%s6481_s1 + $0x6e0] sm:$0xff]  ;;  %v2247_v43 = vld [vmem:[%s6485_s5 + $0x28] sm:$0xff] }
  0xc6   : > { %3298 = vmatprep.subr.bf16.mxu0 %v3297_v49  ;;  %v506_v49 = vld [vmem:[%s6481_s1 + $0x6f0] sm:$0xff] }
  0xc7   : > { %v3335_v52 = vpack.c.bf16 %v506_v49, %v504_v48  ;;  %v1545_v48 = vld [vmem:[%s6484_s4 + $0x38] sm:$0xff]  ;;  %v1290_v49 = vld [vmem:[%s6483_s3 + $0x40] sm:$0xff] }
  0xc8   : > { %1597 = vperm.xlu1 %3544, %v1543_v44   ;;  %1346 = vperm.xlu0 %3543, %v1288_v45  }
  0xc9   : > { %3300 = vmatpush1.bf16.msra.mxu0 %v3299_v54  ;;  %v508_v54 = vld [vmem:[%s6481_s1 + $0x700] sm:$0xff] }
  0xca   : > { %3302 = vmatprep.subr.bf16.mxu0 %v3301_v55  ;;  %v510_v55 = vld [vmem:[%s6481_s1 + $0x710] sm:$0xff] }
  0xcb   : > { %v3339_v58 = vpack.c.bf16 %v510_v55, %v508_v54  ;;  %v1292_v54 = vld [vmem:[%s6483_s3 + $0x50] sm:$0xff] }
  0xcc   : > { %v1548_v55 = vld [vmem:[%s6484_s4 + $0x50] sm:$0xff] }
  0xcd   : > { %3304 = vmatpush1.bf16.msra.mxu0 %v3303_v60  ;;  %v512_v60 = vld [vmem:[%s6481_s1 + $0x720] sm:$0xff] }
  0xce   : > { %3306 = vmatprep.subr.bf16.mxu0 %v3305_v61  ;;  %v514_v61 = vld [vmem:[%s6481_s1 + $0x730] sm:$0xff] }
  0xcf   : > { %v3343_v0 = vpack.c.bf16 %v514_v61, %v512_v60  ;;  %v1295_v60 = vld [vmem:[%s6483_s3 + $0x68] sm:$0xff] }
  0xd0   : > { %783 = vmatmul.mubr.f32.vlgmr.msra.gmra.mrb[0].mxu0 %v256_v2  ;;  %v516_v2 = vld [vmem:[%s6481_s1 + $0x740] sm:$0xff]  ;;  %v1551_v61 = vld [vmem:[%s6484_s4 + $0x68] sm:$0xff] }
  0xd1   : > { %3308 = vmatpush1.bf16.msra.mxu0 %v3307_v3  ;;  %788 = vmatprep.mubr.f32.mxu0 %v265_v7  ;;  %v518_v3 = vld [vmem:[%s6481_s1 + $0x750] sm:$0xff] }
  0xd2   : > { %3310 = vmatprep.subr.bf16.mxu0 %v3309_v4  ;;  %v521_v4 = vld [vmem:[%s6481_s1 + $0x768] sm:$0xff]  ;;  %v3347_v6 = vpack.c.bf16 %v518_v3, %v516_v2  ;;  %v1298_v2 = vld [vmem:[%s6483_s3 + $0x80] sm:$0xff] }
  0xd3   : > { %v3349_v7 = vpack.c.bf16 %v523_v5, %v521_v4  ;;  %v1554_v3 = vld [vmem:[%s6484_s4 + $0x80] sm:$0xff]  ;;  %v1299_v4 = vld [vmem:[%s6483_s3 + $0x88] sm:$0xff] }
  0xd4   : > { %789 = vmatmul.mubr.f32.gmra.mrb[2].mxu0 %v264_v11  ;;  %v527_v11 = vld [vmem:[%s6481_s1 + $0x798] sm:$0xff]  ;;  %v1555_v5 = vld [vmem:[%s6484_s4 + $0x88] sm:$0xff] }
  0xd5   : > { %3312 = vmatpush1.bf16.msra.mxu0 %v3311_v10  ;;  %794 = vmatprep.mubr.f32.mxu0 %v273_v15  ;;  %v525_v10 = vld [vmem:[%s6481_s1 + $0x788] sm:$0xff]  ;;  %v526_v15 = vld [vmem:[%s6481_s1 + $0x790] sm:$0xff] }
  0xd6   : > { %3314 = vmatprep.subr.bf16.mxu0 %v3313_v12  ;;  %v3351_v12 = vpack.c.bf16 %v522_v9, %v520_v8  ;;  %v3353_v13 = vpack.c.bf16 %v527_v11, %v525_v10  ;;  %v1301_v8 = vld [vmem:[%s6483_s3 + $0x98] sm:$0xff]  ;;  %v1302_v10 = vld [vmem:[%s6483_s3 + $0xa0] sm:$0xff] }
  0xd7   : > { %v1557_v9 = vld [vmem:[%s6484_s4 + $0x98] sm:$0xff]  ;;  %v1558_v11 = vld [vmem:[%s6484_s4 + $0xa0] sm:$0xff] }
  0xd8   : > { %795 = vmatmul.mubr.f32.gmra.mrb[4].mxu0 %v272_v19  ;;  %v3357_v19 = vpack.c.bf16 %v531_v17, %v529_v16  ;;  %v1305_v16 = vld [vmem:[%s6483_s3 + $0xb8] sm:$0xff] }
  0xd9   : > { %3316 = vmatpush1.bf16.msra.mxu0 %v3315_v18  ;;  %800 = vmatprep.mubr.f32.mxu0 %v281_v23  ;;  %v3355_v18 = vpack.c.bf16 %v526_v15, %v524_v14  ;;  %v535_v23 = vld [vmem:[%s6481_s1 + $0x7d8] sm:$0xff]  ;;  %v1304_v14 = vld [vmem:[%s6483_s3 + $0xb0] sm:$0xff] }
  0xda   : > { %3318 = vmatprep.subr.bf16.mxu0 %v3317_v20  ;;  %v528_v20 = vld [vmem:[%s6481_s1 + $0x7a0] sm:$0xff]  ;;  %v3361_v25 = vpack.c.bf16 %v535_v23, %v533_v22  ;;  %v1560_v15 = vld [vmem:[%s6484_s4 + $0xb0] sm:$0xff]  ;;  %v1561_v17 = vld [vmem:[%s6484_s4 + $0xb8] sm:$0xff] }
  0xdb   : > { %v3359_v24 = vpack.c.bf16 %v530_v21, %v528_v20  ;;  %v1307_v20 = vld [vmem:[%s6483_s3 + $0xc8] sm:$0xff]  ;;  %v1308_v22 = vld [vmem:[%s6483_s3 + $0xd0] sm:$0xff] }
  0xdc   : > { %801 = vmatmul.mubr.f32.gmra.mrb[6].mxu0 %v280_v27  ;;  %v534_v27 = vld [vmem:[%s6481_s1 + $0x7d0] sm:$0xff]  ;;  %v1563_v21 = vld [vmem:[%s6484_s4 + $0xc8] sm:$0xff] }
  0xdd   : > { %3320 = vmatpush1.bf16.msra.mxu0 %v3319_v26  ;;  %871 = vmatprep.mubr.f32.mxu0 %v259_v31  ;;  %v532_v26 = vld [vmem:[%s6481_s1 + $0x7c0] sm:$0xff]  ;;  %v1564_v23 = vld [vmem:[%s6484_s4 + $0xd0] sm:$0xff] }
  0xde   : > { %3322 = vmatprep.subr.bf16.mxu0 %v3321_v28  ;;  %v537_v28 = vld [vmem:[%s6481_s1 + $0x7e8] sm:$0xff]  ;;  %v3363_v30 = vpack.c.bf16 %v534_v27, %v532_v26  ;;  %v1310_v26 = vld [vmem:[%s6483_s3 + $0xe0] sm:$0xff] }
  0xdf   : > { %v3365_v31 = vpack.c.bf16 %v539_v29, %v537_v28  ;;  %v1566_v27 = vld [vmem:[%s6484_s4 + $0xe0] sm:$0xff]  ;;  %v1311_v28 = vld [vmem:[%s6483_s3 + $0xe8] sm:$0xff] }
  0xe0   : > { %v1567_v29 = vld [vmem:[%s6484_s4 + $0xe8] sm:$0xff] }
  0xe1   : > { %3324 = vmatpush1.bf16.msra.mxu0 %v3323_v34  ;;  %v3367_v34 = vpack.c.bf16 %v538_v33, %v536_v32  ;;  %v1313_v32 = vld [vmem:[%s6483_s3 + $0xf8] sm:$0xff] }
  0xe2   : > { %3326 = vmatprep.subr.bf16.mxu0 %v3325_v35  ;;  %v258_v35 = vld [vmem:[%s3942_s10 + $0x30] sm:$0xff]  ;;  %v1569_v33 = vld [vmem:[%s6484_s4 + $0xf8] sm:$0xff] }
  0xe5   : > { %3328 = vmatpush1.bf16.msra.mxu0 %v3327_v40  ;;  %v283_v40 = vld [vmem:[%s3942_s10 + $0xf8] sm:$0xff] }
  0xe6   : > { %3330 = vmatprep.subr.bf16.mxu0 %v3329_v41  ;;  %v282_v41 = vld [vmem:[%s3942_s10 + $0xf0] sm:$0xff] }
  0xe9   : > { %3332 = vmatpush1.bf16.msra.mxu0 %v3331_v46  ;;  %v1544_v46 = vld [vmem:[%s6484_s4 + $0x30] sm:$0xff] }
  0xea   : > { %3334 = vmatprep.subr.bf16.mxu0 %v3333_v47  ;;  %v1289_v47 = vld [vmem:[%s6483_s3 + $0x38] sm:$0xff]  ;;  %1602 = vperm.xlu1 %3544, %v1544_v46  }
  0xeb   : > { %1351 = vperm.xlu0 %3543, %v1289_v47  }
  0xed   : > { %3336 = vmatpush1.bf16.msra.mxu0 %v3335_v52  ;;  %v3810_v52 = vmov 0.0  }
  0xee   : > { %3338 = vmatprep.subr.bf16.mxu0 %v3337_v53  ;;  %1607 = vperm.xlu1 %3544, %v1545_v48   ;;  %v1547_v53 = vld [vmem:[%s6484_s4 + $0x48] sm:$0xff]  ;;  %v3377_v48 = vpack.c.bf16 %v2247_v43, %v2243_v42  ;;  %v919_v42 = vld [vmem:[%s6482_s2 + $0xb8] sm:$0xff] }
  0xef   : > { %1356 = vperm.xlu0 %3543, %v1290_v49   ;;  %1179 = vmatprep.mubr.f32.mxu1 %v3810_v52  ;;  %v2242_v49 = vld [vmem:[%s6485_s5] sm:$0xff]  ;;  %v905_v43 = vld [vmem:[%s6482_s2 + $0x48] sm:$0xff] }
  0xf1   : > { %3340 = vmatpush1.bf16.msra.mxu0 %v3339_v58  ;;  %v1294_v58 = vld [vmem:[%s6483_s3 + $0x60] sm:$0xff] }
  0xf2   : > { %3342 = vmatprep.subr.bf16.mxu0 %v3341_v59  ;;  %1612 = vperm.xlu1 %3544, %v1546_v50   ;;  %v1550_v59 = vld [vmem:[%s6484_s4 + $0x60] sm:$0xff] }
  0xf3   : > { %1361 = vperm.xlu0 %3543, %v1291_v51   ;;  %v2246_v50 = vld [vmem:[%s6485_s5 + $0x20] sm:$0xff]  ;;  %v2251_v51 = vld [vmem:[%s6485_s5 + $0x48] sm:$0xff] }
  0xf5   : > { %3344 = vmatpush1.bf16.msra.mxu0 %v3343_v0  ;;  %v1297_v0 = vld [vmem:[%s6483_s3 + $0x78] sm:$0xff] }
  0xf6   : > { %3346 = vmatprep.subr.bf16.mxu0 %v3345_v1  ;;  %1617 = vperm.xlu1 %3544, %v1547_v53   ;;  %v1553_v1 = vld [vmem:[%s6484_s4 + $0x78] sm:$0xff]  ;;  %v2255_v53 = vld [vmem:[%s6485_s5 + $0x68] sm:$0xff] }
  0xf7   : > { %1366 = vperm.xlu0 %3543, %v1292_v54   ;;  %v896_v54 = vld [vmem:[%s6482_s2] sm:$0xff] }
  0xf9   : > { %3348 = vmatpush1.bf16.msra.mxu0 %v3347_v6  ;;  %v1300_v6 = vld [vmem:[%s6483_s3 + $0x90] sm:$0xff] }
  0xfa   : > { %3350 = vmatprep.subr.bf16.mxu0 %v3349_v7  ;;  %1622 = vperm.xlu1 %3544, %v1548_v55   ;;  %v1556_v7 = vld [vmem:[%s6484_s4 + $0x90] sm:$0xff]  ;;  %v911_v55 = vld [vmem:[%s6482_s2 + $0x78] sm:$0xff] }
  0xfb   : > { %1371 = vperm.xlu0 %3543, %v1293_v56   ;;  %v3379_v56 = vpack.c.bf16 %v2246_v50, %v2242_v49  ;;  %v908_v49 = vld [vmem:[%s6482_s2 + $0x60] sm:$0xff]  ;;  %v923_v50 = vld [vmem:[%s6482_s2 + $0xd8] sm:$0xff] }
  0xfd   : > { %3352 = vmatpush1.bf16.msra.mxu0 %v3351_v12  ;;  %v1303_v12 = vld [vmem:[%s6483_s3 + $0xa8] sm:$0xff] }
  0xfe   : > { %3354 = vmatprep.subr.bf16.mxu0 %v3353_v13  ;;  %1627 = vperm.xlu1 %3544, %v1549_v57   ;;  %v1559_v13 = vld [vmem:[%s6484_s4 + $0xa8] sm:$0xff]  ;;  %v3381_v57 = vpack.c.bf16 %v2255_v53, %v2251_v51  ;;  %v924_v53 = vld [vmem:[%s6482_s2 + $0xe0] sm:$0xff] }
  0xff   : > { %1376 = vperm.xlu0 %3543, %v1294_v58   ;;  %v2250_v58 = vld [vmem:[%s6485_s5 + $0x40] sm:$0xff]  ;;  %v909_v51 = vld [vmem:[%s6482_s2 + $0x68] sm:$0xff] }
 0x101   : > { %3356 = vmatpush1.bf16.msra.mxu0 %v3355_v18  ;;  %v1306_v18 = vld [vmem:[%s6483_s3 + $0xc0] sm:$0xff] }
 0x102   : > { %3358 = vmatprep.subr.bf16.mxu0 %v3357_v19  ;;  %1632 = vperm.xlu1 %3544, %v1550_v59   ;;  %v1562_v19 = vld [vmem:[%s6484_s4 + $0xc0] sm:$0xff] }
 0x103   : > { %1381 = vperm.xlu0 %3543, %v1295_v60   ;;  %v2254_v59 = vld [vmem:[%s6485_s5 + $0x60] sm:$0xff]  ;;  %v2259_v60 = vld [vmem:[%s6485_s5 + $0x88] sm:$0xff] }
 0x105   : > { %3360 = vmatpush1.bf16.msra.mxu0 %v3359_v24  ;;  %v1309_v24 = vld [vmem:[%s6483_s3 + $0xd8] sm:$0xff] }
 0x106   : > { %3362 = vmatprep.subr.bf16.mxu0 %v3361_v25  ;;  %1637 = vperm.xlu1 %3544, %v1551_v61   ;;  %v1565_v25 = vld [vmem:[%s6484_s4 + $0xd8] sm:$0xff]  ;;  %v2263_v61 = vld [vmem:[%s6485_s5 + $0xa8] sm:$0xff] }
 0x107   : > { %1386 = vperm.xlu0 %3543, %v1296_v62   ;;  %v897_v62 = vld [vmem:[%s6482_s2 + $0x8] sm:$0xff] }
 0x109   : > { %3364 = vmatpush1.bf16.msra.mxu0 %v3363_v30  ;;  %v1312_v30 = vld [vmem:[%s6483_s3 + $0xf0] sm:$0xff] }
 0x10a   : > { %3366 = vmatprep.subr.bf16.mxu0 %v3365_v31  ;;  %1642 = vperm.xlu1 %3544, %v1552_v63   ;;  %v1568_v31 = vld [vmem:[%s6484_s4 + $0xf0] sm:$0xff]  ;;  %v912_v63 = vld [vmem:[%s6482_s2 + $0x80] sm:$0xff] }
 0x10b   : > { %1391 = vperm.xlu0 %3543, %v1297_v0   ;;  %v3383_v0 = vpack.c.bf16 %v2254_v59, %v2250_v58  ;;  %v2299_v58 = vld [vmem:[%s6485_s5 + $0x1c8] sm:$0xff] }
 0x10c   : > { %v2303_v59 = vld [vmem:[%s6485_s5 + $0x1e8] sm:$0xff] }
 0x10d   : > { %3368 = vmatpush1.bf16.msra.mxu0 %v3367_v34 }
 0x10e   : > { %1647 = vperm.xlu1 %3544, %v1553_v1   ;;  %v3385_v1 = vpack.c.bf16 %v2263_v61, %v2259_v60  ;;  %v3405_v60 = vpack.c.bf16 %v2303_v59, %v2299_v58  ;;  %v2298_v61 = vld [vmem:[%s6485_s5 + $0x1c0] sm:$0xff] }
 0x10f   : > { %1396 = vperm.xlu0 %3543, %v1298_v2   ;;  %v2258_v2 = vld [vmem:[%s6485_s5 + $0x80] sm:$0xff] }
 0x110   : > { %872 = vmatmul.mubr.f32.vlgmr.msra.gmra.mrb[0].mxu0 %v258_v35 }
 0x111   : > { %877 = vmatprep.mubr.f32.mxu0 %v267_v36 }
 0x112   : > { %1652 = vperm.xlu1 %3544, %v1554_v3   ;;  %v2262_v3 = vld [vmem:[%s6485_s5 + $0xa0] sm:$0xff] }
 0x113   : > { %1401 = vperm.xlu0 %3543, %v1299_v4   ;;  %v2267_v4 = vld [vmem:[%s6485_s5 + $0xc8] sm:$0xff] }
 0x114   : > { %878 = vmatmul.mubr.f32.gmra.mrb[2].mxu0 %v266_v37 }
 0x115   : > { %883 = vmatprep.mubr.f32.mxu0 %v275_v38 }
 0x116   : > { %1657 = vperm.xlu1 %3544, %v1555_v5   ;;  %v2271_v5 = vld [vmem:[%s6485_s5 + $0xe8] sm:$0xff] }
 0x117   : > { %1406 = vperm.xlu0 %3543, %v1300_v6   ;;  %v898_v6 = vld [vmem:[%s6482_s2 + $0x10] sm:$0xff] }
 0x118   : > { %884 = vmatmul.mubr.f32.gmra.mrb[4].mxu0 %v274_v39 }
 0x119   : > { %889 = vmatprep.mubr.f32.mxu0 %v283_v40 }
 0x11a   : > { %1662 = vperm.xlu1 %3544, %v1556_v7   ;;  %v913_v7 = vld [vmem:[%s6482_s2 + $0x88] sm:$0xff] }
 0x11b   : > { %1411 = vperm.xlu0 %3543, %v1301_v8   ;;  %v3387_v8 = vpack.c.bf16 %v2262_v3, %v2258_v2  ;;  %v2306_v2 = vld [vmem:[%s6485_s5 + $0x200] sm:$0xff] }
 0x11c   : > { %890 = vmatmul.mubr.f32.gmra.mrb[6].mxu0 %v282_v41  ;;  %v2310_v3 = vld [vmem:[%s6485_s5 + $0x220] sm:$0xff] }
 0x11d   : > { %1089 = vmatprep.mubr.f32.mxu0 %v3810_v52 }
 0x11e   : > { %1667 = vperm.xlu1 %3544, %v1557_v9   ;;  %v3389_v9 = vpack.c.bf16 %v2271_v5, %v2267_v4  ;;  %v3411_v4 = vpack.c.bf16 %v2310_v3, %v2306_v2  ;;  %v2315_v5 = vld [vmem:[%s6485_s5 + $0x248] sm:$0xff] }
 0x11f   : > { %1416 = vperm.xlu0 %3543, %v1302_v10   ;;  %v2266_v10 = vld [vmem:[%s6485_s5 + $0xc0] sm:$0xff] }
 0x122   : > { %1672 = vperm.xlu1 %3544, %v1558_v11   ;;  %v2270_v11 = vld [vmem:[%s6485_s5 + $0xe0] sm:$0xff] }
 0x123   : > { %1421 = vperm.xlu0 %3543, %v1303_v12   ;;  %v2275_v12 = vld [vmem:[%s6485_s5 + $0x108] sm:$0xff] }
 0x126   : > { %1677 = vperm.xlu1 %3544, %v1559_v13   ;;  %v2279_v13 = vld [vmem:[%s6485_s5 + $0x128] sm:$0xff] }
 0x127   : > { %1426 = vperm.xlu0 %3543, %v1304_v14   ;;  %v899_v14 = vld [vmem:[%s6482_s2 + $0x18] sm:$0xff] }
 0x12a   : > { %1682 = vperm.xlu1 %3544, %v1560_v15   ;;  %v914_v15 = vld [vmem:[%s6482_s2 + $0x90] sm:$0xff] }
 0x12b   : > { %1431 = vperm.xlu0 %3543, %v1305_v16   ;;  %v3391_v16 = vpack.c.bf16 %v2270_v11, %v2266_v10  ;;  %v2323_v11 = vld [vmem:[%s6485_s5 + $0x288] sm:$0xff] }
 0x12e   : > { %1687 = vperm.xlu1 %3544, %v1561_v17   ;;  %v3393_v17 = vpack.c.bf16 %v2279_v13, %v2275_v12  ;;  %v2327_v12 = vld [vmem:[%s6485_s5 + $0x2a8] sm:$0xff] }
 0x12f   : > { %1436 = vperm.xlu0 %3543, %v1306_v18   ;;  %v2274_v18 = vld [vmem:[%s6485_s5 + $0x100] sm:$0xff]  ;;  %v3417_v13 = vpack.c.bf16 %v2327_v12, %v2323_v11 }
 0x132   : > { %1692 = vperm.xlu1 %3544, %v1562_v19   ;;  %v2278_v19 = vld [vmem:[%s6485_s5 + $0x120] sm:$0xff] }
 0x133   : > { %1441 = vperm.xlu0 %3543, %v1307_v20   ;;  %v2283_v20 = vld [vmem:[%s6485_s5 + $0x148] sm:$0xff] }
 0x136   : > { %1697 = vperm.xlu1 %3544, %v1563_v21   ;;  %v2287_v21 = vld [vmem:[%s6485_s5 + $0x168] sm:$0xff] }
 0x137   : > { %1446 = vperm.xlu0 %3543, %v1308_v22   ;;  %v900_v22 = vld [vmem:[%s6482_s2 + $0x20] sm:$0xff] }
 0x13a   : > { %1702 = vperm.xlu1 %3544, %v1564_v23   ;;  %v915_v23 = vld [vmem:[%s6482_s2 + $0x98] sm:$0xff] }
 0x13b   : > { %1451 = vperm.xlu0 %3543, %v1309_v24   ;;  %v3395_v24 = vpack.c.bf16 %v2278_v19, %v2274_v18  ;;  %v2335_v18 = vld [vmem:[%s6485_s5 + $0x2e8] sm:$0xff] }
 0x13e   : > { %1707 = vperm.xlu1 %3544, %v1565_v25   ;;  %v3397_v25 = vpack.c.bf16 %v2287_v21, %v2283_v20  ;;  %v2330_v20 = vld [vmem:[%s6485_s5 + $0x2c0] sm:$0xff] }
 0x13f   : > { %1456 = vperm.xlu0 %3543, %v1310_v26   ;;  %v2282_v26 = vld [vmem:[%s6485_s5 + $0x140] sm:$0xff] }
 0x140   : > { %v2334_v21 = vld [vmem:[%s6485_s5 + $0x2e0] sm:$0xff] }
 0x142   : > { %1712 = vperm.xlu1 %3544, %v1566_v27   ;;  %v2286_v27 = vld [vmem:[%s6485_s5 + $0x160] sm:$0xff] }
 0x143   : > { %1461 = vperm.xlu0 %3543, %v1311_v28   ;;  %v2291_v28 = vld [vmem:[%s6485_s5 + $0x188] sm:$0xff] }
 0x146   : > { %1717 = vperm.xlu1 %3544, %v1567_v29   ;;  %v2295_v29 = vld [vmem:[%s6485_s5 + $0x1a8] sm:$0xff] }
 0x147   : > { %1466 = vperm.xlu0 %3543, %v1312_v30   ;;  %v901_v30 = vld [vmem:[%s6482_s2 + $0x28] sm:$0xff] }
 0x14a   : > { %1722 = vperm.xlu1 %3544, %v1568_v31   ;;  %v916_v31 = vld [vmem:[%s6482_s2 + $0xa0] sm:$0xff] }
 0x14b   : > { %1471 = vperm.xlu0 %3543, %v1313_v32   ;;  %v3399_v32 = vpack.c.bf16 %v2286_v27, %v2282_v26  ;;  %v2338_v26 = vld [vmem:[%s6485_s5 + $0x300] sm:$0xff] }
 0x14c   : > { %v2342_v27 = vld [vmem:[%s6485_s5 + $0x320] sm:$0xff] }
 0x14e   : > { %1727 = vperm.xlu1 %3544, %v1569_v33   ;;  %v3401_v33 = vpack.c.bf16 %v2295_v29, %v2291_v28  ;;  %v3427_v28 = vpack.c.bf16 %v2342_v27, %v2338_v26  ;;  %v2347_v29 = vld [vmem:[%s6485_s5 + $0x348] sm:$0xff] }
 0x1e3   : > { %v873_v34 = vpop.f32.mrb[0].mxu0 }
 0x1e4   : > { %v875_v35 = vpop.f32.mrb[1].mxu0 }
 0x1e7   : > { %v879_v36 = vpop.f32.mrb[2].mxu0 }
 0x1e8   : > { %v3371_v37 = vpack.c.bf16 %v879_v36, %v873_v34  ;;  %v881_v38 = vpop.f32.mrb[3].mxu0  ;;  %v2290_v34 = vld [vmem:[%s6485_s5 + $0x180] sm:$0xff]  ;;  %v902_v36 = vld [vmem:[%s6482_s2 + $0x30] sm:$0xff] }
 0x1e9   : > { %v3369_v39 = vpack.c.bf16 %v881_v38, %v875_v35  ;;  %v2294_v35 = vld [vmem:[%s6485_s5 + $0x1a0] sm:$0xff] }
 0x1ea   : > { %v3403_v38 = vpack.c.bf16 %v2294_v35, %v2290_v34  ;;  %v2355_v35 = vld [vmem:[%s6485_s5 + $0x388] sm:$0xff] }
 0x1eb   : > { %v885_v40 = vpop.f32.mrb[4].mxu0  ;;  %3370 = vmatprep.subr.bf16.mxu0 %v3369_v39  ;;  %3505 = vmatprep.subr.bf16.mxu1 %v3369_v39  ;;  %v903_v39 = vld [vmem:[%s6482_s2 + $0x38] sm:$0xff] }
 0x1ec   : > { %v887_v41 = vpop.f32.mrb[5].mxu0  ;;  %3372 = vmatpush1.bf16.msra.mxu0 %v3371_v37  ;;  %3507 = vmatpush1.bf16.msra.mxu1 %v3371_v37  ;;  %v917_v37 = vld [vmem:[%s6482_s2 + $0xa8] sm:$0xff] }
 0x1ef   : > { %v891_v44 = vpop.f32.mrb[6].mxu0 }
 0x1f0   : > { %v3375_v45 = vpack.c.bf16 %v891_v44, %v885_v40  ;;  %v893_v46 = vpop.f32.mrb[7].mxu0  ;;  %v918_v40 = vld [vmem:[%s6482_s2 + $0xb0] sm:$0xff]  ;;  %v920_v44 = vld [vmem:[%s6482_s2 + $0xc0] sm:$0xff] }
 0x1f1   : > { %v3373_v47 = vpack.c.bf16 %v893_v46, %v887_v41  ;;  %v904_v41 = vld [vmem:[%s6482_s2 + $0x40] sm:$0xff]  ;;  %v921_v46 = vld [vmem:[%s6482_s2 + $0xc8] sm:$0xff] }
 0x1f3   : > { %3374 = vmatprep.subr.bf16.mxu0 %v3373_v47  ;;  %3506 = vmatprep.subr.bf16.mxu1 %v3373_v47  ;;  %v907_v47 = vld [vmem:[%s6482_s2 + $0x58] sm:$0xff] }
 0x1f4   : > { %3376 = vmatpush1.bf16.msra.mxu0 %v3375_v45  ;;  %3508 = vmatpush1.bf16.msra.mxu1 %v3375_v45  ;;  %v906_v45 = vld [vmem:[%s6482_s2 + $0x50] sm:$0xff] }
 0x1f5   : > { %3378 = vmatprep.subr.bf16.mxu1 %v3377_v48  ;;  %v922_v48 = vld [vmem:[%s6482_s2 + $0xd0] sm:$0xff] }
 0x1f7   : > { %3077 = vmatmul.mubr.msk.f32.vlgmr.msra.gmra.mrb[8].mxu0 %vm928_vm0, %v896_v54  ;;  %3092 = vmatmul.mubr.msk.f32.vlgmr.msra.gmra.mrb[0].mxu1 %vm928_vm0, %v911_v55  ;;  %v910_v54 = vld [vmem:[%s6482_s2 + $0x70] sm:$0xff]  ;;  %v925_v55 = vld [vmem:[%s6482_s2 + $0xe8] sm:$0xff] }
 0x1f8   : > { %1095 = vmatprep.mubr.f32.mxu0 %v3810_v52  ;;  %1185 = vmatprep.mubr.f32.mxu1 %v3810_v52 }
 0x1f9   : > { %3380 = vmatpush1.bf16.msra.mxu1 %v3379_v56  ;;  %v926_v56 = vld [vmem:[%s6482_s2 + $0xf0] sm:$0xff] }
 0x1fa   : > { %3382 = vmatprep.subr.bf16.mxu1 %v3381_v57  ;;  %v927_v57 = vld [vmem:[%s6482_s2 + $0xf8] sm:$0xff] }
 0x1fb   : > { %3078 = vmatmul.mubr.msk.f32.gmra.mrb[10].mxu0 %vm928_vm0, %v897_v62  ;;  %3093 = vmatmul.mubr.msk.f32.gmra.mrb[2].mxu1 %vm928_vm0, %v912_v63  ;;  %v2307_v63 = vld [vmem:[%s6485_s5 + $0x208] sm:$0xff] }
 0x1fc   : > { %1101 = vmatprep.mubr.f32.mxu0 %v3810_v52  ;;  %1191 = vmatprep.mubr.f32.mxu1 %v3810_v52 }
 0x1fd   : > { %3384 = vmatpush1.bf16.msra.mxu1 %v3383_v0  ;;  %v2311_v0 = vld [vmem:[%s6485_s5 + $0x228] sm:$0xff] }
 0x1fe   : > { %3386 = vmatprep.subr.bf16.mxu1 %v3385_v1  ;;  %v3409_v1 = vpack.c.bf16 %v2311_v0, %v2307_v63 }
 0x1ff   : > { %3079 = vmatmul.mubr.msk.f32.gmra.mrb[12].mxu0 %vm928_vm0, %v898_v6  ;;  %3094 = vmatmul.mubr.msk.f32.gmra.mrb[4].mxu1 %vm928_vm0, %v913_v7  ;;  %v2319_v6 = vld [vmem:[%s6485_s5 + $0x268] sm:$0xff] }
 0x200   : > { %1107 = vmatprep.mubr.f32.mxu0 %v3810_v52  ;;  %1197 = vmatprep.mubr.f32.mxu1 %v3810_v52  ;;  %v3413_v7 = vpack.c.bf16 %v2319_v6, %v2315_v5 }
 0x201   : > { %3388 = vmatpush1.bf16.msra.mxu1 %v3387_v8  ;;  %v2314_v8 = vld [vmem:[%s6485_s5 + $0x240] sm:$0xff] }
 0x202   : > { %3390 = vmatprep.subr.bf16.mxu1 %v3389_v9  ;;  %v2318_v9 = vld [vmem:[%s6485_s5 + $0x260] sm:$0xff] }
 0x203   : > { %3080 = vmatmul.mubr.msk.f32.gmra.mrb[14].mxu0 %vm928_vm0, %v899_v14  ;;  %3095 = vmatmul.mubr.msk.f32.gmra.mrb[6].mxu1 %vm928_vm0, %v914_v15  ;;  %v3415_v10 = vpack.c.bf16 %v2318_v9, %v2314_v8  ;;  %v2322_v14 = vld [vmem:[%s6485_s5 + $0x280] sm:$0xff] }
 0x204   : > { %1113 = vmatprep.mubr.f32.mxu0 %v3810_v52  ;;  %1203 = vmatprep.mubr.f32.mxu1 %v3810_v52  ;;  %v2326_v15 = vld [vmem:[%s6485_s5 + $0x2a0] sm:$0xff] }
 0x205   : > { %3392 = vmatpush1.bf16.msra.mxu1 %v3391_v16  ;;  %v3419_v16 = vpack.c.bf16 %v2326_v15, %v2322_v14 }
 0x206   : > { %3394 = vmatprep.subr.bf16.mxu1 %v3393_v17  ;;  %v2331_v17 = vld [vmem:[%s6485_s5 + $0x2c8] sm:$0xff] }
 0x207   : > { %3081 = vmatmul.mubr.msk.f32.gmra.mrb[16].mxu0 %vm928_vm0, %v900_v22  ;;  %3096 = vmatmul.mubr.msk.f32.gmra.mrb[8].mxu1 %vm928_vm0, %v915_v23  ;;  %v3421_v19 = vpack.c.bf16 %v2335_v18, %v2331_v17  ;;  %v3423_v22 = vpack.c.bf16 %v2334_v21, %v2330_v20  ;;  %v2339_v23 = vld [vmem:[%s6485_s5 + $0x308] sm:$0xff] }
 0x208   : > { %1119 = vmatprep.mubr.f32.mxu0 %v3810_v52  ;;  %1209 = vmatprep.mubr.f32.mxu1 %v3810_v52 }
 0x209   : > { %3396 = vmatpush1.bf16.msra.mxu1 %v3395_v24  ;;  %v2343_v24 = vld [vmem:[%s6485_s5 + $0x328] sm:$0xff] }
 0x20a   : > { %3398 = vmatprep.subr.bf16.mxu1 %v3397_v25  ;;  %v3425_v25 = vpack.c.bf16 %v2343_v24, %v2339_v23 }
 0x20b   : > { %3082 = vmatmul.mubr.msk.f32.gmra.mrb[18].mxu0 %vm928_vm0, %v901_v30  ;;  %3097 = vmatmul.mubr.msk.f32.gmra.mrb[10].mxu1 %vm928_vm0, %v916_v31  ;;  %v2351_v30 = vld [vmem:[%s6485_s5 + $0x368] sm:$0xff] }
 0x20c   : > { %1125 = vmatprep.mubr.f32.mxu0 %v3810_v52  ;;  %1215 = vmatprep.mubr.f32.mxu1 %v3810_v52  ;;  %v3429_v31 = vpack.c.bf16 %v2351_v30, %v2347_v29 }
 0x20d   : > { %3400 = vmatpush1.bf16.msra.mxu1 %v3399_v32  ;;  %v2346_v32 = vld [vmem:[%s6485_s5 + $0x340] sm:$0xff] }
 0x20e   : > { %3402 = vmatprep.subr.bf16.mxu1 %v3401_v33  ;;  %v2350_v33 = vld [vmem:[%s6485_s5 + $0x360] sm:$0xff] }
 0x20f   : > { %3083 = vmatmul.mubr.msk.f32.gmra.mrb[20].mxu0 %vm928_vm0, %v902_v36  ;;  %3098 = vmatmul.mubr.msk.f32.gmra.mrb[12].mxu1 %vm928_vm0, %v917_v37  ;;  %v3431_v34 = vpack.c.bf16 %v2350_v33, %v2346_v32  ;;  %v2359_v36 = vld [vmem:[%s6485_s5 + $0x3a8] sm:$0xff] }
 0x210   : > { %1131 = vmatprep.mubr.f32.mxu0 %v3810_v52  ;;  %1221 = vmatprep.mubr.f32.mxu1 %v3810_v52  ;;  %v3433_v37 = vpack.c.bf16 %v2359_v36, %v2355_v35 }
 0x211   : > { %3404 = vmatpush1.bf16.msra.mxu1 %v3403_v38  ;;  %v2354_v38 = vld [vmem:[%s6485_s5 + $0x380] sm:$0xff] }
 0x212   : > { %3406 = vmatprep.subr.bf16.mxu1 %v3405_v60 }
 0x213   : > { %3084 = vmatmul.mubr.msk.f32.gmra.mrb[22].mxu0 %vm928_vm0, %v903_v39  ;;  %3099 = vmatmul.mubr.msk.f32.gmra.mrb[14].mxu1 %vm928_vm0, %v918_v40  ;;  %v2358_v39 = vld [vmem:[%s6485_s5 + $0x3a0] sm:$0xff] }
 0x214   : > { %1137 = vmatprep.mubr.f32.mxu0 %v3810_v52  ;;  %1227 = vmatprep.mubr.f32.mxu1 %v3810_v52  ;;  %v3435_v40 = vpack.c.bf16 %v2358_v39, %v2354_v38 }
 0x217   : > { %3085 = vmatmul.mubr.msk.f32.gmra.mrb[24].mxu0 %vm928_vm0, %v904_v41  ;;  %3100 = vmatmul.mubr.msk.f32.gmra.mrb[16].mxu1 %vm928_vm0, %v919_v42  ;;  %v2363_v41 = vld [vmem:[%s6485_s5 + $0x3c8] sm:$0xff] }
 0x218   : > { %1143 = vmatprep.mubr.f32.mxu0 %v3810_v52  ;;  %1233 = vmatprep.mubr.f32.mxu1 %v3810_v52  ;;  %v2367_v42 = vld [vmem:[%s6485_s5 + $0x3e8] sm:$0xff] }
 0x21b   : > { %3086 = vmatmul.mubr.msk.f32.gmra.mrb[26].mxu0 %vm928_vm0, %v905_v43  ;;  %3101 = vmatmul.mubr.msk.f32.gmra.mrb[18].mxu1 %vm928_vm0, %v920_v44  ;;  %v3437_v43 = vpack.c.bf16 %v2367_v42, %v2363_v41  ;;  %v2362_v44 = vld [vmem:[%s6485_s5 + $0x3c0] sm:$0xff] }
 0x21c   : > { %1149 = vmatprep.mubr.f32.mxu0 %v3810_v52  ;;  %1239 = vmatprep.mubr.f32.mxu1 %v3810_v52 }
 0x21f   : > { %3087 = vmatmul.mubr.msk.f32.gmra.mrb[28].mxu0 %vm928_vm0, %v906_v45  ;;  %3102 = vmatmul.mubr.msk.f32.gmra.mrb[20].mxu1 %vm928_vm0, %v921_v46  ;;  %v2366_v45 = vld [vmem:[%s6485_s5 + $0x3e0] sm:$0xff] }
 0x220   : > { %1155 = vmatprep.mubr.f32.mxu0 %v3810_v52  ;;  %1245 = vmatprep.mubr.f32.mxu1 %v3810_v52  ;;  %v3439_v46 = vpack.c.bf16 %v2366_v45, %v2362_v44 }
 0x223   : > { %3088 = vmatmul.mubr.msk.f32.gmra.mrb[30].mxu0 %vm928_vm0, %v907_v47  ;;  %3103 = vmatmul.mubr.msk.f32.gmra.mrb[22].mxu1 %vm928_vm0, %v922_v48  ;;  %v1317_v47 = vpop.permute.xlu0 %1316  ;;  %v1322_v48 = vpop.permute.xlu1 %1321 }
 0x224   : > { %1161 = vmatprep.mubr.f32.mxu0 %v3810_v52  ;;  %1251 = vmatprep.mubr.f32.mxu1 %v3810_v52 }
 0x227   : > { %3089 = vmatmul.mubr.msk.f32.gmra.mrb[32].mxu0 %vm928_vm0, %v908_v49  ;;  %3104 = vmatmul.mubr.msk.f32.gmra.mrb[24].mxu1 %vm928_vm0, %v923_v50  ;;  %v1573_v49 = vpop.permute.xlu0 %1572  ;;  %v1578_v50 = vpop.permute.xlu1 %1577 }
 0x228   : > { %1167 = vmatprep.mubr.f32.mxu0 %v3810_v52  ;;  %1257 = vmatprep.mubr.f32.mxu1 %v3810_v52 }
 0x22b   : > { %3090 = vmatmul.mubr.msk.f32.gmra.mrb[34].mxu0 %vm928_vm0, %v909_v51  ;;  %3105 = vmatmul.mubr.msk.f32.gmra.mrb[26].mxu1 %vm928_vm0, %v924_v53  ;;  %v5210_v51 = vpop.permute.xlu0 %1326  ;;  %v5212_v53 = vpop.permute.xlu1 %1582 }
 0x22c   : > { %1173 = vmatprep.mubr.f32.mxu0 %v3810_v52  ;;  %1263 = vmatprep.mubr.f32.mxu1 %v3810_v52 }
 0x22f   : > { %3091 = vmatmul.mubr.msk.f32.gmra.mrb[36].mxu0 %vm928_vm0, %v910_v54  ;;  %3106 = vmatmul.mubr.msk.f32.gmra.mrb[28].mxu1 %vm928_vm0, %v925_v55  ;;  %v5214_v54 = vpop.permute.xlu0 %1331  ;;  %v2245_v55 = vld [vmem:[%s6485_s5 + $0x18] sm:$0xff]  ;;  %v5222_v58 = vpop.permute.xlu1 %1587 }
 0x230   : > { %1269 = vmatprep.mubr.f32.mxu1 %v3810_v52 }
 0x233   : > { %3107 = vmatmul.mubr.msk.f32.gmra.mrb[30].mxu1 %vm928_vm0, %v926_v56  ;;  %v2249_v56 = vld [vmem:[%s6485_s5 + $0x38] sm:$0xff]  ;;  %v5224_v59 = vpop.permute.xlu0 %1336  ;;  %v5226_v60 = vpop.permute.xlu1 %1592 }
 0x234   : > { %1275 = vmatprep.mubr.f32.mxu1 %v3810_v52  ;;  %v2302_v52 = vld [vmem:[%s6485_s5 + $0x1e0] sm:$0xff] }
 0x235   : > { %v3407_v62 = vpack.c.bf16 %v2302_v52, %v2298_v61 }
 0x237   : > { %3108 = vmatmul.mubr.msk.f32.gmra.mrb[32].mxu1 %vm928_vm0, %v927_v57  ;;  %v3441_v57 = vpack.c.bf16 %v2249_v56, %v2245_v55  ;;  %v5228_v61 = vpop.permute.xlu0 %1341  ;;  %v5230_v52 = vpop.permute.xlu1 %1597 }
 0x238   : > { %3408 = vmatpush1.bf16.msra.mxu1 %v3407_v62 }
 0x239   : > { %3410 = vmatprep.subr.bf16.mxu1 %v3409_v1 }
 0x23b   : > { %v5232_v62 = vpop.permute.xlu0 %1346  ;;  %v5234_v63 = vpop.permute.xlu1 %1602 }
 0x23c   : > { %3412 = vmatpush1.bf16.msra.mxu1 %v3411_v4 }
 0x23d   : > { %3414 = vmatprep.subr.bf16.mxu1 %v3413_v7 }
 0x23f   : > { %v5236_v0 = vpop.permute.xlu0 %1351  ;;  %v5242_v5 = vpop.permute.xlu1 %1607 }
 0x240   : > { %3416 = vmatpush1.bf16.msra.mxu1 %v3415_v10 }
 0x241   : > { %3418 = vmatprep.subr.bf16.mxu1 %v3417_v13 }
 0x243   : > { %v5248_v10 = vpop.permute.xlu0 %1356 }
 0x244   : > { %3420 = vmatpush1.bf16.msra.mxu1 %v3419_v16  ;;  %v5254_v16 = vpop.permute.xlu1 %1612 }
 0x245   : > { %3422 = vmatprep.subr.bf16.mxu1 %v3421_v19 }
 0x248   : > { %3424 = vmatpush1.bf16.msra.mxu1 %v3423_v22  ;;  %v5260_v22 = vpop.permute.xlu0 %1361  ;;  %v5273_v32 = vpop.permute.xlu1 %1617 }
 0x249   : > { %3426 = vmatprep.subr.bf16.mxu1 %v3425_v25 }
 0x24c   : > { %3428 = vmatpush1.bf16.msra.mxu1 %v3427_v28  ;;  %v5305_v56 = vpop.permute.xlu1 %1622 }
 0x24d   : > { %3430 = vmatprep.subr.bf16.mxu1 %v3429_v31 }
 0x250   : > { %3432 = vmatpush1.bf16.msra.mxu1 %v3431_v34  ;;  %v5276_v34 = vpop.permute.xlu0 %1366 }
 0x251   : > { %3434 = vmatprep.subr.bf16.mxu1 %v3433_v37 }
 0x254   : > { %3436 = vmatpush1.bf16.msra.mxu1 %v3435_v40 }
 0x255   : > { %3438 = vmatprep.subr.bf16.mxu1 %v3437_v43 }
 0x258   : > { %3440 = vmatpush1.bf16.msra.mxu1 %v3439_v46 }
 0x259   : > { %3442 = vmatprep.subr.bf16.mxu1 %v3441_v57  ;;  %v5307_v57 = vpop.permute.xlu0 %1371 }
 0x2ca   : > { %v1091_v1 = vpop.f32.mrb[8].mxu0  ;;  %v5238_v2 = vpop.f32.mrb[0].mxu1 }
 0x2cb   : > { %v1093_v3 = vpop.f32.mrb[9].mxu0  ;;  %v5240_v4 = vpop.f32.mrb[1].mxu1  ;;  %v1474_v17 = vmul.f32 %v1317_v47, %v1091_v1 }
 0x2cc   : > { %v1475_v15 = vmul.f32 %v1317_v47, %v1093_v3 }
 0x2cd   : > { %v5264_v24 = vadd.f32 %v1573_v49, %v1474_v17 }
 0x2ce   : > { %v1097_v6 = vpop.f32.mrb[10].mxu0  ;;  %v5244_v7 = vpop.f32.mrb[2].mxu1  ;;  %v5262_v23 = vadd.f32 %v1573_v49, %v1475_v15 }
 0x2cf   : > { %v1099_v8 = vpop.f32.mrb[11].mxu0  ;;  %v5246_v9 = vpop.f32.mrb[3].mxu1  ;;  %v1476_v28 = vmul.f32 %v1322_v48, %v1097_v6  ;;  %v1794_v33 = vsub.f32 0.0, %v5264_v24 }
 0x2d0   : > { %v1477_v25 = vmul.f32 %v1322_v48, %v1099_v8  ;;  %v1795_v31 = vsub.f32 0.0, %v5262_v23 }
 0x2d1   : > { %v5282_v37 = vadd.f32 %v1578_v50, %v1476_v28  ;;  %v1858_v43 = vmul.f32 1.442695, %v1794_v33 }
 0x2d2   : > { %v1103_v11 = vpop.f32.mrb[12].mxu0  ;;  %v5250_v12 = vpop.f32.mrb[4].mxu1  ;;  %v5278_v35 = vadd.f32 %v1578_v50, %v1477_v25  ;;  %v1860_v41 = vmul.f32 1.442695, %v1795_v31 }
 0x2d3   : > { %v1105_v13 = vpop.f32.mrb[13].mxu0  ;;  %v5252_v14 = vpop.f32.mrb[5].mxu1  ;;  %v1796_v47 = vsub.f32 0.0, %v5282_v37  ;;  %v1478_v55 = vmul.f32 %v5210_v51, %v1103_v11 }
 0x2d4   : > { %v1479_v38 = vmul.f32 %v5210_v51, %v1105_v13  ;;  %v1797_v44 = vsub.f32 0.0, %v5278_v35  ;;  %3545 = vpow2.f32 %v1860_v41 }
 0x2d5   : > { %3547 = vpow2.f32 %v1858_v43  ;;  %v1862_v8 = vmul.f32 1.442695, %v1796_v47  ;;  %v5319_v25 = vadd.f32 %v5212_v53, %v1478_v55  ;;  %v5331_v43 = vpop.permute.xlu1 %1627 }
 0x2d6   : > { %v1109_v18 = vpop.f32.mrb[14].mxu0  ;;  %v5256_v19 = vpop.f32.mrb[6].mxu1  ;;  %v5298_v48 = vadd.f32 %v5212_v53, %v1479_v38  ;;  %v1864_v1 = vmul.f32 1.442695, %v1797_v44 }
 0x2d7   : > { %v1111_v20 = vpop.f32.mrb[15].mxu0  ;;  %v5258_v21 = vpop.f32.mrb[7].mxu1  ;;  %v1798_v41 = vsub.f32 0.0, %v5319_v25  ;;  %v1480_v53 = vmul.f32 %v5214_v54, %v1109_v18 }
 0x2d8   : > { %6518 = vst [vmem:[#allocation2_spill] sm:$0xff] %v5258_v21  ;;  %v1799_v13 = vsub.f32 0.0, %v5298_v48  ;;  %3549 = vpow2.f32 %v1864_v1  ;;  %v1481_v51 = vmul.f32 %v5214_v54, %v1111_v20  ;;  %v5333_v44 = vpop.permute.xlu0 %1376 }
 0x2d9   : > { %3551 = vpow2.f32 %v1862_v8  ;;  %v5349_v54 = vadd.f32 %v5222_v58, %v1480_v53  ;;  %v5365_v53 = vpop.permute.xlu1 %1632 }
 0x2da   : > { %v5266_v26 = vpop.f32.mrb[16].mxu0  ;;  %v5268_v27 = vpop.f32.mrb[8].mxu1  ;;  %v1868_v31 = vmul.f32 1.442695, %v1799_v13  ;;  %v5337_v20 = vadd.f32 %v5222_v58, %v1481_v51 }
 0x2db   : > { %6519 = vst [vmem:[#allocation3_spill] sm:$0xff] %v5268_v27  ;;  %v1117_v29 = vpop.f32.mrb[17].mxu0  ;;  %v5270_v30 = vpop.f32.mrb[9].mxu1  ;;  %v1482_v58 = vmul.f32 %v5224_v59, %v5266_v26 }
 0x2dc   : > { %6520 = vst [vmem:[#allocation4_spill] sm:$0xff] %v5270_v30  ;;  %v1483_v55 = vmul.f32 %v5224_v59, %v1117_v29  ;;  %3553 = vpow2.f32 %v1868_v31  ;;  %v1801_v51 = vsub.f32 0.0, %v5337_v20 }
 0x2dd   : > { %v5393_v21 = vpop.permute.xlu1 %1637 }
 0x2de   : > { %v5280_v36 = vpop.f32.mrb[18].mxu0  ;;  %v5285_v39 = vpop.f32.mrb[10].mxu1  ;;  %v5353_v29 = vadd.f32 %v5226_v60, %v1483_v55  ;;  %v1800_v55 = vsub.f32 0.0, %v5349_v54  ;;  %6537 = vst [vmem:[#allocation21_spill] sm:$0xff] %v5393_v21 }
 0x2df   : > { %6521 = vst [vmem:[#allocation5_spill] sm:$0xff] %v5285_v39  ;;  %v5287_v40 = vpop.f32.mrb[19].mxu0  ;;  %v5289_v42 = vpop.f32.mrb[11].mxu1  ;;  %v1484_v27 = vmul.f32 %v5228_v61, %v5280_v36 }
 0x2e0   : > { %6522 = vst [vmem:[#allocation6_spill] sm:$0xff] %v5289_v42  ;;  %v3546_v47 = vpop.eup %3545 }
 0x2e1   : > { %v3548_v13 = vpop.eup %3547  ;;  %v5403_v36 = vadd.f32 %v5230_v52, %v1484_v27 }
 0x2e2   : > { %v5292_v45 = vpop.f32.mrb[20].mxu0  ;;  %v5294_v46 = vpop.f32.mrb[12].mxu1  ;;  %v1986_v18 = vadd.f32 1.0, %v3548_v13  ;;  %v1872_v13 = vmul.f32 1.442695, %v1801_v51 }
 0x2e3   : > { %6523 = vst [vmem:[#allocation7_spill] sm:$0xff] %v5294_v46  ;;  %v5300_v49 = vpop.f32.mrb[21].mxu0  ;;  %v5302_v50 = vpop.f32.mrb[13].mxu1  ;;  %v1870_v51 = vmul.f32 1.442695, %v1800_v55 }
 0x2e4   : > { %6524 = vst [vmem:[#allocation8_spill] sm:$0xff] %v5302_v50 }
 0x2e6   : > { %v5309_v3 = vpop.f32.mrb[22].mxu0  ;;  %v5311_v6 = vpop.f32.mrb[14].mxu1 }
 0x2e7   : > { %6525 = vst [vmem:[#allocation9_spill] sm:$0xff] %v5311_v6  ;;  %v5314_v15 = vpop.f32.mrb[23].mxu0  ;;  %v5316_v17 = vpop.f32.mrb[15].mxu1  ;;  %v1866_v6 = vmul.f32 1.442695, %v1798_v41 }
 0x2e8   : > { %6526 = vst [vmem:[#allocation10_spill] sm:$0xff] %v5316_v17  ;;  %v1987_v17 = vadd.f32 1.0, %v3546_v47  ;;  %v5367_v47 = vpop.permute.xlu0 %1381 }
 0x2e9   : > { %3555 = vpow2.f32 %v1866_v6  ;;  %6533 = vst [vmem:[#allocation17_spill] sm:$0xff] %v5367_v47 }
 0x2ea   : > { %v5322_v11 = vpop.f32.mrb[24].mxu0  ;;  %v5324_v28 = vpop.f32.mrb[16].mxu1  ;;  %3557 = vrcp.f32 %v1987_v17  ;;  %v5382_v17 = vadd.f32 %v5226_v60, %v1482_v58 }
 0x2eb   : > { %6527 = vst [vmem:[#allocation11_spill] sm:$0xff] %v5324_v28  ;;  %v5326_v33 = vpop.f32.mrb[25].mxu0  ;;  %v5328_v38 = vpop.f32.mrb[17].mxu1  ;;  %3559 = vrcp.f32 %v1986_v18 }
 0x2ec   : > { %6528 = vst [vmem:[#allocation12_spill] sm:$0xff] %v5328_v38  ;;  %3561 = vpow2.f32 %v1872_v13  ;;  %v1802_v58 = vsub.f32 0.0, %v5382_v17 }
 0x2ee   : > { %v5340_v1 = vpop.f32.mrb[26].mxu0  ;;  %v5342_v8 = vpop.f32.mrb[18].mxu1 }
 0x2ef   : > { %6529 = vst [vmem:[#allocation13_spill] sm:$0xff] %v5342_v8  ;;  %v5344_v38 = vpop.f32.mrb[27].mxu0  ;;  %v5346_v28 = vpop.f32.mrb[19].mxu1 }
 0x2f0   : > { %6530 = vst [vmem:[#allocation14_spill] sm:$0xff] %v5346_v28  ;;  %v3550_v28 = vpop.eup %3549 }
 0x2f1   : > { %v3552_v41 = vpop.eup %3551  ;;  %v1989_v59 = vadd.f32 1.0, %v3550_v28 }
 0x2f2   : > { %v5355_v46 = vpop.f32.mrb[28].mxu0  ;;  %v5357_v8 = vpop.f32.mrb[20].mxu1  ;;  %v1988_v30 = vadd.f32 1.0, %v3552_v41 }
 0x2f3   : > { %6531 = vst [vmem:[#allocation15_spill] sm:$0xff] %v5357_v8  ;;  %v5359_v31 = vpop.f32.mrb[29].mxu0  ;;  %v5361_v50 = vpop.f32.mrb[21].mxu1  ;;  %v1803_v8 = vsub.f32 0.0, %v5353_v29  ;;  %3563 = vrcp.f32 %v1989_v59 }
 0x2f4   : > { %6532 = vst [vmem:[#allocation16_spill] sm:$0xff] %v5361_v50  ;;  %v1485_v50 = vmul.f32 %v5228_v61, %v5287_v40  ;;  %v3554_v18 = vpop.eup %3553  ;;  %3565 = vrcp.f32 %v1988_v30  ;;  %v5400_v61 = vpop.permute.xlu0 %1386 }
 0x2f5   : > { %v1876_v40 = vmul.f32 1.442695, %v1803_v8  ;;  %v1991_v60 = vadd.f32 1.0, %v3554_v18  ;;  %6540 = vst [vmem:[#allocation24_spill] sm:$0xff] %v5400_v61  ;;  %3567 = vpow2.f32 %v1870_v51  ;;  %v3556_v8 = vpop.eup %3555  ;;  %v5430_v61 = vpop.permute.xlu1 %1642 }
 0x2f6   : > { %v5373_v42 = vpop.f32.mrb[30].mxu0  ;;  %v5375_v6 = vpop.f32.mrb[22].mxu1  ;;  %v5387_v47 = vadd.f32 %v5230_v52, %v1485_v50  ;;  %v1487_v50 = vmul.f32 %v5232_v62, %v5300_v49  ;;  %v2248_v52 = vld [vmem:[%s6485_s5 + $0x30] sm:$0xff]  ;;  %6545 = vst [vmem:[#allocation29_spill] sm:$0xff] %v5430_v61  ;;  %v1990_v21 = vadd.f32 1.0, %v3556_v8 }
 0x2f7   : > { %6534 = vst [vmem:[#allocation18_spill] sm:$0xff] %v5375_v6  ;;  %v5377_v26 = vpop.f32.mrb[31].mxu0  ;;  %v5379_v39 = vpop.f32.mrb[23].mxu1  ;;  %3569 = vpow2.f32 %v1876_v40  ;;  %v1874_v40 = vmul.f32 1.442695, %v1802_v58 }
 0x2f8   : > { %6535 = vst [vmem:[#allocation19_spill] sm:$0xff] %v5379_v39  ;;  %v1805_v13 = vsub.f32 0.0, %v5387_v47  ;;  %v3558_v18 = vpop.eup %3557  ;;  %3571 = vrcp.f32 %v1991_v60  ;;  %v2257_v39 = vld [vmem:[%s6485_s5 + $0x78] sm:$0xff] }
 0x2f9   : > { %v3560_v51 = vpop.eup %3559  ;;  %3573 = vpow2.f32 %v1874_v40 }
 0x2fa   : > { %v5389_v6 = vpop.f32.mrb[32].mxu0  ;;  %v5391_v28 = vpop.f32.mrb[24].mxu1  ;;  %v1880_v60 = vmul.f32 1.442695, %v1805_v13  ;;  %v5446_v61 = vmul.f32 %v3560_v51, %v5264_v24  ;;  %v1488_v24 = vmul.f32 %v5236_v0, %v5309_v3  ;;  %3575 = vrcp.f32 %v1990_v21 }
 0x2fb   : > { %6536 = vst [vmem:[#allocation20_spill] sm:$0xff] %v5391_v28  ;;  %v5395_v41 = vpop.f32.mrb[33].mxu0  ;;  %v5398_v55 = vpop.f32.mrb[25].mxu1  ;;  %v2244_v28 = vld [vmem:[%s6485_s5 + $0x10] sm:$0xff] }
 0x2fc   : > { %6538 = vst [vmem:[#allocation22_spill] sm:$0xff] %v5395_v41  ;;  %6539 = vst [vmem:[#allocation23_spill] sm:$0xff] %v5398_v55  ;;  %v1486_v55 = vmul.f32 %v5232_v62, %v5292_v45  ;;  %v1489_v62 = vmul.f32 %v5236_v0, %v5314_v15  ;;  %v5439_v45 = vmul.f32 %v3558_v18, %v5262_v23  ;;  %v2256_v15 = vld [vmem:[%s6485_s5 + $0x70] sm:$0xff]  ;;  %v1392_v18 = vpop.permute.xlu0 %1391  ;;  %3577 = vpow2.f32 %v1880_v60 }
 0x2fd   : > { %v3443_v58 = vpack.c.bf16 %v2248_v52, %v2244_v28  ;;  %6548 = vst [vmem:[#allocation32_spill] sm:$0xff] %v5446_v61  ;;  %v3562_v28 = vpop.eup %3561  ;;  %v1504_v21 = vmul.f32 %v1392_v18, %v5238_v2 }
 0x2fe   : > { %v5408_v59 = vpop.f32.mrb[34].mxu0  ;;  %v5410_v30 = vpop.f32.mrb[26].mxu1  ;;  %6546 = vst [vmem:[#allocation30_spill] sm:$0xff] %v5439_v45  ;;  %v5459_v52 = vadd.f32 %v5234_v63, %v1486_v55  ;;  %2434 = vmatprep.mubr.f32.mxu1 %v5439_v45 }
 0x2ff   : > { %6541 = vst [vmem:[#allocation25_spill] sm:$0xff] %v5408_v59  ;;  %6542 = vst [vmem:[#allocation26_spill] sm:$0xff] %v5410_v30  ;;  %v5418_v27 = vpop.f32.mrb[35].mxu0  ;;  %v5420_v49 = vpop.f32.mrb[27].mxu1  ;;  %v2253_v30 = vld [vmem:[%s6485_s5 + $0x58] sm:$0xff]  ;;  %2435 = vmatmul.mubr.f32.vlgmr.msra.gmra.mrb[34].mxu1 %v5446_v61 }
 0x300   : > { %6543 = vst [vmem:[#allocation27_spill] sm:$0xff] %v5418_v27  ;;  %6544 = vst [vmem:[#allocation28_spill] sm:$0xff] %v5420_v49  ;;  %v1804_v27 = vsub.f32 0.0, %v5403_v36  ;;  %v5434_v49 = vadd.f32 %v5234_v63, %v1487_v50  ;;  %v3445_v8 = vpack.c.bf16 %v2257_v39, %v2253_v30  ;;  %v2252_v50 = vld [vmem:[%s6485_s5 + $0x50] sm:$0xff]  ;;  %v3564_v39 = vpop.eup %3563  ;;  %v1490_v63 = vmul.f32 %v5248_v10, %v5322_v11  ;;  %v1648_v45 = vpop.permute.xlu1 %1647 }
 0x301   : > { %3444 = vmatpush1.bf16.msra.mxu1 %v3443_v58  ;;  %v3447_v55 = vpack.c.bf16 %v2256_v15, %v2252_v50  ;;  %v1806_v60 = vsub.f32 0.0, %v5459_v52  ;;  %v1491_v11 = vmul.f32 %v5248_v10, %v5326_v33  ;;  %v5483_v58 = vmul.f32 %v3564_v39, %v5278_v35  ;;  %v1397_v15 = vpop.permute.xlu0 %1396 }
 0x302   : > { %v5441_v59 = vpop.f32.mrb[36].mxu0  ;;  %v5443_v41 = vpop.f32.mrb[28].mxu1  ;;  %v1878_v30 = vmul.f32 1.442695, %v1804_v27  ;;  %v1807_v51 = vsub.f32 0.0, %v5434_v49  ;;  %v1993_v27 = vadd.f32 1.0, %v3562_v28  ;;  %3446 = vmatprep.subr.bf16.mxu1 %v3445_v8  ;;  %v1505_v50 = vmul.f32 %v1392_v18, %v5240_v4 }
 0x303   : > { %6547 = vst [vmem:[#allocation31_spill] sm:$0xff] %v5443_v41  ;;  %v5454_v13 = vpop.f32.mrb[37].mxu0  ;;  %v5456_v23 = vpop.f32.mrb[29].mxu1  ;;  %2440 = vmatprep.mubr.f32.mxu1 %v5483_v58  ;;  %v1506_v10 = vmul.f32 %v1397_v15, %v5244_v7  ;;  %v5499_v18 = vadd.f32 %v1648_v45, %v1504_v21  ;;  %v1492_v7 = vmul.f32 %v5260_v22, %v5340_v1 }
 0x304   : > { %6549 = vst [vmem:[#allocation33_spill] sm:$0xff] %v5456_v23  ;;  %v3566_v41 = vpop.eup %3565  ;;  %v5467_v23 = vadd.f32 %v5242_v5, %v1489_v62  ;;  %v5478_v62 = vadd.f32 %v5242_v5, %v1488_v24  ;;  %3579 = vpow2.f32 %v1878_v30  ;;  %v1884_v2 = vmul.f32 1.442695, %v1807_v51 }
 0x305   : > { %v3568_v3 = vpop.eup %3567  ;;  %3448 = vmatpush1.bf16.msra.mxu1 %v3447_v55  ;;  %3581 = vrcp.f32 %v1993_v27  ;;  %v5495_v4 = vmul.f32 %v3566_v41, %v5282_v37  ;;  %v1882_v24 = vmul.f32 1.442695, %v1806_v60  ;;  %v5503_v30 = vadd.f32 %v5254_v16, %v1491_v11 }
 0x306   : > { %v5471_v0 = vpop.f32.mrb[30].mxu1  ;;  %v3570_v61 = vpop.eup %3569  ;;  %v1992_v28 = vadd.f32 1.0, %v3568_v3  ;;  %v1808_v39 = vsub.f32 0.0, %v5478_v62  ;;  %v5505_v51 = vadd.f32 %v1648_v45, %v1505_v50  ;;  %3583 = vpow2.f32 %v1884_v2 }
 0x307   : > { %6550 = vst [vmem:[#allocation34_spill] sm:$0xff] %v5471_v0  ;;  %v5474_v40 = vpop.f32.mrb[31].mxu1  ;;  %v3572_v8 = vpop.eup %3571  ;;  %v1809_v0 = vsub.f32 0.0, %v5467_v23  ;;  %v1995_v35 = vadd.f32 1.0, %v3570_v61  ;;  %6552 = vst [vmem:[#allocation36_spill] sm:$0xff] %v5495_v4  ;;  %2441 = vmatmul.mubr.f32.gmra.mrb[36].mxu1 %v5495_v4  ;;  %v1507_v45 = vmul.f32 %v1397_v15, %v5246_v9  ;;  %v1493_v1 = vmul.f32 %v5260_v22, %v5344_v38 }
 0x308   : > { %6551 = vst [vmem:[#allocation35_spill] sm:$0xff] %v5474_v40  ;;  %v5488_v40 = vadd.f32 %v5254_v16, %v1490_v63  ;;  %v5511_v37 = vmul.f32 %v3572_v8, %v5298_v48  ;;  %v3574_v41 = vpop.eup %3573  ;;  %v1653_v61 = vpop.permute.xlu1 %1652  ;;  %3585 = vrcp.f32 %v1992_v28  ;;  %v1886_v48 = vmul.f32 1.442695, %v1808_v39 }
 0x309   : > { %v1888_v63 = vmul.f32 1.442695, %v1809_v0  ;;  %v3576_v3 = vpop.eup %3575  ;;  %v5514_v16 = vadd.f32 %v1653_v61, %v1506_v10  ;;  %3587 = vrcp.f32 %v1995_v35  ;;  %v1811_v27 = vsub.f32 0.0, %v5503_v30 }
 0x30a   : > { %v5491_v5 = vpop.f32.mrb[32].mxu1  ;;  %6553 = vst [vmem:[#allocation37_spill] sm:$0xff] %v5511_v37  ;;  %v1810_v55 = vsub.f32 0.0, %v5488_v40  ;;  %2446 = vmatprep.mubr.f32.mxu1 %v5511_v37  ;;  %v3578_v21 = vpop.eup %3577  ;;  %3589 = vpow2.f32 %v1882_v24  ;;  %v1824_v0 = vsub.f32 0.0, %v5499_v18  ;;  %v1825_v60 = vsub.f32 0.0, %v5505_v51 }
 0x30b   : > { %v5497_v33 = vpop.f32.mrb[33].mxu1  ;;  %v1994_v11 = vadd.f32 1.0, %v3574_v41  ;;  %v5524_v50 = vadd.f32 %v5273_v32, %v1492_v7  ;;  %3591 = vpow2.f32 %v1888_v63  ;;  %v1494_v22 = vmul.f32 %v5276_v34, %v5355_v46 }
 0x30c   : > { %v1890_v9 = vmul.f32 1.442695, %v1810_v55  ;;  %v5529_v38 = vmul.f32 %v3576_v3, %v5319_v25  ;;  %v1826_v8 = vsub.f32 0.0, %v5514_v16  ;;  %v5532_v15 = vadd.f32 %v1653_v61, %v1507_v45  ;;  %v1402_v45 = vpop.permute.xlu0 %1401 }
 0x30d   : > { %v1997_v28 = vadd.f32 1.0, %v3578_v21  ;;  %v5535_v10 = vadd.f32 %v5273_v32, %v1493_v1  ;;  %3593 = vpow2.f32 %v1886_v48  ;;  %v1892_v35 = vmul.f32 1.442695, %v1811_v27 }
 0x30e   : > { %6554 = vst [vmem:[#allocation38_spill] sm:$0xff] %v5529_v38  ;;  %v3580_v2 = vpop.eup %3579  ;;  %v1495_v24 = vmul.f32 %v5276_v34, %v5359_v31  ;;  %2447 = vmatmul.mubr.f32.gmra.mrb[38].mxu1 %v5529_v38  ;;  %v1918_v39 = vmul.f32 1.442695, %v1824_v0  ;;  %v1920_v25 = vmul.f32 1.442695, %v1825_v60  ;;  %3595 = vrcp.f32 %v1994_v11 }
 0x30f   : > { %v3582_v46 = vpop.eup %3581  ;;  %v1812_v7 = vsub.f32 0.0, %v5524_v50  ;;  %v1996_v41 = vadd.f32 1.0, %v3580_v2  ;;  %3597 = vpow2.f32 %v1890_v9  ;;  %v5542_v61 = vadd.f32 %v5305_v56, %v1494_v22 }
 0x310   : > { %v1496_v32 = vmul.f32 %v5307_v57, %v5373_v42  ;;  %v3584_v63 = vpop.eup %3583  ;;  %v1922_v55 = vmul.f32 1.442695, %v1826_v8  ;;  %v1827_v34 = vsub.f32 0.0, %v5532_v15  ;;  %3599 = vrcp.f32 %v1997_v28 }
 0x311   : > { %v1813_v31 = vsub.f32 0.0, %v5535_v10  ;;  %3601 = vpow2.f32 %v1892_v35  ;;  %v5549_v1 = vadd.f32 %v5305_v56, %v1495_v24  ;;  %v1497_v21 = vmul.f32 %v5307_v57, %v5377_v26  ;;  %v1658_v26 = vpop.permute.xlu1 %1657 }
 0x312   : > { %v3586_v3 = vpop.eup %3585  ;;  %v5554_v48 = vmul.f32 %v3582_v46, %v5337_v20  ;;  %3603 = vpow2.f32 %v1918_v39  ;;  %v1508_v27 = vmul.f32 %v1402_v45, %v5250_v12  ;;  %v1894_v0 = vmul.f32 1.442695, %v1812_v7  ;;  %v1407_v46 = vpop.permute.xlu0 %1406 }
 0x313   : > { %v3588_v42 = vpop.eup %3587  ;;  %3605 = vrcp.f32 %v1996_v41  ;;  %v1999_v11 = vadd.f32 1.0, %v3584_v63  ;;  %v1814_v9 = vsub.f32 0.0, %v5542_v61  ;;  %v5559_v22 = vadd.f32 %v5331_v43, %v1496_v32 }
 0x314   : > { %6555 = vst [vmem:[#allocation39_spill] sm:$0xff] %v5554_v48  ;;  %v3590_v60 = vpop.eup %3589  ;;  %2452 = vmatprep.mubr.f32.mxu1 %v5554_v48  ;;  %3607 = vpow2.f32 %v1920_v25  ;;  %v1924_v56 = vmul.f32 1.442695, %v1827_v34  ;;  %v1896_v57 = vmul.f32 1.442695, %v1813_v31  ;;  %v1815_v2 = vsub.f32 0.0, %v5549_v1 }
 0x315   : > { %v3592_v20 = vpop.eup %3591  ;;  %3609 = vpow2.f32 %v1922_v55  ;;  %v5564_v12 = vadd.f32 %v5331_v43, %v1497_v21  ;;  %v5567_v8 = vmul.f32 %v3586_v3, %v5349_v54  ;;  %v1998_v28 = vadd.f32 1.0, %v3590_v60  ;;  %v5580_v21 = vpop.permute.xlu1 %1662 }
 0x316   : > { %3611 = vpow2.f32 %v1894_v0  ;;  %v5570_v35 = vmul.f32 %v3588_v42, %v5353_v29  ;;  %v5572_v39 = vadd.f32 %v1658_v26, %v1508_v27  ;;  %v1898_v25 = vmul.f32 1.442695, %v1814_v9  ;;  %v5590_v9 = vpop.permute.xlu0 %1411 }
 0x317   : > { %6556 = vst [vmem:[#allocation40_spill] sm:$0xff] %v5567_v8  ;;  %v3594_v24 = vpop.eup %3593  ;;  %3613 = vrcp.f32 %v1999_v11  ;;  %v1816_v7 = vsub.f32 0.0, %v5559_v22  ;;  %2453 = vmatmul.mubr.f32.gmra.mrb[40].mxu1 %v5567_v8  ;;  %v1509_v41 = vmul.f32 %v1402_v45, %v5252_v14  ;;  %v2001_v54 = vadd.f32 1.0, %v3592_v20  ;;  %v2284_v8 = vld [vmem:[%s6485_s5 + $0x150] sm:$0xff] }
 0x318   : > { %6557 = vst [vmem:[#allocation41_spill] sm:$0xff] %v5570_v35  ;;  %v3596_v43 = vpop.eup %3595  ;;  %3615 = vpow2.f32 %v1896_v57  ;;  %2458 = vmatprep.mubr.f32.mxu1 %v5570_v35  ;;  %v1900_v29 = vmul.f32 1.442695, %v1815_v2  ;;  %v1817_v63 = vsub.f32 0.0, %v5564_v12  ;;  %v1510_v34 = vmul.f32 %v1407_v46, %v5256_v19  ;;  %v2265_v2 = vld [vmem:[%s6485_s5 + $0xb8] sm:$0xff] }
 0x319   : > { %v3598_v32 = vpop.eup %3597  ;;  %3617 = vpow2.f32 %v1924_v56  ;;  %v2000_v31 = vadd.f32 1.0, %v3594_v24  ;;  %v1828_v42 = vsub.f32 0.0, %v5572_v39  ;;  %v1902_v14 = vmul.f32 1.442695, %v1816_v7 }
 0x31a   : > { %v3600_v55 = vpop.eup %3599  ;;  %3619 = vrcp.f32 %v1998_v28  ;;  %v5584_v45 = vmul.f32 %v3596_v43, %v5382_v17  ;;  %v5586_v0 = vadd.f32 %v1658_v26, %v1509_v41  ;;  %v2002_v60 = vadd.f32 1.0, %v3598_v32  ;;  %v2260_v41 = vld [vmem:[%s6485_s5 + $0x90] sm:$0xff] }
 0x31b   : > { %v3602_v3 = vpop.eup %3601  ;;  %3621 = vpow2.f32 %v1898_v25  ;;  %v1498_v19 = vmul.f32 %v5333_v44, %v5389_v6  ;;  %v1904_v56 = vmul.f32 1.442695, %v1817_v63  ;;  %v5594_v20 = vadd.f32 %v5580_v21, %v1510_v34  ;;  %v2261_v6 = vld [vmem:[%s6485_s5 + $0x98] sm:$0xff]  ;;  %v6561_v63 = vld [vmem:[#allocation22_spill] sm:$0xff] }
 0x31c   : > { %6558 = vst [vmem:[#allocation42_spill] sm:$0xff] %v5584_v45  ;;  %v3604_v27 = vpop.eup %3603  ;;  %3623 = vrcp.f32 %v2001_v54  ;;  %2459 = vmatmul.mubr.f32.gmra.mrb[42].mxu1 %v5584_v45  ;;  %v2003_v17 = vadd.f32 1.0, %v3602_v3  ;;  %v5597_v26 = vmul.f32 %v3600_v55, %v5387_v47  ;;  %v1926_v24 = vmul.f32 1.442695, %v1828_v42  ;;  %v2264_v54 = vld [vmem:[%s6485_s5 + $0xb0] sm:$0xff]  ;;  %v6562_v3 = vld [vmem:[#allocation2_spill] sm:$0xff] }
 0x31d   : > { %v3606_v11 = vpop.eup %3605  ;;  %3625 = vpow2.f32 %v1900_v29  ;;  %v1829_v7 = vsub.f32 0.0, %v5586_v0  ;;  %v5609_v43 = vadd.f32 %v5365_v53, %v1498_v19  ;;  %v5621_v29 = vpop.permute.xlu1 %1667  ;;  %v1499_v55 = vmul.f32 %v5333_v44, %v6561_v63 }
 0x31e   : > { %v3608_v57 = vpop.eup %3607  ;;  %3627 = vrcp.f32 %v2000_v31  ;;  %6559 = vst [vmem:[#allocation43_spill] sm:$0xff] %v5597_v26  ;;  %2464 = vmatprep.mubr.f32.mxu1 %v5597_v26  ;;  %v5613_v47 = vmul.f32 %v3606_v11, %v5403_v36  ;;  %v3449_v34 = vpack.c.bf16 %v2265_v2, %v2261_v6  ;;  %v1830_v36 = vsub.f32 0.0, %v5594_v20  ;;  %v6563_v26 = vld [vmem:[#allocation25_spill] sm:$0xff] }
 0x31f   : > { %v5605_v28 = vpop.eup %3609  ;;  %3629 = vpow2.f32 %v1902_v14  ;;  %v1511_v42 = vmul.f32 %v1407_v46, %v6562_v3  ;;  %v3451_v44 = vpack.c.bf16 %v2264_v54, %v2260_v41  ;;  %v2016_v2 = vadd.f32 1.0, %v3604_v27  ;;  %v6567_v41 = vld [vmem:[#allocation27_spill] sm:$0xff] }
 0x320   : > { %v3612_v25 = vpop.eup %3611  ;;  %3631 = vrcp.f32 %v2002_v60  ;;  %6560 = vst [vmem:[#allocation44_spill] sm:$0xff] %v5613_v47  ;;  %2465 = vmatmul.mubr.f32.gmra.mrb[44].mxu1 %v5613_v47  ;;  %v5630_v60 = vpop.permute.xlu0 %1416  ;;  %3450 = vmatprep.subr.bf16.mxu1 %v3449_v34  ;;  %v5634_v63 = vmul.f32 1.442695, %v1829_v7  ;;  %v1818_v46 = vsub.f32 0.0, %v5609_v43  ;;  %v2017_v3 = vadd.f32 1.0, %v3608_v57 }
 0x321   : > { %v3614_v32 = vpop.eup %3613  ;;  %3633 = vpow2.f32 %v1904_v56  ;;  %v2004_v19 = vadd.f32 1.0, %v3612_v25  ;;  %v6564_v56 = vld [vmem:[#allocation17_spill] sm:$0xff]  ;;  %v5638_v47 = vadd.f32 %v5365_v53, %v1499_v55  ;;  %3452 = vmatpush1.bf16.msra.mxu1 %v3451_v44  ;;  %v5643_v34 = vmul.f32 1.442695, %v1830_v36 }
 0x322   : > { %v3616_v31 = vpop.eup %3615  ;;  %3635 = vrcp.f32 %v2003_v17  ;;  %v1500_v45 = vmul.f32 %v6564_v56, %v6563_v26  ;;  %v5641_v25 = vmul.f32 %v3614_v32, %v5434_v49  ;;  %v5646_v27 = vadd.f32 %v5580_v21, %v1511_v42  ;;  %v6568_v55 = vld [vmem:[#allocation21_spill] sm:$0xff] }
 0x323   : > { %v5628_v14 = vpop.eup %3617  ;;  %v2005_v11 = vadd.f32 1.0, %v3616_v31  ;;  %3637 = vpow2.f32 %v1926_v24  ;;  %v6566_v24 = vld [vmem:[#allocation3_spill] sm:$0xff]  ;;  %v1501_v57 = vmul.f32 %v6564_v56, %v6567_v41  ;;  %v5652_v31 = vpop.permute.xlu1 %1672  ;;  %v1906_v42 = vmul.f32 1.442695, %v1818_v46 }
 0x324   : > { %v3620_v6 = vpop.eup %3619  ;;  %6565 = vst [vmem:[#allocation22_spill] sm:$0xff] %v5641_v25  ;;  %v1512_v7 = vmul.f32 %v5590_v9, %v6566_v24  ;;  %v5655_v49 = vadd.f32 %v6568_v55, %v1500_v45  ;;  %2470 = vmatprep.mubr.f32.mxu1 %v5641_v25  ;;  %v5663_v24 = vpop.permute.xlu0 %1421 }
 0x325   : > { %v3622_v17 = vpop.eup %3621  ;;  %3639 = vrcp.f32 %v2005_v11  ;;  %v5659_v32 = vmul.f32 %v3620_v6, %v5459_v52  ;;  %v6570_v11 = vld [vmem:[#allocation24_spill] sm:$0xff] }
 0x326   : > { %v3624_v26 = vpop.eup %3623  ;;  %3641 = vrcp.f32 %v2004_v19  ;;  %v2006_v53 = vadd.f32 1.0, %v3622_v17  ;;  %v1502_v56 = vmul.f32 %v6570_v11, %v5441_v59  ;;  %v6571_v19 = vld [vmem:[#allocation4_spill] sm:$0xff]  ;;  %v1819_v17 = vsub.f32 0.0, %v5638_v47 }
 0x327   : > { %v3626_v54 = vpop.eup %3625  ;;  %6569 = vst [vmem:[#allocation2_spill] sm:$0xff] %v5659_v32  ;;  %3643 = vrcp.f32 %v2016_v2  ;;  %v1513_v45 = vmul.f32 %v5590_v9, %v6571_v19  ;;  %2471 = vmatmul.mubr.f32.gmra.mrb[46].mxu1 %v5659_v32  ;;  %v5670_v52 = vmul.f32 %v3624_v26, %v5467_v23  ;;  %v1831_v2 = vsub.f32 0.0, %v5646_v27  ;;  %v2269_v9 = vld [vmem:[%s6485_s5 + $0xd8] sm:$0xff] }
 0x328   : > { %v3628_v21 = vpop.eup %3627  ;;  %v2007_v36 = vadd.f32 1.0, %v3626_v54  ;;  %3645 = vrcp.f32 %v2017_v3  ;;  %v5674_v59 = vadd.f32 %v6568_v55, %v1501_v57  ;;  %v1503_v46 = vmul.f32 %v6570_v11, %v5454_v13  ;;  %v2273_v3 = vld [vmem:[%s6485_s5 + $0xf8] sm:$0xff]  ;;  %v2268_v13 = vld [vmem:[%s6485_s5 + $0xd0] sm:$0xff] }
 0x329   : > { %v3630_v44 = vpop.eup %3629  ;;  %6572 = vst [vmem:[#allocation25_spill] sm:$0xff] %v5670_v52  ;;  %v5685_v26 = vadd.f32 %v5621_v29, %v1512_v7  ;;  %v1820_v57 = vsub.f32 0.0, %v5655_v49  ;;  %2476 = vmatprep.mubr.f32.mxu1 %v5670_v52  ;;  %v2272_v54 = vld [vmem:[%s6485_s5 + $0xf0] sm:$0xff]  ;;  %v6573_v11 = vld [vmem:[#allocation29_spill] sm:$0xff]  ;;  %v2018_v19 = vadd.f32 1.0, %v5605_v28  ;;  %v5705_v52 = vadd.f32 %v5621_v29, %v1513_v45 }
 0x32a   : > { %v3632_v6 = vpop.eup %3631  ;;  %3647 = vrcp.f32 %v2007_v36  ;;  %v2008_v41 = vadd.f32 1.0, %v3630_v44  ;;  %v5696_v7 = vadd.f32 %v6573_v11, %v1502_v56  ;;  %v5701_v44 = vpop.permute.xlu1 %1677  ;;  %v1908_v32 = vmul.f32 1.442695, %v1819_v17  ;;  %v2280_v45 = vld [vmem:[%s6485_s5 + $0x130] sm:$0xff] }
 0x32b   : > { %v3634_v23 = vpop.eup %3633  ;;  %3649 = vrcp.f32 %v2006_v53  ;;  %v5699_v53 = vmul.f32 %v3628_v21, %v5478_v62  ;;  %v3453_v25 = vpack.c.bf16 %v2273_v3, %v2269_v9  ;;  %v1821_v62 = vsub.f32 0.0, %v5674_v59  ;;  %v2276_v21 = vld [vmem:[%s6485_s5 + $0x110] sm:$0xff]  ;;  %v5726_v9 = vpop.permute.xlu0 %1426  ;;  %v6575_v3 = vld [vmem:[#allocation5_spill] sm:$0xff] }
 0x32c   : > { %v3636_v55 = vpop.eup %3635  ;;  %v2009_v36 = vadd.f32 1.0, %v3634_v23  ;;  %3651 = vpow2.f32 %v1906_v42  ;;  %v2277_v23 = vld [vmem:[%s6485_s5 + $0x118] sm:$0xff]  ;;  %v5717_v28 = vadd.f32 %v6573_v11, %v1503_v46  ;;  %v3455_v29 = vpack.c.bf16 %v2272_v54, %v2268_v13 }
 0x32d   : > { %6574 = vst [vmem:[#allocation17_spill] sm:$0xff] %v5699_v53  ;;  %v2281_v42 = vld [vmem:[%s6485_s5 + $0x138] sm:$0xff]  ;;  %v5713_v56 = vpop.eup %3637  ;;  %2477 = vmatmul.mubr.f32.gmra.mrb[48].mxu1 %v5699_v53  ;;  %v1910_v46 = vmul.f32 1.442695, %v1820_v57  ;;  %3454 = vmatprep.subr.bf16.mxu1 %v3453_v25  ;;  %v5731_v11 = vmul.f32 %v3636_v55, %v5503_v30  ;;  %v1822_v53 = vsub.f32 0.0, %v5696_v7  ;;  %v5741_v35 = vmul.f32 %v3632_v6, %v5488_v40  ;;  %v2288_v40 = vld [vmem:[%s6485_s5 + $0x170] sm:$0xff] }
 0x32e   : > { %3653 = vrcp.f32 %v2009_v36  ;;  %v1514_v36 = vmul.f32 %v5630_v60, %v6575_v3  ;;  %v2285_v13 = vld [vmem:[%s6485_s5 + $0x158] sm:$0xff]  ;;  %3456 = vmatpush1.bf16.msra.mxu1 %v3455_v29  ;;  %v3457_v25 = vpack.c.bf16 %v2281_v42, %v2277_v23  ;;  %v1932_v57 = vmul.f32 1.442695, %v1831_v2 }
 0x32f   : > { %v3640_v17 = vpop.eup %3639  ;;  %3655 = vrcp.f32 %v2008_v41  ;;  %6576 = vst [vmem:[#allocation3_spill] sm:$0xff] %v5731_v11  ;;  %v2289_v54 = vld [vmem:[%s6485_s5 + $0x178] sm:$0xff]  ;;  %6577 = vst [vmem:[#allocation27_spill] sm:$0xff] %v5741_v35  ;;  %v1832_v55 = vsub.f32 0.0, %v5685_v26  ;;  %2482 = vmatprep.mubr.f32.mxu1 %v5731_v11  ;;  %v3459_v3 = vpack.c.bf16 %v2280_v45, %v2276_v21  ;;  %v1823_v2 = vsub.f32 0.0, %v5717_v28  ;;  %v5766_v21 = vpop.permute.xlu1 %1682  ;;  %v6579_v45 = vld [vmem:[#allocation6_spill] sm:$0xff] }
 0x330   : > { %v5744_v41 = vmul.f32 %v3640_v17, %v5535_v10  ;;  %v3642_v30 = vpop.eup %3641  ;;  %3657 = vpow2.f32 %v1908_v32  ;;  %v1912_v10 = vmul.f32 1.442695, %v1821_v62  ;;  %3458 = vmatprep.subr.bf16.mxu1 %v3457_v25  ;;  %v3461_v32 = vpack.c.bf16 %v2289_v54, %v2285_v13  ;;  %v2293_v23 = vld [vmem:[%s6485_s5 + $0x198] sm:$0xff] }
 0x331   : > { %v5754_v6 = vpop.eup %3643  ;;  %3659 = vrcp.f32 %v2018_v19  ;;  %2483 = vmatmul.mubr.f32.gmra.mrb[50].mxu1 %v5741_v35  ;;  %v2297_v42 = vld [vmem:[%s6485_s5 + $0x1b8] sm:$0xff]  ;;  %v1833_v19 = vsub.f32 0.0, %v5705_v52  ;;  %v5771_v62 = vadd.f32 %v5652_v31, %v1514_v36  ;;  %v1515_v17 = vmul.f32 %v5630_v60, %v6579_v45 }
 0x332   : > { %6578 = vst [vmem:[#allocation21_spill] sm:$0xff] %v5744_v41  ;;  %v5764_v29 = vpop.eup %3645  ;;  %3661 = vpow2.f32 %v5634_v63  ;;  %2488 = vmatprep.mubr.f32.mxu1 %v5744_v41  ;;  %v1914_v54 = vmul.f32 1.442695, %v1822_v53  ;;  %v5777_v25 = vmul.f32 %v3642_v30, %v5524_v50  ;;  %3460 = vmatpush1.bf16.msra.mxu1 %v3459_v3  ;;  %v3463_v35 = vpack.c.bf16 %v2288_v40, %v2284_v8  ;;  %v5779_v63 = vpop.permute.xlu0 %1431  ;;  %v2292_v53 = vld [vmem:[%s6485_s5 + $0x190] sm:$0xff] }
 0x333   : > { %3663 = vpow2.f32 %v1910_v46  ;;  %v1934_v36 = vmul.f32 1.442695, %v1832_v55  ;;  %3462 = vmatprep.subr.bf16.mxu1 %v3461_v32  ;;  %v3465_v60 = vpack.c.bf16 %v2297_v42, %v2293_v23  ;;  %v2296_v50 = vld [vmem:[%s6485_s5 + $0x1b0] sm:$0xff]  ;;  %v1916_v46 = vmul.f32 1.442695, %v1823_v2  ;;  %v5806_v23 = vpop.permute.xlu1 %1687 }
 0x334   : > { %v3648_v13 = vpop.eup %3647  ;;  %6580 = vst [vmem:[#allocation24_spill] sm:$0xff] %v5777_v25  ;;  %3665 = vpow2.f32 %v5643_v34  ;;  %v2305_v34 = vld [vmem:[%s6485_s5 + $0x1f8] sm:$0xff]  ;;  %v1936_v30 = vmul.f32 1.442695, %v1833_v19  ;;  %v1834_v55 = vsub.f32 0.0, %v5771_v62  ;;  %v5801_v40 = vadd.f32 %v5652_v31, %v1515_v17  ;;  %v2300_v31 = vld [vmem:[%s6485_s5 + $0x1d0] sm:$0xff] }
 0x335   : > { %v3650_v11 = vpop.eup %3649  ;;  %v5783_v48 = vmul.f32 %v3648_v13, %v5549_v1  ;;  %3667 = vpow2.f32 %v1912_v10  ;;  %2489 = vmatmul.mubr.f32.gmra.mrb[52].mxu1 %v5777_v25  ;;  %v2301_v1 = vld [vmem:[%s6485_s5 + $0x1d8] sm:$0xff]  ;;  %v3467_v2 = vpack.c.bf16 %v2296_v50, %v2292_v53  ;;  %v2019_v17 = vadd.f32 1.0, %v5628_v14  ;;  %v6584_v13 = vld [vmem:[#allocation8_spill] sm:$0xff] }
 0x336   : > { %v3652_v8 = vpop.eup %3651  ;;  %3669 = vpow2.f32 %v1932_v57  ;;  %v5804_v10 = vmul.f32 %v3650_v11, %v5542_v61  ;;  %3464 = vmatpush1.bf16.msra.mxu1 %v3463_v35  ;;  %v3469_v19 = vpack.c.bf16 %v2305_v34, %v2301_v1  ;;  %v2304_v61 = vld [vmem:[%s6485_s5 + $0x1f0] sm:$0xff]  ;;  %v2309_v35 = vld [vmem:[%s6485_s5 + $0x218] sm:$0xff]  ;;  %v5824_v45 = vpop.permute.xlu0 %1436  ;;  %v1938_v1 = vmul.f32 1.442695, %v1834_v55 }
 0x337   : > { %6581 = vst [vmem:[#allocation4_spill] sm:$0xff] %v5783_v48  ;;  %2494 = vmatprep.mubr.f32.mxu1 %v5783_v48  ;;  %3671 = vpow2.f32 %v1914_v54  ;;  %v2010_v57 = vadd.f32 1.0, %v3652_v8  ;;  %3466 = vmatprep.subr.bf16.mxu1 %v3465_v60  ;;  %v1517_v54 = vmul.f32 %v5663_v24, %v6584_v13  ;;  %v2020_v60 = vadd.f32 1.0, %v5713_v56  ;;  %v2312_v56 = vld [vmem:[%s6485_s5 + $0x230] sm:$0xff]  ;;  %v2317_v55 = vld [vmem:[%s6485_s5 + $0x258] sm:$0xff] }
 0x338   : > { %v3654_v3 = vpop.eup %3653  ;;  %6582 = vst [vmem:[#allocation29_spill] sm:$0xff] %v5804_v10  ;;  %3673 = vpow2.f32 %v1934_v36  ;;  %v3471_v8 = vpack.c.bf16 %v2304_v61, %v2300_v31  ;;  %v1835_v14 = vsub.f32 0.0, %v5801_v40  ;;  %v6587_v61 = vld [vmem:[#allocation10_spill] sm:$0xff] }
 0x339   : > { %v3656_v32 = vpop.eup %3655  ;;  %v5809_v42 = vmul.f32 %v3654_v3, %v5564_v12  ;;  %3675 = vpow2.f32 %v1916_v46  ;;  %2495 = vmatmul.mubr.f32.gmra.mrb[54].mxu1 %v5804_v10  ;;  %v2313_v12 = vld [vmem:[%s6485_s5 + $0x238] sm:$0xff]  ;;  %v5855_v31 = vadd.f32 %v5701_v44, %v1517_v54  ;;  %v2316_v54 = vld [vmem:[%s6485_s5 + $0x250] sm:$0xff] }
 0x33a   : > { %v3658_v11 = vpop.eup %3657  ;;  %3677 = vpow2.f32 %v1936_v30  ;;  %v5834_v50 = vmul.f32 %v3656_v32, %v5559_v22  ;;  %3468 = vmatpush1.bf16.msra.mxu1 %v3467_v2  ;;  %v3473_v34 = vpack.c.bf16 %v2313_v12, %v2309_v35  ;;  %v2308_v30 = vld [vmem:[%s6485_s5 + $0x210] sm:$0xff]  ;;  %v6586_v22 = vld [vmem:[#allocation7_spill] sm:$0xff]  ;;  %v2321_v32 = vld [vmem:[%s6485_s5 + $0x278] sm:$0xff] }
 0x33b   : > { %6583 = vst [vmem:[#allocation5_spill] sm:$0xff] %v5809_v42  ;;  %2500 = vmatprep.mubr.f32.mxu1 %v5809_v42  ;;  %v5830_v36 = vpop.eup %3659  ;;  %v2011_v53 = vadd.f32 1.0, %v3658_v11  ;;  %3679 = vrcp.f32 %v2010_v57  ;;  %3470 = vmatprep.subr.bf16.mxu1 %v3469_v19  ;;  %v1516_v2 = vmul.f32 %v5663_v24, %v6586_v22  ;;  %v5852_v19 = vpop.permute.xlu1 %1692  ;;  %v1519_v24 = vmul.f32 %v5726_v9, %v6587_v61 }
 0x33c   : > { %6585 = vst [vmem:[#allocation6_spill] sm:$0xff] %v5834_v50  ;;  %v3662_v46 = vpop.eup %3661  ;;  %v3475_v13 = vpack.c.bf16 %v2312_v56, %v2308_v30  ;;  %v5859_v22 = vpop.permute.xlu0 %1441  ;;  %v1837_v56 = vsub.f32 0.0, %v5855_v31 }
 0x33d   : > { %v3664_v3 = vpop.eup %3663  ;;  %3681 = vrcp.f32 %v2011_v53  ;;  %2501 = vmatmul.mubr.f32.gmra.mrb[56].mxu1 %v5834_v50  ;;  %v2021_v11 = vadd.f32 1.0, %v3662_v46  ;;  %v1940_v50 = vmul.f32 1.442695, %v1835_v14  ;;  %v6588_v46 = vld [vmem:[#allocation9_spill] sm:$0xff] }
 0x33e   : > { %v3666_v57 = vpop.eup %3665  ;;  %3683 = vrcp.f32 %v2019_v17  ;;  %v2012_v35 = vadd.f32 1.0, %v3664_v3  ;;  %3472 = vmatpush1.bf16.msra.mxu1 %v3471_v8  ;;  %v3477_v17 = vpack.c.bf16 %v2321_v32, %v2317_v55  ;;  %v2320_v3 = vld [vmem:[%s6485_s5 + $0x270] sm:$0xff]  ;;  %v5868_v8 = vadd.f32 %v5701_v44, %v1516_v2  ;;  %v2329_v14 = vld [vmem:[%s6485_s5 + $0x2b8] sm:$0xff]  ;;  %v6589_v32 = vld [vmem:[#allocation11_spill] sm:$0xff] }
 0x33f   : > { %v3668_v12 = vpop.eup %3667  ;;  %3685 = vrcp.f32 %v2020_v60  ;;  %3474 = vmatprep.subr.bf16.mxu1 %v3473_v34  ;;  %v1518_v30 = vmul.f32 %v5726_v9, %v6588_v46  ;;  %v5880_v55 = vadd.f32 %v5766_v21, %v1519_v24  ;;  %v2022_v9 = vadd.f32 1.0, %v3666_v57  ;;  %v5884_v46 = vpop.permute.xlu1 %1697  ;;  %v2324_v57 = vld [vmem:[%s6485_s5 + $0x290] sm:$0xff] }
 0x340   : > { %v3670_v53 = vpop.eup %3669  ;;  %3687 = vpow2.f32 %v1938_v1  ;;  %v2013_v42 = vadd.f32 1.0, %v3668_v12  ;;  %v2325_v1 = vld [vmem:[%s6485_s5 + $0x298] sm:$0xff]  ;;  %v1520_v61 = vmul.f32 %v5779_v63, %v6589_v32  ;;  %v1836_v24 = vsub.f32 0.0, %v5868_v8 }
 0x341   : > { %v3672_v60 = vpop.eup %3671  ;;  %3689 = vrcp.f32 %v2012_v35  ;;  %v3479_v35 = vpack.c.bf16 %v2320_v3, %v2316_v54  ;;  %v3481_v48 = vpack.c.bf16 %v2329_v14, %v2325_v1  ;;  %v2023_v25 = vadd.f32 1.0, %v3670_v53  ;;  %v2337_v3 = vld [vmem:[%s6485_s5 + $0x2f8] sm:$0xff] }
 0x342   : > { %v3674_v34 = vpop.eup %3673  ;;  %3691 = vrcp.f32 %v2013_v42  ;;  %v2014_v44 = vadd.f32 1.0, %v3672_v60  ;;  %3476 = vmatpush1.bf16.msra.mxu1 %v3475_v13  ;;  %v6590_v42 = vld [vmem:[#allocation12_spill] sm:$0xff]  ;;  %v5898_v53 = vadd.f32 %v5766_v21, %v1518_v30  ;;  %v1839_v54 = vsub.f32 0.0, %v5880_v55  ;;  %v6591_v30 = vld [vmem:[#allocation13_spill] sm:$0xff] }
 0x343   : > { %v3676_v2 = vpop.eup %3675  ;;  %3693 = vrcp.f32 %v2021_v11  ;;  %3478 = vmatprep.subr.bf16.mxu1 %v3477_v17  ;;  %v1521_v60 = vmul.f32 %v5779_v63, %v6590_v42  ;;  %v2328_v11 = vld [vmem:[%s6485_s5 + $0x2b0] sm:$0xff]  ;;  %v1944_v17 = vmul.f32 1.442695, %v1837_v56  ;;  %v2333_v63 = vld [vmem:[%s6485_s5 + $0x2d8] sm:$0xff]  ;;  %v2024_v14 = vadd.f32 1.0, %v3674_v34 }
 0x344   : > { %v3678_v12 = vpop.eup %3677  ;;  %3695 = vpow2.f32 %v1940_v50  ;;  %v2015_v10 = vadd.f32 1.0, %v3676_v2  ;;  %v5895_v50 = vpop.permute.xlu0 %1446  ;;  %v5908_v56 = vadd.f32 %v5806_v23, %v1520_v61  ;;  %v6592_v2 = vld [vmem:[#allocation14_spill] sm:$0xff]  ;;  %v3483_v41 = vpack.c.bf16 %v2328_v11, %v2324_v57 }
 0x345   : > { %3697 = vrcp.f32 %v2014_v44  ;;  %v3680_v13 = vpop.eup %3679  ;;  %v2025_v44 = vadd.f32 1.0, %v3678_v12  ;;  %v1523_v32 = vmul.f32 %v5824_v45, %v6592_v2  ;;  %v5922_v34 = vadd.f32 %v5806_v23, %v1521_v60  ;;  %v2345_v60 = vld [vmem:[%s6485_s5 + $0x338] sm:$0xff] }
 0x346   : > { %3699 = vrcp.f32 %v2015_v10  ;;  %3480 = vmatpush1.bf16.msra.mxu1 %v3479_v35  ;;  %v1522_v10 = vmul.f32 %v5824_v45, %v6591_v30  ;;  %v5925_v61 = vmul.f32 %v3680_v13, %v5609_v43  ;;  %v3485_v35 = vpack.c.bf16 %v2337_v3, %v2333_v63  ;;  %v5927_v30 = vpop.permute.xlu1 %1702 }
 0x347   : > { %v3682_v1 = vpop.eup %3681  ;;  %3701 = vrcp.f32 %v2022_v9  ;;  %3482 = vmatprep.subr.bf16.mxu1 %v3481_v48  ;;  %v1942_v38 = vmul.f32 1.442695, %v1836_v24  ;;  %v2332_v48 = vld [vmem:[%s6485_s5 + $0x2d0] sm:$0xff]  ;;  %v1948_v23 = vmul.f32 1.442695, %v1839_v54  ;;  %v1840_v45 = vsub.f32 0.0, %v5908_v56 }
 0x348   : > { %v5910_v21 = vpop.eup %3683  ;;  %v5917_v42 = vmul.f32 %v3682_v1, %v5638_v47  ;;  %3703 = vrcp.f32 %v2023_v25  ;;  %6594 = vst [vmem:[#allocation7_spill] sm:$0xff] %v5925_v61  ;;  %v1838_v47 = vsub.f32 0.0, %v5898_v53  ;;  %v2336_v25 = vld [vmem:[%s6485_s5 + $0x2f0] sm:$0xff]  ;;  %v2341_v24 = vld [vmem:[%s6485_s5 + $0x318] sm:$0xff]  ;;  %v5945_v11 = vpop.permute.xlu0 %1451  ;;  %v5948_v13 = vadd.f32 %v5852_v19, %v1522_v10  ;;  %v6595_v54 = vld [vmem:[#allocation15_spill] sm:$0xff] }
 0x349   : > { %v5919_v9 = vpop.eup %3685  ;;  %3705 = vpow2.f32 %v1944_v17  ;;  %v5951_v17 = vadd.f32 %v5852_v19, %v1523_v32  ;;  %v1524_v63 = vmul.f32 %v5859_v22, %v6595_v54  ;;  %v1841_v1 = vsub.f32 0.0, %v5922_v34 }
 0x34a   : > { %6593 = vst [vmem:[#allocation8_spill] sm:$0xff] %v5917_v42  ;;  %v3688_v12 = vpop.eup %3687  ;;  %2506 = vmatprep.mubr.f32.mxu1 %v5917_v42  ;;  %3707 = vrcp.f32 %v2024_v14  ;;  %3484 = vmatpush1.bf16.msra.mxu1 %v3483_v41  ;;  %v6596_v14 = vld [vmem:[#allocation16_spill] sm:$0xff]  ;;  %v1946_v19 = vmul.f32 1.442695, %v1838_v47  ;;  %v3489_v54 = vpack.c.bf16 %v2345_v60, %v2341_v24 }
 0x34b   : > { %v3690_v43 = vpop.eup %3689  ;;  %2507 = vmatmul.mubr.f32.gmra.mrb[58].mxu1 %v5925_v61  ;;  %3709 = vrcp.f32 %v2025_v44  ;;  %v1525_v2 = vmul.f32 %v5859_v22, %v6596_v14  ;;  %3486 = vmatprep.subr.bf16.mxu1 %v3485_v35  ;;  %v3487_v44 = vpack.c.bf16 %v2336_v25, %v2332_v48  ;;  %v2340_v41 = vld [vmem:[%s6485_s5 + $0x310] sm:$0xff]  ;;  %v1950_v35 = vmul.f32 1.442695, %v1840_v45  ;;  %v5979_v48 = vpop.permute.xlu1 %1707 }
 0x34c   : > { %v3692_v57 = vpop.eup %3691  ;;  %3711 = vpow2.f32 %v1942_v38  ;;  %v5964_v32 = vmul.f32 %v3690_v43, %v5655_v49  ;;  %v2344_v22 = vld [vmem:[%s6485_s5 + $0x330] sm:$0xff]  ;;  %v2349_v38 = vld [vmem:[%s6485_s5 + $0x358] sm:$0xff]  ;;  %v1842_v25 = vsub.f32 0.0, %v5948_v13  ;;  %v1843_v43 = vsub.f32 0.0, %v5951_v17  ;;  %v5997_v37 = vpop.permute.xlu0 %1456 }
 0x34d   : > { %v5955_v3 = vpop.eup %3693  ;;  %v5961_v61 = vmul.f32 %v3692_v57, %v5674_v59  ;;  %v2026_v59 = vadd.f32 1.0, %v3688_v12  ;;  %3713 = vpow2.f32 %v1948_v23  ;;  %v2353_v49 = vld [vmem:[%s6485_s5 + $0x378] sm:$0xff]  ;;  %v5984_v12 = vadd.f32 %v5884_v46, %v1524_v63  ;;  %v6599_v23 = vld [vmem:[#allocation19_spill] sm:$0xff]  ;;  %v6600_v63 = vld [vmem:[#allocation18_spill] sm:$0xff] }
 0x34e   : > { %v3696_v10 = vpop.eup %3695  ;;  %6598 = vst [vmem:[#allocation9_spill] sm:$0xff] %v5964_v32  ;;  %v1527_v45 = vmul.f32 %v5895_v50, %v6599_v23  ;;  %v1952_v60 = vmul.f32 1.442695, %v1841_v1  ;;  %v5992_v57 = vadd.f32 %v5884_v46, %v1525_v2  ;;  %3488 = vmatpush1.bf16.msra.mxu1 %v3487_v44  ;;  %v3491_v42 = vpack.c.bf16 %v2344_v22, %v2340_v41  ;;  %v2348_v46 = vld [vmem:[%s6485_s5 + $0x350] sm:$0xff]  ;;  %v2361_v44 = vld [vmem:[%s6485_s5 + $0x3b8] sm:$0xff] }
 0x34f   : > { %6597 = vst [vmem:[#allocation10_spill] sm:$0xff] %v5961_v61  ;;  %v3698_v14 = vpop.eup %3697  ;;  %2512 = vmatprep.mubr.f32.mxu1 %v5961_v61  ;;  %3715 = vpow2.f32 %v1946_v19  ;;  %v1526_v4 = vmul.f32 %v5895_v50, %v6600_v63  ;;  %3490 = vmatprep.subr.bf16.mxu1 %v3489_v54  ;;  %v2027_v2 = vadd.f32 1.0, %v3696_v10  ;;  %v2357_v50 = vld [vmem:[%s6485_s5 + $0x398] sm:$0xff]  ;;  %v1954_v54 = vmul.f32 1.442695, %v1842_v25 }
 0x350   : > { %v3700_v47 = vpop.eup %3699  ;;  %2513 = vmatmul.mubr.f32.gmra.mrb[60].mxu1 %v5964_v32  ;;  %v6002_v23 = vmul.f32 %v3698_v14, %v5696_v7  ;;  %v3493_v32 = vpack.c.bf16 %v2353_v49, %v2349_v38  ;;  %3717 = vrcp.f32 %v2026_v59  ;;  %v6015_v7 = vmul.f32 %v5764_v29, %v5505_v51  ;;  %v6601_v14 = vld [vmem:[#allocation23_spill] sm:$0xff] }
 0x351   : > { %v5989_v24 = vpop.eup %3701  ;;  %v5995_v61 = vmul.f32 %v3700_v47, %v5717_v28  ;;  %v2352_v28 = vld [vmem:[%s6485_s5 + $0x370] sm:$0xff]  ;;  %v1956_v41 = vmul.f32 1.442695, %v1843_v43  ;;  %v1844_v22 = vsub.f32 0.0, %v5984_v12  ;;  %v6025_v10 = vadd.f32 %v5927_v30, %v1527_v45  ;;  %v1713_v47 = vpop.permute.xlu1 %1712 }
 0x352   : > { %v6010_v1 = vpop.eup %3703  ;;  %3719 = vpow2.f32 %v1952_v60  ;;  %v1845_v29 = vsub.f32 0.0, %v5992_v57  ;;  %v1529_v59 = vmul.f32 %v5945_v11, %v6601_v14  ;;  %3492 = vmatpush1.bf16.msra.mxu1 %v3491_v42  ;;  %v3495_v38 = vpack.c.bf16 %v2352_v28, %v2348_v46  ;;  %v2356_v60 = vld [vmem:[%s6485_s5 + $0x390] sm:$0xff] }
 0x353   : > { %2518 = vmatprep.mubr.f32.mxu1 %v5995_v61  ;;  %v3706_v19 = vpop.eup %3705  ;;  %3721 = vpow2.f32 %v1950_v35  ;;  %v6037_v25 = vadd.f32 %v5927_v30, %v1526_v4  ;;  %v6041_v43 = vmul.f32 %v5754_v6, %v5499_v18  ;;  %3494 = vmatprep.subr.bf16.mxu1 %v3493_v32  ;;  %v3497_v45 = vpack.c.bf16 %v2361_v44, %v2357_v50  ;;  %v2360_v42 = vld [vmem:[%s6485_s5 + $0x3b0] sm:$0xff]  ;;  %v2365_v18 = vld [vmem:[%s6485_s5 + $0x3d8] sm:$0xff]  ;;  %v1462_v32 = vpop.permute.xlu0 %1461 }
 0x354   : > { %2519 = vmatmul.mubr.f32.gmra.mrb[62].mxu1 %v6002_v23  ;;  %v6028_v51 = vpop.eup %3707  ;;  %3723 = vrcp.f32 %v2027_v2  ;;  %v2029_v63 = vadd.f32 1.0, %v3706_v19  ;;  %v6051_v4 = vmul.f32 %v5910_v21, %v5532_v15  ;;  %v2369_v6 = vld [vmem:[%s6485_s5 + $0x3f8] sm:$0xff]  ;;  %v1958_v35 = vmul.f32 1.442695, %v1844_v22  ;;  %v6602_v28 = vld [vmem:[#allocation20_spill] sm:$0xff] }
 0x355   : > { %2524 = vmatprep.mubr.f32.mxu1 %v6015_v7  ;;  %v6034_v49 = vpop.eup %3709  ;;  %v1847_v46 = vsub.f32 0.0, %v6025_v10  ;;  %v1528_v2 = vmul.f32 %v5945_v11, %v6602_v28  ;;  %v6603_v50 = vld [vmem:[#allocation28_spill] sm:$0xff]  ;;  %3725 = vpow2.f32 %v1956_v41  ;;  %v1960_v44 = vmul.f32 1.442695, %v1845_v29 }
 0x356   : > { %v3712_v30 = vpop.eup %3711  ;;  %v1531_v15 = vmul.f32 %v5997_v37, %v6603_v50  ;;  %v6066_v19 = vadd.f32 %v5979_v48, %v1529_v59  ;;  %3496 = vmatpush1.bf16.msra.mxu1 %v3495_v38  ;;  %v3499_v22 = vpack.c.bf16 %v2360_v42, %v2356_v60  ;;  %3727 = vpow2.f32 %v1954_v54  ;;  %v2364_v41 = vld [vmem:[%s6485_s5 + $0x3d0] sm:$0xff]  ;;  %v6604_v38 = vld [vmem:[#allocation26_spill] sm:$0xff] }
 0x357   : > { %v3714_v21 = vpop.eup %3713  ;;  %v1846_v14 = vsub.f32 0.0, %v6037_v25  ;;  %v6072_v11 = vmul.f32 %v5830_v36, %v5514_v16  ;;  %3498 = vmatprep.subr.bf16.mxu1 %v3497_v45  ;;  %v3501_v28 = vpack.c.bf16 %v2369_v6, %v2365_v18  ;;  %v2368_v29 = vld [vmem:[%s6485_s5 + $0x3f0] sm:$0xff]  ;;  %v2028_v59 = vadd.f32 1.0, %v3712_v30  ;;  %v1718_v36 = vpop.permute.xlu1 %1717 }
 0x358   : > { %2525 = vmatmul.mubr.f32.gmra.mrb[64].mxu1 %v6041_v43  ;;  %3729 = vrcp.f32 %v2029_v63  ;;  %v1530_v54 = vmul.f32 %v5997_v37, %v6604_v38  ;;  %v6084_v60 = vmul.f32 %v5955_v3, %v5586_v0  ;;  %v2031_v45 = vadd.f32 1.0, %v3714_v21  ;;  %v6605_v63 = vld [vmem:[#allocation33_spill] sm:$0xff]  ;;  %v1467_v3 = vpop.permute.xlu0 %1466 }
 0x359   : > { %2530 = vmatprep.mubr.f32.mxu1 %v6051_v4  ;;  %v3716_v16 = vpop.eup %3715  ;;  %v1964_v42 = vmul.f32 1.442695, %v1847_v46  ;;  %v6087_v18 = vadd.f32 %v5979_v48, %v1528_v2  ;;  %v6089_v6 = vadd.f32 %v1713_v47, %v1531_v15  ;;  %3731 = vpow2.f32 %v1960_v44 }
 0x35a   : > { %v6092_v30 = vpop.eup %3717  ;;  %v1849_v37 = vsub.f32 0.0, %v6066_v19  ;;  %v1533_v50 = vmul.f32 %v1462_v32, %v6605_v63  ;;  %3500 = vmatpush1.bf16.msra.mxu1 %v3499_v22  ;;  %v3503_v0 = vpack.c.bf16 %v2368_v29, %v2364_v41  ;;  %3733 = vpow2.f32 %v1958_v35 }
 0x35b   : > { %v1962_v46 = vmul.f32 1.442695, %v1846_v14  ;;  %v6099_v48 = vmul.f32 %v5919_v9, %v5572_v39  ;;  %3502 = vmatprep.subr.bf16.mxu1 %v3501_v28  ;;  %3735 = vrcp.f32 %v2028_v59  ;;  %v2030_v15 = vadd.f32 1.0, %v3716_v16  ;;  %v6606_v14 = vld [vmem:[#allocation31_spill] sm:$0xff] }
 0x35c   : > { %2531 = vmatmul.mubr.f32.gmra.mrb[66].mxu1 %v6072_v11  ;;  %v3720_v2 = vpop.eup %3719  ;;  %v6101_v21 = vadd.f32 %v1713_v47, %v1530_v54  ;;  %v6105_v44 = vmul.f32 %v6010_v1, %v5646_v27  ;;  %3737 = vrcp.f32 %v2031_v45  ;;  %v1848_v22 = vsub.f32 0.0, %v6087_v18  ;;  %v6607_v47 = vld [vmem:[#allocation35_spill] sm:$0xff]  ;;  %v1723_v27 = vpop.permute.xlu1 %1722 }
 0x35d   : > { %2536 = vmatprep.mubr.f32.mxu1 %v6084_v60  ;;  %v3722_v38 = vpop.eup %3721  ;;  %v1851_v35 = vsub.f32 0.0, %v6089_v6  ;;  %v1532_v41 = vmul.f32 %v1462_v32, %v6606_v14  ;;  %3739 = vpow2.f32 %v1964_v42  ;;  %v1968_v9 = vmul.f32 1.442695, %v1849_v37  ;;  %v1472_v37 = vpop.permute.xlu0 %1471 }
 0x35e   : > { %v3724_v39 = vpop.eup %3723  ;;  %v6111_v28 = vadd.f32 %v1718_v36, %v1533_v50  ;;  %v1535_v29 = vmul.f32 %v1467_v3, %v6607_v47  ;;  %3504 = vmatpush1.bf16.msra.mxu1 %v3503_v0  ;;  %v2033_v1 = vadd.f32 1.0, %v3720_v2  ;;  %3741 = vpow2.f32 %v1962_v46  ;;  %v6608_v46 = vld [vmem:[#allocation34_spill] sm:$0xff] }
 0x35f   : > { %v6117_v59 = vmul.f32 %v5989_v24, %v5594_v20  ;;  %v3726_v32 = vpop.eup %3725  ;;  %3743 = vrcp.f32 %v2030_v15  ;;  %v2032_v54 = vadd.f32 1.0, %v3722_v38  ;;  %v1850_v16 = vsub.f32 0.0, %v6101_v21 }
 0x360   : > { %2537 = vmatmul.mubr.f32.gmra.mrb[68].mxu1 %v6099_v48  ;;  %v6122_v45 = vmul.f32 %v6034_v49, %v5705_v52  ;;  %v3728_v42 = vpop.eup %3727  ;;  %v1966_v63 = vmul.f32 1.442695, %v1848_v22  ;;  %v1972_v50 = vmul.f32 1.442695, %v1851_v35  ;;  %v6124_v0 = vadd.f32 %v1718_v36, %v1532_v41  ;;  %v1728_v41 = vpop.permute.xlu1 %1727 }
 0x361   : > { %2542 = vmatprep.mubr.f32.mxu1 %v6105_v44  ;;  %v1534_v2 = vmul.f32 %v1467_v3, %v6608_v46  ;;  %3745 = vpow2.f32 %v1968_v9  ;;  %v1853_v24 = vsub.f32 0.0, %v6111_v28  ;;  %v6129_v15 = vadd.f32 %v1723_v27, %v1535_v29 }
 0x362   : > { %v3730_v20 = vpop.eup %3729  ;;  %v1537_v38 = vmul.f32 %v1472_v37, %v5497_v33  ;;  %3747 = vrcp.f32 %v2033_v1  ;;  %v2035_v52 = vadd.f32 1.0, %v3726_v32  ;;  %v6135_v49 = vmul.f32 %v6028_v51, %v5685_v26 }
 0x363   : > { %v3732_v36 = vpop.eup %3731  ;;  %3749 = vrcp.f32 %v2032_v54  ;;  %v2034_v3 = vadd.f32 1.0, %v3728_v42  ;;  %v1970_v22 = vmul.f32 1.442695, %v1850_v16  ;;  %v6138_v35 = vmul.f32 %v3724_v39, %v5801_v40 }
 0x364   : > { %2543 = vmatmul.mubr.f32.gmra.mrb[70].mxu1 %v6117_v59  ;;  %v3734_v14 = vpop.eup %3733  ;;  %3751 = vpow2.f32 %v1966_v63  ;;  %v1852_v33 = vsub.f32 0.0, %v6124_v0  ;;  %v6141_v9 = vadd.f32 %v1723_v27, %v1534_v2  ;;  %v1536_v47 = vmul.f32 %v1472_v37, %v5491_v5 }
 0x365   : > { %2548 = vmatprep.mubr.f32.mxu1 %v6122_v45  ;;  %v3736_v26 = vpop.eup %3735  ;;  %3753 = vpow2.f32 %v1972_v50  ;;  %v1976_v51 = vmul.f32 1.442695, %v1853_v24  ;;  %v1855_v29 = vsub.f32 0.0, %v6129_v15  ;;  %v6146_v1 = vadd.f32 %v1728_v41, %v1537_v38 }
 0x366   : > { %v3738_v40 = vpop.eup %3737  ;;  %3755 = vrcp.f32 %v2035_v52  ;;  %v2037_v39 = vadd.f32 1.0, %v3732_v36  ;;  %v6151_v27 = vmul.f32 %v6092_v30, %v5771_v62  ;;  %v2036_v5 = vadd.f32 1.0, %v3734_v14 }
 0x367   : > { %v3740_v32 = vpop.eup %3739  ;;  %3757 = vrcp.f32 %v2034_v3  ;;  %v6154_v54 = vmul.f32 %v3730_v20, %v5855_v31  ;;  %v1974_v42 = vmul.f32 1.442695, %v1852_v33  ;;  %v1854_v37 = vsub.f32 0.0, %v6141_v9 }
 0x368   : > { %2549 = vmatmul.mubr.f32.gmra.mrb[72].mxu1 %v6135_v49  ;;  %v3742_v16 = vpop.eup %3741  ;;  %3759 = vpow2.f32 %v1970_v22  ;;  %v6157_v63 = vadd.f32 %v1728_v41, %v1536_v47  ;;  %v1980_v46 = vmul.f32 1.442695, %v1855_v29  ;;  %v1857_v62 = vsub.f32 0.0, %v6146_v1 }
 0x369   : > { %2554 = vmatprep.mubr.f32.mxu1 %v6138_v35  ;;  %v3744_v50 = vpop.eup %3743  ;;  %3761 = vpow2.f32 %v1976_v51  ;;  %v2039_v30 = vadd.f32 1.0, %v3740_v32  ;;  %v6163_v31 = vmul.f32 %v3736_v26, %v5868_v8  ;;  %v2038_v20 = vadd.f32 1.0, %v3742_v16 }
 0x36a   : > { %3763 = vrcp.f32 %v2037_v39  ;;  %v6166_v24 = vmul.f32 %v3738_v40, %v5880_v55  ;;  %v1978_v52 = vmul.f32 1.442695, %v1854_v37  ;;  %v1856_v36 = vsub.f32 0.0, %v6157_v63 }
 0x36b   : > { %v3746_v2 = vpop.eup %3745  ;;  %3765 = vrcp.f32 %v2036_v5  ;;  %v1984_v22 = vmul.f32 1.442695, %v1857_v62  ;;  %v6172_v41 = vmul.f32 %v3744_v50, %v5898_v53 }
 0x36c   : > { %2555 = vmatmul.mubr.f32.gmra.mrb[74].mxu1 %v6151_v27  ;;  %v3748_v38 = vpop.eup %3747  ;;  %3767 = vpow2.f32 %v1974_v42  ;;  %v2041_v14 = vadd.f32 1.0, %v3746_v2  ;;  %v1982_v26 = vmul.f32 1.442695, %v1856_v36 }
 0x36d   : > { %2560 = vmatprep.mubr.f32.mxu1 %v6154_v54  ;;  %v3750_v3 = vpop.eup %3749  ;;  %3769 = vpow2.f32 %v1980_v46  ;;  %v6175_v33 = vmul.f32 %v3748_v38, %v5922_v34 }
 0x36e   : > { %v3752_v8 = vpop.eup %3751  ;;  %3771 = vrcp.f32 %v2039_v30  ;;  %v6180_v53 = vmul.f32 %v3750_v3, %v5908_v56 }
 0x36f   : > { %v3754_v55 = vpop.eup %3753  ;;  %3773 = vrcp.f32 %v2038_v20  ;;  %v2040_v29 = vadd.f32 1.0, %v3752_v8 }
 0x370   : > { %2561 = vmatmul.mubr.f32.gmra.mrb[76].mxu1 %v6163_v31  ;;  %v3756_v47 = vpop.eup %3755  ;;  %3775 = vpow2.f32 %v1978_v52  ;;  %v2043_v39 = vadd.f32 1.0, %v3754_v55 }
 0x371   : > { %2566 = vmatprep.mubr.f32.mxu1 %v6166_v24  ;;  %v3758_v51 = vpop.eup %3757  ;;  %3777 = vpow2.f32 %v1984_v22  ;;  %v6183_v34 = vmul.f32 %v3756_v47, %v5951_v17 }
 0x372   : > { %v3760_v40 = vpop.eup %3759  ;;  %3779 = vrcp.f32 %v2041_v14  ;;  %v6188_v46 = vmul.f32 %v3758_v51, %v5948_v13 }
 0x373   : > { %v3762_v32 = vpop.eup %3761  ;;  %3781 = vpow2.f32 %v1982_v26  ;;  %v2042_v42 = vadd.f32 1.0, %v3760_v40 }
 0x374   : > { %2567 = vmatmul.mubr.f32.gmra.mrb[78].mxu1 %v6172_v41  ;;  %v3764_v5 = vpop.eup %3763  ;;  %3783 = vrcp.f32 %v2040_v29  ;;  %v2045_v50 = vadd.f32 1.0, %v3762_v32 }
 0x375   : > { %2572 = vmatprep.mubr.f32.mxu1 %v6175_v33  ;;  %v3766_v16 = vpop.eup %3765  ;;  %3785 = vrcp.f32 %v2043_v39  ;;  %v6191_v62 = vmul.f32 %v3764_v5, %v5992_v57 }
 0x376   : > { %v3768_v37 = vpop.eup %3767  ;;  %3787 = vrcp.f32 %v2042_v42  ;;  %v6196_v52 = vmul.f32 %v3766_v16, %v5984_v12 }
 0x377   : > { %v3770_v56 = vpop.eup %3769  ;;  %v2044_v2 = vadd.f32 1.0, %v3768_v37  ;;  %3789 = vrcp.f32 %v2045_v50  ;;  %v6610_v37 = vld [vmem:[#allocation32_spill] sm:$0xff]  ;;  %v6612_v50 = vld [vmem:[#allocation37_spill] sm:$0xff] }
 0x378   : > { %2573 = vmatmul.mubr.f32.gmra.mrb[80].mxu1 %v6180_v53  ;;  %v3772_v17 = vpop.eup %3771  ;;  %v2047_v38 = vadd.f32 1.0, %v3770_v56  ;;  %v6614_v56 = vld [vmem:[#allocation39_spill] sm:$0xff] }
 0x379   : > { %2578 = vmatprep.mubr.f32.mxu1 %v6183_v34  ;;  %v3774_v30 = vpop.eup %3773  ;;  %v6199_v36 = vmul.f32 %v3772_v17, %v6025_v10  ;;  %3791 = vrcp.f32 %v2044_v2  ;;  %v6615_v17 = vld [vmem:[#allocation40_spill] sm:$0xff]  ;;  %v6618_v2 = vld [vmem:[#allocation43_spill] sm:$0xff] }
 0x37a   : > { %v3776_v20 = vpop.eup %3775  ;;  %3793 = vrcp.f32 %v2047_v38  ;;  %v6204_v14 = vmul.f32 %v3774_v30, %v6037_v25  ;;  %v6617_v30 = vld [vmem:[#allocation42_spill] sm:$0xff] }
 0x37b   : > { %v3778_v13 = vpop.eup %3777  ;;  %v2046_v3 = vadd.f32 1.0, %v3776_v20  ;;  %v6619_v20 = vld [vmem:[#allocation44_spill] sm:$0xff]  ;;  %v6621_v38 = vld [vmem:[#allocation2_spill] sm:$0xff] }
 0x37c   : > { %2579 = vmatmul.mubr.f32.gmra.mrb[82].mxu1 %v6188_v46  ;;  %v3780_v57 = vpop.eup %3779  ;;  %v2049_v8 = vadd.f32 1.0, %v3778_v13  ;;  %v6622_v13 = vld [vmem:[#allocation25_spill] sm:$0xff] }
 0x37d   : > { %2584 = vmatprep.mubr.f32.mxu1 %v6191_v62  ;;  %v3782_v22 = vpop.eup %3781  ;;  %v6207_v12 = vmul.f32 %v3780_v57, %v6066_v19  ;;  %3795 = vrcp.f32 %v2046_v3  ;;  %v6623_v57 = vld [vmem:[#allocation17_spill] sm:$0xff]  ;;  %v6624_v3 = vld [vmem:[#allocation3_spill] sm:$0xff] }
 0x37e   : > { %v3784_v55 = vpop.eup %3783  ;;  %v2048_v10 = vadd.f32 1.0, %v3782_v22  ;;  %3797 = vrcp.f32 %v2049_v8  ;;  %v6625_v22 = vld [vmem:[#allocation27_spill] sm:$0xff]  ;;  %v6626_v8 = vld [vmem:[#allocation21_spill] sm:$0xff] }
 0x37f   : > { %v3786_v47 = vpop.eup %3785  ;;  %v6212_v26 = vmul.f32 %v3784_v55, %v6087_v18  ;;  %v6627_v55 = vld [vmem:[#allocation24_spill] sm:$0xff] }
 0x380   : > { %2585 = vmatmul.mubr.f32.gmra.mrb[84].mxu1 %v6196_v52  ;;  %v3788_v51 = vpop.eup %3787  ;;  %v6215_v29 = vmul.f32 %v3786_v47, %v6089_v6  ;;  %3799 = vrcp.f32 %v2048_v10  ;;  %v6628_v47 = vld [vmem:[#allocation4_spill] sm:$0xff]  ;;  %v6629_v10 = vld [vmem:[#allocation29_spill] sm:$0xff] }
 0x381   : > { %2590 = vmatprep.mubr.f32.mxu1 %v6199_v36  ;;  %v3790_v25 = vpop.eup %3789  ;;  %v6220_v19 = vmul.f32 %v3788_v51, %v6101_v21  ;;  %v6630_v51 = vld [vmem:[#allocation5_spill] sm:$0xff] }
 0x382   : > { %v6223_v39 = vmul.f32 %v3790_v25, %v6111_v28  ;;  %v6631_v25 = vld [vmem:[#allocation6_spill] sm:$0xff] }
 0x383   : > { %v3792_v40 = vpop.eup %3791 }
 0x384   : > { %2591 = vmatmul.mubr.f32.gmra.mrb[86].mxu1 %v6204_v14  ;;  %v3794_v32 = vpop.eup %3793  ;;  %v6228_v18 = vmul.f32 %v3792_v40, %v6124_v0  ;;  %v6632_v40 = vld [vmem:[#allocation8_spill] sm:$0xff] }
 0x385   : > { %2596 = vmatprep.mubr.f32.mxu1 %v6207_v12  ;;  %v6231_v5 = vmul.f32 %v3794_v32, %v6129_v15  ;;  %v6609_v15 = vld [vmem:[#allocation30_spill] sm:$0xff]  ;;  %v6633_v32 = vld [vmem:[#allocation7_spill] sm:$0xff] }
 0x387   : > { %v3796_v6 = vpop.eup %3795 }
 0x388   : > { %2597 = vmatmul.mubr.f32.gmra.mrb[88].mxu1 %v6212_v26  ;;  %v3798_v16 = vpop.eup %3797  ;;  %v6236_v21 = vmul.f32 %v3796_v6, %v6141_v9  ;;  %v6611_v9 = vld [vmem:[#allocation36_spill] sm:$0xff]  ;;  %v6634_v6 = vld [vmem:[#allocation10_spill] sm:$0xff] }
 0x389   : > { %2602 = vmatprep.mubr.f32.mxu1 %v6215_v29  ;;  %v6239_v42 = vmul.f32 %v3798_v16, %v6146_v1  ;;  %v6613_v1 = vld [vmem:[#allocation38_spill] sm:$0xff]  ;;  %v6635_v16 = vld [vmem:[#allocation9_spill] sm:$0xff] }
 0x38a   : > { %v3800_v28 = vpop.eup %3799 }
 0x38b   : > { %v6244_v0 = vmul.f32 %v3800_v28, %v6157_v63  ;;  %v6616_v63 = vld [vmem:[#allocation41_spill] sm:$0xff] }
 0x38c   : > { %2603 = vmatmul.mubr.f32.gmra.mrb[90].mxu1 %v6220_v19 }
 0x38d   : > { %2608 = vmatprep.mubr.f32.mxu1 %v6223_v39 }
 0x390   : > { %2609 = vmatmul.mubr.f32.gmra.mrb[92].mxu1 %v6228_v18 }
 0x391   : > { %2614 = vmatprep.mubr.f32.mxu1 %v6231_v5 }
 0x394   : > { %2615 = vmatmul.mubr.f32.gmra.mrb[94].mxu1 %v6236_v21 }
 0x395   : > { %2620 = vmatprep.mubr.f32.mxu1 %v6239_v42 }
 0x398   : > { %2621 = vmatmul.mubr.f32.gmra.mrb[96].mxu1 %v6244_v0 }
 0x399   : > { %2691 = vmatprep.mubr.f32.mxu1 %v6609_v15 }
 0x39c   : > { %2692 = vmatmul.mubr.f32.vlgmr.msra.gmra.mrb[98].mxu1 %v6610_v37 }
 0x39d   : > { %2697 = vmatprep.mubr.f32.mxu1 %v5483_v58  ;;  %v6620_v58 = vld [vmem:[#allocation22_spill] sm:$0xff] }
 0x3a0   : > { %2698 = vmatmul.mubr.f32.gmra.mrb[100].mxu1 %v6611_v9 }
 0x3a1   : > { %2703 = vmatprep.mubr.f32.mxu1 %v6612_v50 }
 0x3a4   : > { %2704 = vmatmul.mubr.f32.gmra.mrb[102].mxu1 %v6613_v1 }
 0x3a5   : > { %2709 = vmatprep.mubr.f32.mxu1 %v6614_v56 }
 0x3a8   : > { %2710 = vmatmul.mubr.f32.gmra.mrb[104].mxu1 %v6615_v17 }
 0x3a9   : > { %2715 = vmatprep.mubr.f32.mxu1 %v6616_v63 }
 0x3ac   : > { %2716 = vmatmul.mubr.f32.gmra.mrb[106].mxu1 %v6617_v30 }
 0x3ad   : > { %2721 = vmatprep.mubr.f32.mxu1 %v6618_v2 }
 0x3b0   : > { %2722 = vmatmul.mubr.f32.gmra.mrb[108].mxu1 %v6619_v20 }
 0x3b1   : > { %2727 = vmatprep.mubr.f32.mxu1 %v6620_v58 }
 0x3b4   : > { %2728 = vmatmul.mubr.f32.gmra.mrb[110].mxu1 %v6621_v38 }
 0x3b5   : > { %2733 = vmatprep.mubr.f32.mxu1 %v6622_v13 }
 0x3b8   : > { %2734 = vmatmul.mubr.f32.gmra.mrb[112].mxu1 %v6623_v57 }
 0x3b9   : > { %2739 = vmatprep.mubr.f32.mxu1 %v6624_v3 }
 0x3bc   : > { %2740 = vmatmul.mubr.f32.gmra.mrb[114].mxu1 %v6625_v22 }
 0x3bd   : > { %2745 = vmatprep.mubr.f32.mxu1 %v6626_v8 }
 0x3c0   : > { %2746 = vmatmul.mubr.f32.gmra.mrb[116].mxu1 %v6627_v55 }
 0x3c1   : > { %2751 = vmatprep.mubr.f32.mxu1 %v6628_v47 }
 0x3c4   : > { %2752 = vmatmul.mubr.f32.gmra.mrb[118].mxu1 %v6629_v10 }
 0x3c5   : > { %2757 = vmatprep.mubr.f32.mxu1 %v6630_v51 }
 0x3c8   : > { %2758 = vmatmul.mubr.f32.gmra.mrb[120].mxu1 %v6631_v25 }
 0x3c9   : > { %2763 = vmatprep.mubr.f32.mxu1 %v6632_v40 }
 0x3cc   : > { %2764 = vmatmul.mubr.f32.gmra.mrb[122].mxu1 %v6633_v32 }
 0x3cd   : > { %2769 = vmatprep.mubr.f32.mxu1 %v6634_v6 }
 0x3d0   : > { %2770 = vmatmul.mubr.f32.gmra.mrb[124].mxu1 %v6635_v16 }
 0x3d1   : > { %2775 = vmatprep.mubr.f32.mxu1 %v5995_v61 }
 0x3d2   : > { %v2436_v28 = vpop.f32.mrb[34].mxu1 }
 0x3d3   : > { %2884 = vst [vmem:[%s6278_s20] sm:$0xff] %v2436_v28  ;;  %v2438_v15 = vpop.f32.mrb[35].mxu1 }
 0x3d4   : > { %2885 = vst [vmem:[%s6278_s20 + $0x8] sm:$0xff] %v2438_v15  ;;  %2776 = vmatmul.mubr.f32.gmra.mrb[126].mxu1 %v6002_v23 }
 0x3d5   : > { %2781 = vmatprep.mubr.f32.mxu1 %v6015_v7 }
 0x3d8   : > { %2782 = vmatmul.mubr.f32.gmra.mrb[128].mxu1 %v6041_v43 }
 0x3d9   : > { %2787 = vmatprep.mubr.f32.mxu1 %v6051_v4 }
 0x3da   : > { %v2442_v37 = vpop.f32.mrb[36].mxu1 }
 0x3db   : > { %2889 = vst [vmem:[%s6278_s20 + $0x20] sm:$0xff] %v2442_v37  ;;  %v2444_v9 = vpop.f32.mrb[37].mxu1 }
 0x3dc   : > { %2890 = vst [vmem:[%s6278_s20 + $0x28] sm:$0xff] %v2444_v9  ;;  %2788 = vmatmul.mubr.f32.gmra.mrb[130].mxu1 %v6072_v11 }
 0x3dd   : > { %2793 = vmatprep.mubr.f32.mxu1 %v6084_v60 }
 0x3e0   : > { %2794 = vmatmul.mubr.f32.gmra.mrb[132].mxu1 %v6099_v48 }
 0x3e1   : > { %v2448_v61 = vpop.f32.mrb[38].mxu1  ;;  %2799 = vmatprep.mubr.f32.mxu1 %v6105_v44 }
 0x3e2   : > { %2893 = vst [vmem:[%s6278_s20 + $0x40] sm:$0xff] %v2448_v61  ;;  %v2450_v23 = vpop.f32.mrb[39].mxu1 }
 0x3e3   : > { %2894 = vst [vmem:[%s6278_s20 + $0x48] sm:$0xff] %v2450_v23 }
 0x3e4   : > { %2800 = vmatmul.mubr.f32.gmra.mrb[134].mxu1 %v6117_v59 }
 0x3e5   : > { %2805 = vmatprep.mubr.f32.mxu1 %v6122_v45 }
 0x3e8   : > { %2806 = vmatmul.mubr.f32.gmra.mrb[136].mxu1 %v6135_v49 }
 0x3e9   : > { %2811 = vmatprep.mubr.f32.mxu1 %v6138_v35 }
 0x3ea   : > { %v2454_v7 = vpop.f32.mrb[40].mxu1 }
 0x3eb   : > { %2897 = vst [vmem:[%s6278_s20 + $0x60] sm:$0xff] %v2454_v7  ;;  %v2456_v43 = vpop.f32.mrb[41].mxu1 }
 0x3ec   : > { %2898 = vst [vmem:[%s6278_s20 + $0x68] sm:$0xff] %v2456_v43  ;;  %2812 = vmatmul.mubr.f32.gmra.mrb[138].mxu1 %v6151_v27 }
 0x3ed   : > { %2817 = vmatprep.mubr.f32.mxu1 %v6154_v54 }
 0x3ef   : > { %v2460_v4 = vpop.f32.mrb[42].mxu1 }
 0x3f0   : > { %2818 = vmatmul.mubr.f32.gmra.mrb[140].mxu1 %v6163_v31  ;;  %2901 = vst [vmem:[%s6278_s20 + $0x80] sm:$0xff] %v2460_v4  ;;  %v2462_v11 = vpop.f32.mrb[43].mxu1 }
 0x3f1   : > { %2823 = vmatprep.mubr.f32.mxu1 %v6166_v24  ;;  %2902 = vst [vmem:[%s6278_s20 + $0x88] sm:$0xff] %v2462_v11 }
 0x3f3   : > { %v2466_v60 = vpop.f32.mrb[44].mxu1 }
 0x3f4   : > { %2824 = vmatmul.mubr.f32.gmra.mrb[142].mxu1 %v6172_v41  ;;  %2905 = vst [vmem:[%s6278_s20 + $0xa0] sm:$0xff] %v2466_v60  ;;  %v2468_v48 = vpop.f32.mrb[45].mxu1 }
 0x3f5   : > { %2829 = vmatprep.mubr.f32.mxu1 %v6175_v33  ;;  %2906 = vst [vmem:[%s6278_s20 + $0xa8] sm:$0xff] %v2468_v48 }
 0x3f8   : > { %2830 = vmatmul.mubr.f32.gmra.mrb[144].mxu1 %v6180_v53 }
 0x3f9   : > { %2835 = vmatprep.mubr.f32.mxu1 %v6183_v34 }
 0x3fa   : > { %v2472_v44 = vpop.f32.mrb[46].mxu1 }
 0x3fb   : > { %2909 = vst [vmem:[%s6278_s20 + $0xc0] sm:$0xff] %v2472_v44  ;;  %v2474_v59 = vpop.f32.mrb[47].mxu1 }
 0x3fc   : > { %2836 = vmatmul.mubr.f32.gmra.mrb[146].mxu1 %v6188_v46  ;;  %2910 = vst [vmem:[%s6278_s20 + $0xc8] sm:$0xff] %v2474_v59 }
 0x3fd   : > { %2841 = vmatprep.mubr.f32.mxu1 %v6191_v62 }
 0x400   : > { %2842 = vmatmul.mubr.f32.gmra.mrb[148].mxu1 %v6196_v52  ;;  %v2478_v45 = vpop.f32.mrb[48].mxu1 }
 0x401   : > { %2847 = vmatprep.mubr.f32.mxu1 %v6199_v36  ;;  %2913 = vst [vmem:[%s6278_s20 + $0xe0] sm:$0xff] %v2478_v45  ;;  %v2480_v49 = vpop.f32.mrb[49].mxu1 }
 0x402   : > { %2914 = vst [vmem:[%s6278_s20 + $0xe8] sm:$0xff] %v2480_v49 }
 0x404   : > { %2848 = vmatmul.mubr.f32.gmra.mrb[150].mxu1 %v6204_v14  ;;  %v2484_v35 = vpop.f32.mrb[50].mxu1 }
 0x405   : > { %2853 = vmatprep.mubr.f32.mxu1 %v6207_v12  ;;  %2917 = vst [vmem:[%s6278_s20 + $0x100] sm:$0xff] %v2484_v35  ;;  %v2486_v27 = vpop.f32.mrb[51].mxu1 }
 0x406   : > { %2918 = vst [vmem:[%s6278_s20 + $0x108] sm:$0xff] %v2486_v27 }
 0x408   : > { %2854 = vmatmul.mubr.f32.gmra.mrb[152].mxu1 %v6212_v26  ;;  %v2490_v54 = vpop.f32.mrb[52].mxu1 }
 0x409   : > { %2859 = vmatprep.mubr.f32.mxu1 %v6215_v29  ;;  %2921 = vst [vmem:[%s6278_s20 + $0x120] sm:$0xff] %v2490_v54  ;;  %v2492_v31 = vpop.f32.mrb[53].mxu1 }
 0x40a   : > { %2922 = vst [vmem:[%s6278_s20 + $0x128] sm:$0xff] %v2492_v31 }
 0x40c   : > { %2860 = vmatmul.mubr.f32.gmra.mrb[154].mxu1 %v6220_v19  ;;  %v2496_v24 = vpop.f32.mrb[54].mxu1 }
 0x40d   : > { %2865 = vmatprep.mubr.f32.mxu1 %v6223_v39  ;;  %2925 = vst [vmem:[%s6278_s20 + $0x140] sm:$0xff] %v2496_v24  ;;  %v2498_v41 = vpop.f32.mrb[55].mxu1 }
 0x40e   : > { %2926 = vst [vmem:[%s6278_s20 + $0x148] sm:$0xff] %v2498_v41 }
 0x410   : > { %2866 = vmatmul.mubr.f32.gmra.mrb[156].mxu1 %v6228_v18  ;;  %v2502_v33 = vpop.f32.mrb[56].mxu1 }
 0x411   : > { %2871 = vmatprep.mubr.f32.mxu1 %v6231_v5  ;;  %2929 = vst [vmem:[%s6278_s20 + $0x160] sm:$0xff] %v2502_v33  ;;  %v2504_v53 = vpop.f32.mrb[57].mxu1 }
 0x412   : > { %2930 = vst [vmem:[%s6278_s20 + $0x168] sm:$0xff] %v2504_v53 }
 0x414   : > { %2872 = vmatmul.mubr.f32.gmra.mrb[158].mxu1 %v6236_v21 }
 0x415   : > { %2877 = vmatprep.mubr.f32.mxu1 %v6239_v42 }
 0x418   : > { %2878 = vmatmul.mubr.f32.gmra.mrb[160].mxu1 %v6244_v0 }
 0x41e   : > { %v2508_v34 = vpop.f32.mrb[58].mxu1 }
 0x41f   : > { %2933 = vst [vmem:[%s6278_s20 + $0x180] sm:$0xff] %v2508_v34  ;;  %v2510_v46 = vpop.f32.mrb[59].mxu1 }
 0x420   : > { %2934 = vst [vmem:[%s6278_s20 + $0x188] sm:$0xff] %v2510_v46 }
 0x423   : > { %v2514_v62 = vpop.f32.mrb[60].mxu1 }
 0x424   : > { %2937 = vst [vmem:[%s6278_s20 + $0x1a0] sm:$0xff] %v2514_v62  ;;  %v2516_v52 = vpop.f32.mrb[61].mxu1 }
 0x425   : > { %2938 = vst [vmem:[%s6278_s20 + $0x1a8] sm:$0xff] %v2516_v52 }
 0x427   : > { %v2520_v36 = vpop.f32.mrb[62].mxu1 }
 0x428   : > { %2941 = vst [vmem:[%s6278_s20 + $0x1c0] sm:$0xff] %v2520_v36  ;;  %v2522_v14 = vpop.f32.mrb[63].mxu1 }
 0x429   : > { %2942 = vst [vmem:[%s6278_s20 + $0x1c8] sm:$0xff] %v2522_v14 }
 0x42b   : > { %v2526_v12 = vpop.f32.mrb[64].mxu1 }
 0x42c   : > { %2945 = vst [vmem:[%s6278_s20 + $0x1e0] sm:$0xff] %v2526_v12  ;;  %v2528_v26 = vpop.f32.mrb[65].mxu1 }
 0x42d   : > { %2946 = vst [vmem:[%s6278_s20 + $0x1e8] sm:$0xff] %v2528_v26 }
 0x42f   : > { %v2532_v29 = vpop.f32.mrb[66].mxu1 }
 0x430   : > { %2949 = vst [vmem:[%s6278_s20 + $0x200] sm:$0xff] %v2532_v29  ;;  %v2534_v19 = vpop.f32.mrb[67].mxu1 }
 0x431   : > { %2950 = vst [vmem:[%s6278_s20 + $0x208] sm:$0xff] %v2534_v19 }
 0x433   : > { %v2538_v39 = vpop.f32.mrb[68].mxu1 }
 0x434   : > { %2953 = vst [vmem:[%s6278_s20 + $0x220] sm:$0xff] %v2538_v39  ;;  %v2540_v18 = vpop.f32.mrb[69].mxu1 }
 0x435   : > { %2954 = vst [vmem:[%s6278_s20 + $0x228] sm:$0xff] %v2540_v18 }
 0x437   : > { %v2544_v5 = vpop.f32.mrb[70].mxu1 }
 0x438   : > { %2957 = vst [vmem:[%s6278_s20 + $0x240] sm:$0xff] %v2544_v5  ;;  %v2546_v21 = vpop.f32.mrb[71].mxu1 }
 0x439   : > { %2958 = vst [vmem:[%s6278_s20 + $0x248] sm:$0xff] %v2546_v21 }
 0x43b   : > { %v2550_v42 = vpop.f32.mrb[72].mxu1 }
 0x43c   : > { %2961 = vst [vmem:[%s6278_s20 + $0x260] sm:$0xff] %v2550_v42  ;;  %v2552_v0 = vpop.f32.mrb[73].mxu1 }
 0x43d   : > { %2962 = vst [vmem:[%s6278_s20 + $0x268] sm:$0xff] %v2552_v0 }
 0x43f   : > { %v2556_v50 = vpop.f32.mrb[74].mxu1 }
 0x440   : > { %2965 = vst [vmem:[%s6278_s20 + $0x280] sm:$0xff] %v2556_v50  ;;  %v2558_v1 = vpop.f32.mrb[75].mxu1 }
 0x441   : > { %2966 = vst [vmem:[%s6278_s20 + $0x288] sm:$0xff] %v2558_v1 }
 0x443   : > { %v2562_v56 = vpop.f32.mrb[76].mxu1 }
 0x444   : > { %2969 = vst [vmem:[%s6278_s20 + $0x2a0] sm:$0xff] %v2562_v56  ;;  %v2564_v17 = vpop.f32.mrb[77].mxu1 }
 0x445   : > { %2970 = vst [vmem:[%s6278_s20 + $0x2a8] sm:$0xff] %v2564_v17 }
 0x447   : > { %v2568_v63 = vpop.f32.mrb[78].mxu1 }
 0x448   : > { %2973 = vst [vmem:[%s6278_s20 + $0x2c0] sm:$0xff] %v2568_v63  ;;  %v2570_v30 = vpop.f32.mrb[79].mxu1 }
 0x449   : > { %2974 = vst [vmem:[%s6278_s20 + $0x2c8] sm:$0xff] %v2570_v30 }
 0x44b   : > { %v2574_v2 = vpop.f32.mrb[80].mxu1 }
 0x44c   : > { %2977 = vst [vmem:[%s6278_s20 + $0x2e0] sm:$0xff] %v2574_v2  ;;  %v2576_v20 = vpop.f32.mrb[81].mxu1 }
 0x44d   : > { %2978 = vst [vmem:[%s6278_s20 + $0x2e8] sm:$0xff] %v2576_v20 }
 0x44f   : > { %v2580_v58 = vpop.f32.mrb[82].mxu1 }
 0x450   : > { %2981 = vst [vmem:[%s6278_s20 + $0x300] sm:$0xff] %v2580_v58  ;;  %v2582_v38 = vpop.f32.mrb[83].mxu1 }
 0x451   : > { %2982 = vst [vmem:[%s6278_s20 + $0x308] sm:$0xff] %v2582_v38 }
 0x453   : > { %v2586_v13 = vpop.f32.mrb[84].mxu1 }
 0x454   : > { %2985 = vst [vmem:[%s6278_s20 + $0x320] sm:$0xff] %v2586_v13  ;;  %v2588_v57 = vpop.f32.mrb[85].mxu1 }
 0x455   : > { %2986 = vst [vmem:[%s6278_s20 + $0x328] sm:$0xff] %v2588_v57 }
 0x457   : > { %v2592_v3 = vpop.f32.mrb[86].mxu1 }
 0x458   : > { %2989 = vst [vmem:[%s6278_s20 + $0x340] sm:$0xff] %v2592_v3  ;;  %v2594_v22 = vpop.f32.mrb[87].mxu1 }
 0x459   : > { %2990 = vst [vmem:[%s6278_s20 + $0x348] sm:$0xff] %v2594_v22 }
 0x45b   : > { %v2598_v8 = vpop.f32.mrb[88].mxu1 }
 0x45c   : > { %2993 = vst [vmem:[%s6278_s20 + $0x360] sm:$0xff] %v2598_v8  ;;  %v2600_v55 = vpop.f32.mrb[89].mxu1 }
 0x45d   : > { %2994 = vst [vmem:[%s6278_s20 + $0x368] sm:$0xff] %v2600_v55 }
 0x45f   : > { %v2604_v47 = vpop.f32.mrb[90].mxu1 }
 0x460   : > { %2997 = vst [vmem:[%s6278_s20 + $0x380] sm:$0xff] %v2604_v47  ;;  %v2606_v10 = vpop.f32.mrb[91].mxu1 }
 0x461   : > { %2998 = vst [vmem:[%s6278_s20 + $0x388] sm:$0xff] %v2606_v10 }
 0x463   : > { %v2610_v51 = vpop.f32.mrb[92].mxu1 }
 0x464   : > { %3001 = vst [vmem:[%s6278_s20 + $0x3a0] sm:$0xff] %v2610_v51  ;;  %v2612_v25 = vpop.f32.mrb[93].mxu1 }
 0x465   : > { %3002 = vst [vmem:[%s6278_s20 + $0x3a8] sm:$0xff] %v2612_v25 }
 0x467   : > { %v2616_v40 = vpop.f32.mrb[94].mxu1 }
 0x468   : > { %3005 = vst [vmem:[%s6278_s20 + $0x3c0] sm:$0xff] %v2616_v40  ;;  %v2618_v32 = vpop.f32.mrb[95].mxu1 }
 0x469   : > { %3006 = vst [vmem:[%s6278_s20 + $0x3c8] sm:$0xff] %v2618_v32 }
 0x46b   : > { %v2622_v6 = vpop.f32.mrb[96].mxu1 }
 0x46c   : > { %3009 = vst [vmem:[%s6278_s20 + $0x3e0] sm:$0xff] %v2622_v6  ;;  %v2624_v16 = vpop.f32.mrb[97].mxu1 }
 0x46d   : > { %3010 = vst [vmem:[%s6278_s20 + $0x3e8] sm:$0xff] %v2624_v16 }
 0x46f   : > { %v2693_v28 = vpop.f32.mrb[98].mxu1 }
 0x470   : > { %2886 = vst [vmem:[%s6278_s20 + $0x10] sm:$0xff] %v2693_v28  ;;  %v2695_v15 = vpop.f32.mrb[99].mxu1 }
 0x471   : > { %2888 = vst.msk [vmem:[%s6278_s20 + $0x18] sm:$0xff] %vm2887_vm1, %v2695_v15 }
 0x473   : > { %v2699_v37 = vpop.f32.mrb[100].mxu1 }
 0x474   : > { %2891 = vst [vmem:[%s6278_s20 + $0x30] sm:$0xff] %v2699_v37  ;;  %v2701_v9 = vpop.f32.mrb[101].mxu1 }
 0x475   : > { %2892 = vst.msk [vmem:[%s6278_s20 + $0x38] sm:$0xff] %vm2887_vm1, %v2701_v9 }
 0x477   : > { %v2705_v61 = vpop.f32.mrb[102].mxu1 }
 0x478   : > { %2895 = vst [vmem:[%s6278_s20 + $0x50] sm:$0xff] %v2705_v61  ;;  %v2707_v23 = vpop.f32.mrb[103].mxu1 }
 0x479   : > { %2896 = vst.msk [vmem:[%s6278_s20 + $0x58] sm:$0xff] %vm2887_vm1, %v2707_v23 }
 0x47b   : > { %v2711_v7 = vpop.f32.mrb[104].mxu1 }
 0x47c   : > { %2899 = vst [vmem:[%s6278_s20 + $0x70] sm:$0xff] %v2711_v7  ;;  %v2713_v43 = vpop.f32.mrb[105].mxu1 }
 0x47d   : > { %2900 = vst.msk [vmem:[%s6278_s20 + $0x78] sm:$0xff] %vm2887_vm1, %v2713_v43 }
 0x47f   : > { %v2717_v4 = vpop.f32.mrb[106].mxu1 }
 0x480   : > { %2903 = vst [vmem:[%s6278_s20 + $0x90] sm:$0xff] %v2717_v4  ;;  %v2719_v11 = vpop.f32.mrb[107].mxu1 }
 0x481   : > { %2904 = vst.msk [vmem:[%s6278_s20 + $0x98] sm:$0xff] %vm2887_vm1, %v2719_v11 }
 0x483   : > { %v2723_v60 = vpop.f32.mrb[108].mxu1 }
 0x484   : > { %2907 = vst [vmem:[%s6278_s20 + $0xb0] sm:$0xff] %v2723_v60  ;;  %v2725_v48 = vpop.f32.mrb[109].mxu1 }
 0x485   : > { %2908 = vst.msk [vmem:[%s6278_s20 + $0xb8] sm:$0xff] %vm2887_vm1, %v2725_v48 }
 0x487   : > { %v2729_v44 = vpop.f32.mrb[110].mxu1 }
 0x488   : > { %2911 = vst [vmem:[%s6278_s20 + $0xd0] sm:$0xff] %v2729_v44  ;;  %v2731_v59 = vpop.f32.mrb[111].mxu1 }
 0x489   : > { %2912 = vst.msk [vmem:[%s6278_s20 + $0xd8] sm:$0xff] %vm2887_vm1, %v2731_v59 }
 0x48b   : > { %v2735_v45 = vpop.f32.mrb[112].mxu1 }
 0x48c   : > { %2915 = vst [vmem:[%s6278_s20 + $0xf0] sm:$0xff] %v2735_v45  ;;  %v2737_v49 = vpop.f32.mrb[113].mxu1 }
 0x48d   : > { %2916 = vst.msk [vmem:[%s6278_s20 + $0xf8] sm:$0xff] %vm2887_vm1, %v2737_v49 }
 0x48f   : > { %v2741_v35 = vpop.f32.mrb[114].mxu1 }
 0x490   : > { %2919 = vst [vmem:[%s6278_s20 + $0x110] sm:$0xff] %v2741_v35  ;;  %v2743_v27 = vpop.f32.mrb[115].mxu1 }
 0x491   : > { %2920 = vst.msk [vmem:[%s6278_s20 + $0x118] sm:$0xff] %vm2887_vm1, %v2743_v27 }
 0x493   : > { %v2747_v54 = vpop.f32.mrb[116].mxu1 }
 0x494   : > { %2923 = vst [vmem:[%s6278_s20 + $0x130] sm:$0xff] %v2747_v54  ;;  %v2749_v31 = vpop.f32.mrb[117].mxu1 }
 0x495   : > { %2924 = vst.msk [vmem:[%s6278_s20 + $0x138] sm:$0xff] %vm2887_vm1, %v2749_v31 }
 0x497   : > { %v2753_v24 = vpop.f32.mrb[118].mxu1 }
 0x498   : > { %2927 = vst [vmem:[%s6278_s20 + $0x150] sm:$0xff] %v2753_v24  ;;  %v2755_v41 = vpop.f32.mrb[119].mxu1 }
 0x499   : > { %2928 = vst.msk [vmem:[%s6278_s20 + $0x158] sm:$0xff] %vm2887_vm1, %v2755_v41 }
 0x49b   : > { %v2759_v33 = vpop.f32.mrb[120].mxu1 }
 0x49c   : > { %2931 = vst [vmem:[%s6278_s20 + $0x170] sm:$0xff] %v2759_v33  ;;  %v2761_v53 = vpop.f32.mrb[121].mxu1 }
 0x49d   : > { %2932 = vst.msk [vmem:[%s6278_s20 + $0x178] sm:$0xff] %vm2887_vm1, %v2761_v53 }
 0x49f   : > { %v2765_v34 = vpop.f32.mrb[122].mxu1 }
 0x4a0   : > { %2935 = vst [vmem:[%s6278_s20 + $0x190] sm:$0xff] %v2765_v34  ;;  %v2767_v46 = vpop.f32.mrb[123].mxu1 }
 0x4a1   : > { %2936 = vst.msk [vmem:[%s6278_s20 + $0x198] sm:$0xff] %vm2887_vm1, %v2767_v46 }
 0x4a3   : > { %v2771_v62 = vpop.f32.mrb[124].mxu1 }
 0x4a4   : > { %2939 = vst [vmem:[%s6278_s20 + $0x1b0] sm:$0xff] %v2771_v62  ;;  %v2773_v52 = vpop.f32.mrb[125].mxu1 }
 0x4a5   : > { %2940 = vst.msk [vmem:[%s6278_s20 + $0x1b8] sm:$0xff] %vm2887_vm1, %v2773_v52 }
 0x4a7   : > { %v2777_v36 = vpop.f32.mrb[126].mxu1 }
 0x4a8   : > { %2943 = vst [vmem:[%s6278_s20 + $0x1d0] sm:$0xff] %v2777_v36  ;;  %v2779_v14 = vpop.f32.mrb[127].mxu1 }
 0x4a9   : > { %2944 = vst.msk [vmem:[%s6278_s20 + $0x1d8] sm:$0xff] %vm2887_vm1, %v2779_v14 }
 0x4ab   : > { %v2783_v12 = vpop.f32.mrb[128].mxu1 }
 0x4ac   : > { %2947 = vst [vmem:[%s6278_s20 + $0x1f0] sm:$0xff] %v2783_v12  ;;  %v2785_v26 = vpop.f32.mrb[129].mxu1 }
 0x4ad   : > { %2948 = vst.msk [vmem:[%s6278_s20 + $0x1f8] sm:$0xff] %vm2887_vm1, %v2785_v26 }
 0x4af   : > { %v2789_v29 = vpop.f32.mrb[130].mxu1 }
 0x4b0   : > { %2951 = vst [vmem:[%s6278_s20 + $0x210] sm:$0xff] %v2789_v29  ;;  %v2791_v19 = vpop.f32.mrb[131].mxu1 }
 0x4b1   : > { %2952 = vst.msk [vmem:[%s6278_s20 + $0x218] sm:$0xff] %vm2887_vm1, %v2791_v19 }
 0x4b3   : > { %v2795_v39 = vpop.f32.mrb[132].mxu1 }
 0x4b4   : > { %2955 = vst [vmem:[%s6278_s20 + $0x230] sm:$0xff] %v2795_v39  ;;  %v2797_v18 = vpop.f32.mrb[133].mxu1 }
 0x4b5   : > { %2956 = vst.msk [vmem:[%s6278_s20 + $0x238] sm:$0xff] %vm2887_vm1, %v2797_v18 }
 0x4b7   : > { %v2801_v5 = vpop.f32.mrb[134].mxu1 }
 0x4b8   : > { %2959 = vst [vmem:[%s6278_s20 + $0x250] sm:$0xff] %v2801_v5  ;;  %v2803_v21 = vpop.f32.mrb[135].mxu1 }
 0x4b9   : > { %2960 = vst.msk [vmem:[%s6278_s20 + $0x258] sm:$0xff] %vm2887_vm1, %v2803_v21 }
 0x4bb   : > { %v2807_v42 = vpop.f32.mrb[136].mxu1 }
 0x4bc   : > { %2963 = vst [vmem:[%s6278_s20 + $0x270] sm:$0xff] %v2807_v42  ;;  %v2809_v0 = vpop.f32.mrb[137].mxu1 }
 0x4bd   : > { %2964 = vst.msk [vmem:[%s6278_s20 + $0x278] sm:$0xff] %vm2887_vm1, %v2809_v0 }
 0x4bf   : > { %v2813_v50 = vpop.f32.mrb[138].mxu1 }
 0x4c0   : > { %2967 = vst [vmem:[%s6278_s20 + $0x290] sm:$0xff] %v2813_v50  ;;  %v2815_v1 = vpop.f32.mrb[139].mxu1 }
 0x4c1   : > { %2968 = vst.msk [vmem:[%s6278_s20 + $0x298] sm:$0xff] %vm2887_vm1, %v2815_v1 }
 0x4c3   : > { %v2819_v56 = vpop.f32.mrb[140].mxu1 }
 0x4c4   : > { %2971 = vst [vmem:[%s6278_s20 + $0x2b0] sm:$0xff] %v2819_v56  ;;  %v2821_v17 = vpop.f32.mrb[141].mxu1 }
 0x4c5   : > { %2972 = vst.msk [vmem:[%s6278_s20 + $0x2b8] sm:$0xff] %vm2887_vm1, %v2821_v17 }
 0x4c7   : > { %v2825_v63 = vpop.f32.mrb[142].mxu1 }
 0x4c8   : > { %2975 = vst [vmem:[%s6278_s20 + $0x2d0] sm:$0xff] %v2825_v63  ;;  %v2827_v30 = vpop.f32.mrb[143].mxu1 }
 0x4c9   : > { %2976 = vst.msk [vmem:[%s6278_s20 + $0x2d8] sm:$0xff] %vm2887_vm1, %v2827_v30 }
 0x4cb   : > { %v2831_v2 = vpop.f32.mrb[144].mxu1 }
 0x4cc   : > { %2979 = vst [vmem:[%s6278_s20 + $0x2f0] sm:$0xff] %v2831_v2  ;;  %v2833_v20 = vpop.f32.mrb[145].mxu1 }
 0x4cd   : > { %2980 = vst.msk [vmem:[%s6278_s20 + $0x2f8] sm:$0xff] %vm2887_vm1, %v2833_v20 }
 0x4cf   : > { %v2837_v58 = vpop.f32.mrb[146].mxu1 }
 0x4d0   : > { %2983 = vst [vmem:[%s6278_s20 + $0x310] sm:$0xff] %v2837_v58  ;;  %v2839_v38 = vpop.f32.mrb[147].mxu1 }
 0x4d1   : > { %2984 = vst.msk [vmem:[%s6278_s20 + $0x318] sm:$0xff] %vm2887_vm1, %v2839_v38 }
 0x4d3   : > { %v2843_v13 = vpop.f32.mrb[148].mxu1 }
 0x4d4   : > { %2987 = vst [vmem:[%s6278_s20 + $0x330] sm:$0xff] %v2843_v13  ;;  %v2845_v57 = vpop.f32.mrb[149].mxu1 }
 0x4d5   : > { %2988 = vst.msk [vmem:[%s6278_s20 + $0x338] sm:$0xff] %vm2887_vm1, %v2845_v57 }
 0x4d7   : > { %v2849_v3 = vpop.f32.mrb[150].mxu1 }
 0x4d8   : > { %2991 = vst [vmem:[%s6278_s20 + $0x350] sm:$0xff] %v2849_v3  ;;  %v2851_v22 = vpop.f32.mrb[151].mxu1 }
 0x4d9   : > { %2992 = vst.msk [vmem:[%s6278_s20 + $0x358] sm:$0xff] %vm2887_vm1, %v2851_v22 }
 0x4db   : > { %v2855_v8 = vpop.f32.mrb[152].mxu1 }
 0x4dc   : > { %2995 = vst [vmem:[%s6278_s20 + $0x370] sm:$0xff] %v2855_v8  ;;  %v2857_v55 = vpop.f32.mrb[153].mxu1 }
 0x4dd   : > { %2996 = vst.msk [vmem:[%s6278_s20 + $0x378] sm:$0xff] %vm2887_vm1, %v2857_v55 }
 0x4df   : > { %v2861_v47 = vpop.f32.mrb[154].mxu1 }
 0x4e0   : > { %2999 = vst [vmem:[%s6278_s20 + $0x390] sm:$0xff] %v2861_v47  ;;  %v2863_v10 = vpop.f32.mrb[155].mxu1 }
 0x4e1   : > { %3000 = vst.msk [vmem:[%s6278_s20 + $0x398] sm:$0xff] %vm2887_vm1, %v2863_v10 }
 0x4e3   : > { %v2867_v51 = vpop.f32.mrb[156].mxu1 }
 0x4e4   : > { %3003 = vst [vmem:[%s6278_s20 + $0x3b0] sm:$0xff] %v2867_v51  ;;  %v2869_v25 = vpop.f32.mrb[157].mxu1 }
 0x4e5   : > { %3004 = vst.msk [vmem:[%s6278_s20 + $0x3b8] sm:$0xff] %vm2887_vm1, %v2869_v25 }
 0x4e7   : > { %v2873_v40 = vpop.f32.mrb[158].mxu1 }
 0x4e8   : > { %3007 = vst [vmem:[%s6278_s20 + $0x3d0] sm:$0xff] %v2873_v40  ;;  %v2875_v32 = vpop.f32.mrb[159].mxu1 }
 0x4e9   : > { %3008 = vst.msk [vmem:[%s6278_s20 + $0x3d8] sm:$0xff] %vm2887_vm1, %v2875_v32 }
 0x4eb   : > { %v2879_v6 = vpop.f32.mrb[160].mxu1 }
 0x4ec   : > { %3011 = vst [vmem:[%s6278_s20 + $0x3f0] sm:$0xff] %v2879_v6  ;;  %v2881_v16 = vpop.f32.mrb[161].mxu1 }
 0x4ed   : > { %3012 = vst.msk [vmem:[%s6278_s20 + $0x3f8] sm:$0xff] %vm2887_vm1, %v2881_v16 }
 0x4ee PF: > { %s16_s21 = sadd.s32 1, %s3807_s21  }
 0x4ef   : > { %p13_p4 = scmp.ge.s32.totalorder %s16_s21, 4  }
 0x4f1   :  { %15 = sbr.rel (!%p13_p4) target bundleno = 1 (0x1), region = 74 }

</bundles_post_ra>
